<compile_context>
chip_gen: v5e
topology: v5e:2x2
jax: 0.10.0
libtpu: 0.0.40
codegen_flags: <defaults>
</compile_context>

<pallas_src>
import functools
from collections import namedtuple

import numpy as np
import jax
import jax.numpy as jnp
from jax.experimental import pallas as pl
from jax.experimental.pallas import tpu as pltpu

RRELU_SLOPE = (1.0 / 8.0 + 1.0 / 3.0) / 2.0   # F.rrelu eval-path slope
BN_EPS = 1e-5
MAX_LANE_TILE = 2048                           # lane-tile cap (multiple of 128)
COMPUTE_DTYPE = jnp.bfloat16                   # storage / MXU operand dtype


def _round_up(a, b):
    return (a + b - 1) // b * b


def _pick_lane_tile(q, max_tq=MAX_LANE_TILE):
    """Largest 128-multiple tile; for small images one tile covers the image."""
    qp = _round_up(q, 128)
    if qp <= max_tq:
        return qp, qp                          # qt == 1: no inner grid axis work
    tq = max(t for t in range(128, max_tq + 1, 128) if qp % t == 0)
    if tq < 512:
        tq = max_tq                            # awkward factorization: pad tail
    return tq, _round_up(q, tq)


# Flat-padded geometry for one spatial size.
#   wp   = W + 2 (padded row length), q = H*wp flat positions (2 junk cols/row),
#   qpad = q rounded up to the lane tile, pp = qpad + halo (halo = 2*wp + 2 is
#   the largest shifted read of either conv formulation).
Geom = namedtuple("Geom", "h w wp q tq qpad qt halo pp")


def make_geom(h, w):
    wp = w + 2
    q = h * wp
    tq, qpad = _pick_lane_tile(q)
    halo = 2 * wp + 2
    return Geom(h=h, w=w, wp=wp, q=q, tq=tq, qpad=qpad, qt=qpad // tq,
                halo=halo, pp=qpad + halo)


@functools.lru_cache(maxsize=1)
def _vmem_limit_bytes():
    cap = 64 * 1024 * 1024
    try:
        info = pltpu.get_tpu_info()
        cap = int(getattr(info, "vmem_capacity_bytes", cap)) or cap
    except Exception:
        pass
    # ~3/4 of physical: 48 MiB on v7x (64 MiB parts), 96 MiB on v5e/v6e (128 MiB).
    return max(32 * 1024 * 1024, (cap * 3) // 4)


def _cparams():
    # Batch axis (N) is the megacore-parallel axis; keep N >= 2 on v7x.
    return pltpu.CompilerParams(
        dimension_semantics=("parallel", "parallel"),
        vmem_limit_bytes=_vmem_limit_bytes())


def _cost(flops, bytes_accessed):
    try:
        return pl.CostEstimate(flops=int(flops), transcendentals=0,
                               bytes_accessed=int(bytes_accessed))
    except Exception:
        return None


# --------------------------- XLA data-movement glue --------------------------

def flat_pad(x_nchw, g):
    """Zero-pad spatially by 1, flatten (H+2, W+2) row-major, pad tail to pp."""
    n, c, h, w = x_nchw.shape
    xp = jnp.pad(x_nchw, ((0, 0), (0, 0), (1, 1), (1, 1)))
    xf = xp.reshape(n, c, (h + 2) * g.wp)
    return jnp.pad(xf, ((0, 0), (0, 0), (0, g.pp - (h + 2) * g.wp)))


def unflatten(yf, g):
    n, c, _ = yf.shape
    return yf[:, :, :g.q].reshape(n, c, g.h, g.wp)[:, :, :, :g.w]


def valid_mask(g):
    qs = np.arange(g.qpad)
    m = ((qs % g.wp) < g.w) & (qs < g.q)
    return jnp.asarray(m[None, :], dtype=jnp.float32)


def interleave_phases(res, g):
    """(N, 4, C, qpad) phase-major result -> (N, C, 2H, 2W); ph = 2*py + px."""
    n, _, c, _ = res.shape
    r = res[:, :, :, :g.q].reshape(n, 2, 2, c, g.h, g.wp)[..., :g.w]
    r = jnp.transpose(r, (0, 3, 4, 1, 5, 2))          # (N, C, H, 2, W, 2)
    return r.reshape(n, c, 2 * g.h, 2 * g.w)


# ------------------------------ weight packing --------------------------------

def pack_conv_weights(w_oihw):
    """(Cout, Cin, 3, 3) -> (Cout, 9*Cin); column block k = kh*3 + kw."""
    cout, cin = w_oihw.shape[:2]
    return jnp.transpose(w_oihw, (0, 2, 3, 1)).reshape(cout, 9 * cin)


# Row/col tap groups of the 3x3 kernel, indexed by output-pixel parity: a 3x3
# conv on the nearest-x2 upsample collapses to a 2x2 conv on the original
# padded image, per output phase (py, px).
_PAR_GROUPS = ([(0,), (1, 2)], [(0, 1), (2,)])


def pack_upsample_weights(w_oihw):
    """Effective weights for conv-on-x2-upsample: (4, Cout, 4*Cin); ph=2*py+px."""
    cout, cin = w_oihw.shape[:2]
    phases = []
    for py in range(2):
        for px in range(2):
            taps = []
            for dr in range(2):
                for dc in range(2):
                    wsum = 0.0
                    for ky in _PAR_GROUPS[py][dr]:
                        for kx in _PAR_GROUPS[px][dc]:
                            wsum = wsum + w_oihw[:, :, ky, kx]
                    taps.append(wsum)                      # (Cout, Cin)
            phases.append(jnp.stack(taps, axis=1).reshape(cout, 4 * cin))
    return jnp.stack(phases, axis=0)


def _phase_shifts(wp):
    """Flat read offsets per phase, matching tap order t = 2*dr + dc."""
    return tuple(tuple((py + dr) * wp + (px + dc)
                       for dr in range(2) for dc in range(2))
                 for py in range(2) for px in range(2))


# ------------------------------ Pallas kernels --------------------------------

def _make_conv1_kernel(*, shifts, tq, halo, cin):
    """Direct 3x3 conv: pack 9 shifted windows -> one K=9*Cin dot (+BN stats)."""

    def kernel(w_ref, m_ref, x_ref, y_ref, st_ref, pack_ref):
        q0 = pl.multiple_of(pl.program_id(1) * tq, tq)
        xwin = x_ref[:, pl.ds(q0, tq + halo)]              # one window load
        for k, s in enumerate(shifts):                     # static shift slices
            pack_ref[k * cin:(k + 1) * cin, :] = xwin[:, s:s + tq]
        acc = jnp.dot(w_ref[...], pack_ref[...],           # single MXU contraction
                      preferred_element_type=jnp.float32)
        y_ref[...] = acc.astype(y_ref.dtype)
        yv = acc * m_ref[...]                              # masked partial BN stats
        st_ref[...] = jnp.concatenate(
            [jnp.sum(yv, axis=1, keepdims=True),
             jnp.sum(yv * yv, axis=1, keepdims=True)], axis=1)

    return kernel


def _make_conv23_kernel(*, phase_shifts, tq, halo, cmid, cin):
    """Fused {conv2 on x2-up(h1)} + {conv3 skip on x2-up(x)}, 4 output phases."""

    def kernel(w2_ref, w3_ref, b3_ref, m_ref, h_ref, x_ref,
               y2_ref, sk_ref, st_ref, hpack_ref, xpack_ref):
        q0 = pl.multiple_of(pl.program_id(1) * tq, tq)
        hwin = h_ref[:, pl.ds(q0, tq + halo)]
        xwin = x_ref[:, pl.ds(q0, tq + halo)]
        w2 = w2_ref[...]
        w3 = w3_ref[...]
        b3 = b3_ref[...]
        mask = m_ref[...]
        cout = y2_ref.shape[1]
        ssum = jnp.zeros((cout, 1), jnp.float32)
        ssq = jnp.zeros((cout, 1), jnp.float32)
        for ph, shifts in enumerate(phase_shifts):
            for t, s in enumerate(shifts):                 # 4 shifted windows/phase
                hpack_ref[t * cmid:(t + 1) * cmid, :] = hwin[:, s:s + tq]
                xpack_ref[t * cin:(t + 1) * cin, :] = xwin[:, s:s + tq]
            acc2 = jnp.dot(w2[ph], hpack_ref[...],
                           preferred_element_type=jnp.float32)
            acc3 = jnp.dot(w3[ph], xpack_ref[...],
                           preferred_element_type=jnp.float32) + b3
            y2_ref[ph] = acc2.astype(y2_ref.dtype)
            sk_ref[ph] = acc3.astype(sk_ref.dtype)
            yv = acc2 * mask
            ssum = ssum + jnp.sum(yv, axis=1, keepdims=True)
            ssq = ssq + jnp.sum(yv * yv, axis=1, keepdims=True)
        st_ref[...] = jnp.concatenate([ssum, ssq], axis=1)

    return kernel


def _bn_act_kernel(p_ref, y_ref, o_ref):
    scale = p_ref[:, 0:1]
    shift = p_ref[:, 1:2]
    z = y_ref[...].astype(jnp.float32) * scale + shift     # f32 math (v5e-safe)
    o_ref[...] = jnp.where(z >= 0, z, RRELU_SLOPE * z).astype(o_ref.dtype)


def _bn_act_skip_kernel(p_ref, y_ref, s_ref, o_ref):
    scale = p_ref[:, 0:1]
    shift = p_ref[:, 1:2]
    z = (y_ref[...].astype(jnp.float32) * scale + shift
         + s_ref[...].astype(jnp.float32))
    o_ref[...] = jnp.where(z >= 0, z, RRELU_SLOPE * z).astype(o_ref.dtype)


# ------------------------------ pallas_call wrappers ---------------------------

def conv1_pass(xf, w_oihw, g):
    n, cin, pp = xf.shape
    assert pp == g.pp
    cout = w_oihw.shape[0]
    shifts = tuple(kh * g.wp + kw for kh in range(3) for kw in range(3))
    wk = pack_conv_weights(w_oihw).astype(COMPUTE_DTYPE)
    mask = valid_mask(g)

    kernel = _make_conv1_kernel(shifts=shifts, tq=g.tq, halo=g.halo, cin=cin)
    flops = 2 * 9 * cin * cout * g.qpad * n
    bytes_acc = (xf.size * xf.dtype.itemsize + wk.size * 2
                 + n * cout * g.qpad * 2 + n * g.qt * cout * 2 * 4)

    # Full per-image flat input stays resident across the lane-tile axis
    # (index_map ignores qi) -> one DMA per image, no HBM im2col.
    # TODO(synk): for very large images switch to row-band tiling with a
    # manual halo DMA so the resident block stays inside the VMEM budget.
    y, stats = pl.pallas_call(
        kernel,
        out_shape=(jax.ShapeDtypeStruct((n, cout, g.qpad), COMPUTE_DTYPE),
                   jax.ShapeDtypeStruct((n, g.qt, cout, 2), jnp.float32)),
        grid=(n, g.qt),
        in_specs=[pl.BlockSpec((cout, 9 * cin), lambda ni, qi: (0, 0)),
                  pl.BlockSpec((1, g.tq), lambda ni, qi: (0, qi)),
                  pl.BlockSpec((None, cin, pp), lambda ni, qi: (ni, 0, 0))],
        out_specs=(pl.BlockSpec((None, cout, g.tq), lambda ni, qi: (ni, 0, qi)),
                   pl.BlockSpec((None, None, cout, 2),
                                lambda ni, qi: (ni, qi, 0, 0))),
        scratch_shapes=[pltpu.VMEM((9 * cin, g.tq), COMPUTE_DTYPE)],
        compiler_params=_cparams(),
        cost_estimate=_cost(flops, bytes_acc),
    )(wk, mask, xf)
    return y, stats


def conv23_pass(h1f, xf, w2_oihw, w3_oihw, b3, g):
    n, cmid, pp = h1f.shape
    _, cin, _ = xf.shape
    assert pp == g.pp and xf.shape[2] == g.pp
    cout = w2_oihw.shape[0]
    w2p = pack_upsample_weights(w2_oihw).astype(COMPUTE_DTYPE)
    w3p = pack_upsample_weights(w3_oihw).astype(COMPUTE_DTYPE)
    b3p = b3.reshape(cout, 1).astype(jnp.float32)
    mask = valid_mask(g)
    pshifts = _phase_shifts(g.wp)

    kernel = _make_conv23_kernel(phase_shifts=pshifts, tq=g.tq, halo=g.halo,
                                 cmid=cmid, cin=cin)
    flops = 2 * 4 * 4 * (cmid + cin) * cout * g.qpad * n
    bytes_acc = (h1f.size * h1f.dtype.itemsize + xf.size * xf.dtype.itemsize
                 + 2 * n * 4 * cout * g.qpad * 2 + n * g.qt * cout * 2 * 4)

    y2, skip, stats = pl.pallas_call(
        kernel,
        out_shape=(jax.ShapeDtypeStruct((n, 4, cout, g.qpad), COMPUTE_DTYPE),
                   jax.ShapeDtypeStruct((n, 4, cout, g.qpad), COMPUTE_DTYPE),
                   jax.ShapeDtypeStruct((n, g.qt, cout, 2), jnp.float32)),
        grid=(n, g.qt),
        in_specs=[pl.BlockSpec((4, cout, 4 * cmid), lambda ni, qi: (0, 0, 0)),
                  pl.BlockSpec((4, cout, 4 * cin), lambda ni, qi: (0, 0, 0)),
                  pl.BlockSpec((cout, 1), lambda ni, qi: (0, 0)),
                  pl.BlockSpec((1, g.tq), lambda ni, qi: (0, qi)),
                  pl.BlockSpec((None, cmid, pp), lambda ni, qi: (ni, 0, 0)),
                  pl.BlockSpec((None, cin, pp), lambda ni, qi: (ni, 0, 0))],
        out_specs=(pl.BlockSpec((None, 4, cout, g.tq),
                                lambda ni, qi: (ni, 0, 0, qi)),
                   pl.BlockSpec((None, 4, cout, g.tq),
                                lambda ni, qi: (ni, 0, 0, qi)),
                   pl.BlockSpec((None, None, cout, 2),
                                lambda ni, qi: (ni, qi, 0, 0))),
        scratch_shapes=[pltpu.VMEM((4 * cmid, g.tq), COMPUTE_DTYPE),
                        pltpu.VMEM((4 * cin, g.tq), COMPUTE_DTYPE)],
        compiler_params=_cparams(),
        cost_estimate=_cost(flops, bytes_acc),
    )(w2p, w3p, b3p, mask, h1f, xf)
    return y2, skip, stats


def bn_scale_shift(stats, gamma, beta, count):
    """Reduce per-tile partial stats -> per-channel (scale, shift), packed (C,2)."""
    s = jnp.sum(stats.astype(jnp.float32), axis=(0, 1))    # (C, 2)
    mean = s[:, 0] / count
    var = s[:, 1] / count - mean * mean                    # biased var (training BN)
    scale = gamma * jax.lax.rsqrt(var + BN_EPS)
    shift = beta - mean * scale
    return jnp.stack([scale, shift], axis=1)               # (C, 2)


def bn_act_pass(yf, scale_shift, g, out_dtype):
    n, c, qpad = yf.shape
    assert qpad == g.qpad
    return pl.pallas_call(
        _bn_act_kernel,
        out_shape=jax.ShapeDtypeStruct((n, c, qpad), out_dtype),
        grid=(n, g.qt),
        in_specs=[pl.BlockSpec((c, 2), lambda ni, qi: (0, 0)),
                  pl.BlockSpec((None, c, g.tq), lambda ni, qi: (ni, 0, qi))],
        out_specs=pl.BlockSpec((None, c, g.tq), lambda ni, qi: (ni, 0, qi)),
        compiler_params=_cparams(),
    )(scale_shift.astype(jnp.float32), yf)


def bn_act_skip_pass(yf, skipf, scale_shift, g, out_dtype):
    n, _, c, qpad = yf.shape
    assert qpad == g.qpad
    return pl.pallas_call(
        _bn_act_skip_kernel,
        out_shape=jax.ShapeDtypeStruct((n, 4, c, qpad), out_dtype),
        grid=(n, g.qt),
        in_specs=[pl.BlockSpec((c, 2), lambda ni, qi: (0, 0)),
                  pl.BlockSpec((None, 4, c, g.tq), lambda ni, qi: (ni, 0, 0, qi)),
                  pl.BlockSpec((None, 4, c, g.tq), lambda ni, qi: (ni, 0, 0, qi))],
        out_specs=pl.BlockSpec((None, 4, c, g.tq), lambda ni, qi: (ni, 0, 0, qi)),
        compiler_params=_cparams(),
    )(scale_shift.astype(jnp.float32), yf, skipf)


# --------------------------------- forward ------------------------------------

@jax.jit
def res_up_forward(x_nchw, params):
    # TODO(synk): only scale_factor=2 (module default) is supported — the
    # nearest upsample is folded analytically into the stage-2 conv phases.
    n, cin, h, w = x_nchw.shape
    g = make_geom(h, w)

    xf = flat_pad(x_nchw.astype(COMPUTE_DTYPE), g)              # (N, Cin, pp) bf16

    # ---- stage 1: conv1 (+ fused partial BN stats), then BN1 + rrelu --------
    # conv1/conv2 biases dropped: exactly cancelled by training-mode BN mean.
    h1, st1 = conv1_pass(xf, params["w1"], g)
    p1 = bn_scale_shift(st1, params["g1"], params["be1"], n * h * w)
    h1n = bn_act_pass(h1, p1, g, COMPUTE_DTYPE)                 # (N, Cmid, qpad)

    # Re-pad the stage-1 output at ORIGINAL resolution (cheap XLA glue); the
    # 4x upsampled tensors are never materialised.
    h1f = flat_pad(unflatten(h1n, g), g)                        # (N, Cmid, pp)

    # ---- stage 2: fused {conv2, conv3-skip} on the x2-upsampled grid --------
    y2, skip, st2 = conv23_pass(h1f, xf, params["w2"], params["w3"],
                                params["b3"], g)
    p2 = bn_scale_shift(st2, params["g2"], params["be2"], n * 4 * h * w)
    outf = bn_act_skip_pass(y2, skip, p2, g, jnp.float32)       # (N,4,Cout,qpad)

    return interleave_phases(outf, g)                           # (N, Cout, 2H, 2W)


# ------------------------- pure-JAX reference check ---------------------------

def ref_forward(x, p, scale=2):
    def conv(x, w, b):
        y = jax.lax.conv_general_dilated(
            x, w, window_strides=(1, 1), padding=((1, 1), (1, 1)),
            dimension_numbers=("NCHW", "OIHW", "NCHW"),
            precision=jax.lax.Precision.HIGHEST)
        return y + b[None, :, None, None]

    def bn(y, g, be):
        mean = jnp.mean(y, axis=(0, 2, 3), keepdims=True)
        var = jnp.mean((y - mean) ** 2, axis=(0, 2, 3), keepdims=True)
        return ((y - mean) * jax.lax.rsqrt(var + BN_EPS)
                * g[None, :, None, None] + be[None, :, None, None])

    def up(y):
        return jnp.repeat(jnp.repeat(y, scale, axis=2), scale, axis=3)

    def rrelu(y):
        return jnp.where(y >= 0, y, RRELU_SLOPE * y)

    skip = conv(up(x), p["w3"], p["b3"])
    h = rrelu(bn(conv(x, p["w1"], p["b1"]), p["g1"], p["be1"]))
    h = up(h)
    h = bn(conv(h, p["w2"], p["b2"]), p["g2"], p["be2"])
    return rrelu(h + skip)


# ----------------------------------- main --------------------------------------

if __name__ == "__main__":
    channel_in, channel_out = 4, 8
    N, H, W = 2, 16, 16
    cmid = channel_out // 2

    key = jax.random.PRNGKey(0)
    ks = jax.random.split(key, 11)
    params = {
        "w1": 0.1 * jax.random.normal(ks[0], (cmid, channel_in, 3, 3), jnp.float32),
        "b1": 0.1 * jax.random.normal(ks[1], (cmid,), jnp.float32),
        "g1": 1.0 + 0.1 * jax.random.normal(ks[2], (cmid,), jnp.float32),
        "be1": 0.1 * jax.random.normal(ks[3], (cmid,), jnp.float32),
        "w2": 0.1 * jax.random.normal(ks[4], (channel_out, cmid, 3, 3), jnp.float32),
        "b2": 0.1 * jax.random.normal(ks[5], (channel_out,), jnp.float32),
        "g2": 1.0 + 0.1 * jax.random.normal(ks[6], (channel_out,), jnp.float32),
        "be2": 0.1 * jax.random.normal(ks[7], (channel_out,), jnp.float32),
        "w3": 0.1 * jax.random.normal(ks[8], (channel_out, channel_in, 3, 3), jnp.float32),
        "b3": 0.1 * jax.random.normal(ks[9], (channel_out,), jnp.float32),
    }
    x = jax.random.normal(ks[10], (N, channel_in, H, W), jnp.float32)

    out = jax.block_until_ready(res_up_forward(x, params))
    assert out.shape == (N, channel_out, 2 * H, 2 * W), out.shape

    ref = jax.block_until_ready(ref_forward(x, params))
    # bf16 storage / MXU operands (f32 accumulation) -> slightly looser tol.
    np.testing.assert_allclose(np.asarray(out), np.asarray(ref),
                               rtol=4e-2, atol=4e-2)
    print("KERNEL_OK")
</pallas_src>

<mosaic_0001>
module attributes {stable_mosaic.version = 11 : i64} {
  func.func @kernel(%arg0: i32, %arg1: i32, %arg2: memref<4x36xbf16, #tpu.memory_space<vmem>>, %arg3: memref<1x384xf32, #tpu.memory_space<vmem>>, %arg4: memref<1x4x422xbf16, #tpu.memory_space<vmem>>, %arg5: memref<1x4x384xbf16, #tpu.memory_space<vmem>>, %arg6: memref<1x1x4x2xf32, #tpu.memory_space<vmem>>, %arg7: memref<36x384xbf16, #tpu.memory_space<vmem>>) attributes {dimension_semantics = [#tpu.dimension_semantics<parallel>, #tpu.dimension_semantics<parallel>], iteration_bounds = array<i64: 2, 1>, scalar_prefetch = 0 : i64, scratch_operands = 1 : i64, tpu.core_type = #tpu.core_type<tc>, window_params = [{pipeline_mode = #tpu.pipeline_mode<synchronous>, transform_indices = @transform_0, window_bounds = array<i64: 4, 36>}, {transform_indices = @transform_1, window_bounds = array<i64: 1, 384>}, {transform_indices = @transform_2, window_bounds = array<i64: 1, 4, 422>}, {transform_indices = @transform_3, window_bounds = array<i64: 1, 4, 384>}, {transform_indices = @transform_4, window_bounds = array<i64: 1, 1, 4, 2>}]} {
    %c384_i32 = arith.constant 384 : i32
    %0 = arith.muli %arg1, %c384_i32 : i32
    %1 = tpu.assume_multiple %0, 384 : i32
    %c0 = arith.constant 0 : index
    %c0_0 = arith.constant 0 : index
    %2 = arith.index_cast %1 : i32 to index
    %3 = vector.load %arg4[%c0, %c0_0, %2] : memref<1x4x422xbf16, #tpu.memory_space<vmem>>, vector<1x4x422xbf16>
    %4 = vector.shape_cast %3 : vector<1x4x422xbf16> to vector<4x422xbf16>
    %5 = vector.extract_strided_slice %4 {offsets = [0, 0], sizes = [4, 384], strides = [1, 1]} : vector<4x422xbf16> to vector<4x384xbf16>
    %c0_1 = arith.constant 0 : index
    %c0_2 = arith.constant 0 : index
    %6 = vector.load %arg7[%c0_1, %c0_2] : memref<36x384xbf16, #tpu.memory_space<vmem>>, vector<4x384xbf16>
    tpu.vector_store %arg7[%c0_1, %c0_2], %5 {strides = array<i32>} : memref<36x384xbf16, #tpu.memory_space<vmem>>, vector<4x384xbf16>,
    %7 = vector.extract_strided_slice %4 {offsets = [0, 1], sizes = [4, 384], strides = [1, 1]} : vector<4x422xbf16> to vector<4x384xbf16>
    %c4 = arith.constant 4 : index
    %c0_3 = arith.constant 0 : index
    %8 = vector.load %arg7[%c4, %c0_3] : memref<36x384xbf16, #tpu.memory_space<vmem>>, vector<4x384xbf16>
    tpu.vector_store %arg7[%c4, %c0_3], %7 {strides = array<i32>} : memref<36x384xbf16, #tpu.memory_space<vmem>>, vector<4x384xbf16>,
    %9 = vector.extract_strided_slice %4 {offsets = [0, 2], sizes = [4, 384], strides = [1, 1]} : vector<4x422xbf16> to vector<4x384xbf16>
    %c8 = arith.constant 8 : index
    %c0_4 = arith.constant 0 : index
    %10 = vector.load %arg7[%c8, %c0_4] : memref<36x384xbf16, #tpu.memory_space<vmem>>, vector<4x384xbf16>
    tpu.vector_store %arg7[%c8, %c0_4], %9 {strides = array<i32>} : memref<36x384xbf16, #tpu.memory_space<vmem>>, vector<4x384xbf16>,
    %11 = vector.extract_strided_slice %4 {offsets = [0, 18], sizes = [4, 384], strides = [1, 1]} : vector<4x422xbf16> to vector<4x384xbf16>
    %c12 = arith.constant 12 : index
    %c0_5 = arith.constant 0 : index
    %12 = vector.load %arg7[%c12, %c0_5] : memref<36x384xbf16, #tpu.memory_space<vmem>>, vector<4x384xbf16>
    tpu.vector_store %arg7[%c12, %c0_5], %11 {strides = array<i32>} : memref<36x384xbf16, #tpu.memory_space<vmem>>, vector<4x384xbf16>,
    %13 = vector.extract_strided_slice %4 {offsets = [0, 19], sizes = [4, 384], strides = [1, 1]} : vector<4x422xbf16> to vector<4x384xbf16>
    %c16 = arith.constant 16 : index
    %c0_6 = arith.constant 0 : index
    %14 = vector.load %arg7[%c16, %c0_6] : memref<36x384xbf16, #tpu.memory_space<vmem>>, vector<4x384xbf16>
    tpu.vector_store %arg7[%c16, %c0_6], %13 {strides = array<i32>} : memref<36x384xbf16, #tpu.memory_space<vmem>>, vector<4x384xbf16>,
    %15 = vector.extract_strided_slice %4 {offsets = [0, 20], sizes = [4, 384], strides = [1, 1]} : vector<4x422xbf16> to vector<4x384xbf16>
    %c20 = arith.constant 20 : index
    %c0_7 = arith.constant 0 : index
    %16 = vector.load %arg7[%c20, %c0_7] : memref<36x384xbf16, #tpu.memory_space<vmem>>, vector<4x384xbf16>
    tpu.vector_store %arg7[%c20, %c0_7], %15 {strides = array<i32>} : memref<36x384xbf16, #tpu.memory_space<vmem>>, vector<4x384xbf16>,
    %17 = vector.extract_strided_slice %4 {offsets = [0, 36], sizes = [4, 384], strides = [1, 1]} : vector<4x422xbf16> to vector<4x384xbf16>
    %c24 = arith.constant 24 : index
    %c0_8 = arith.constant 0 : index
    %18 = vector.load %arg7[%c24, %c0_8] : memref<36x384xbf16, #tpu.memory_space<vmem>>, vector<4x384xbf16>
    tpu.vector_store %arg7[%c24, %c0_8], %17 {strides = array<i32>} : memref<36x384xbf16, #tpu.memory_space<vmem>>, vector<4x384xbf16>,
    %19 = vector.extract_strided_slice %4 {offsets = [0, 37], sizes = [4, 384], strides = [1, 1]} : vector<4x422xbf16> to vector<4x384xbf16>
    %c28 = arith.constant 28 : index
    %c0_9 = arith.constant 0 : index
    %20 = vector.load %arg7[%c28, %c0_9] : memref<36x384xbf16, #tpu.memory_space<vmem>>, vector<4x384xbf16>
    tpu.vector_store %arg7[%c28, %c0_9], %19 {strides = array<i32>} : memref<36x384xbf16, #tpu.memory_space<vmem>>, vector<4x384xbf16>,
    %21 = vector.extract_strided_slice %4 {offsets = [0, 38], sizes = [4, 384], strides = [1, 1]} : vector<4x422xbf16> to vector<4x384xbf16>
    %c32 = arith.constant 32 : index
    %c0_10 = arith.constant 0 : index
    %22 = vector.load %arg7[%c32, %c0_10] : memref<36x384xbf16, #tpu.memory_space<vmem>>, vector<4x384xbf16>
    tpu.vector_store %arg7[%c32, %c0_10], %21 {strides = array<i32>} : memref<36x384xbf16, #tpu.memory_space<vmem>>, vector<4x384xbf16>,
    %c0_11 = arith.constant 0 : index
    %c0_12 = arith.constant 0 : index
    %23 = vector.load %arg2[%c0_11, %c0_12] : memref<4x36xbf16, #tpu.memory_space<vmem>>, vector<4x36xbf16>
    %c0_13 = arith.constant 0 : index
    %c0_14 = arith.constant 0 : index
    %24 = vector.load %arg7[%c0_13, %c0_14] : memref<36x384xbf16, #tpu.memory_space<vmem>>, vector<36x384xbf16>
    %cst = arith.constant dense<0.000000e+00> : vector<4x384xf32>
    %25 = tpu.matmul %23, %24, %cst {dimension_numbers = #tpu.dot_dimension_numbers<[1], [0], [0], [1], [0, 0, 1, 1], [], []>} : vector<4x36xbf16>, vector<36x384xbf16>, vector<4x384xf32> -> vector<4x384xf32>
    %26 = arith.truncf %25 : vector<4x384xf32> to vector<4x384xbf16>
    %c0_15 = arith.constant 0 : index
    %c0_16 = arith.constant 0 : index
    %c0_17 = arith.constant 0 : index
    %27 = vector.load %arg5[%c0_15, %c0_16, %c0_17] : memref<1x4x384xbf16, #tpu.memory_space<vmem>>, vector<1x4x384xbf16>
    %28 = vector.shape_cast %27 : vector<1x4x384xbf16> to vector<4x384xbf16>
    %29 = vector.shape_cast %26 : vector<4x384xbf16> to vector<1x4x384xbf16>
    tpu.vector_store %arg5[%c0_15, %c0_16, %c0_17], %29 {strides = array<i32>} : memref<1x4x384xbf16, #tpu.memory_space<vmem>>, vector<1x4x384xbf16>,
    %c0_18 = arith.constant 0 : index
    %c0_19 = arith.constant 0 : index
    %30 = vector.load %arg3[%c0_18, %c0_19] : memref<1x384xf32, #tpu.memory_space<vmem>>, vector<1x384xf32>
    %31 = vector.broadcast %30 : vector<1x384xf32> to vector<4x384xf32>
    %32 = arith.mulf %25, %31 : vector<4x384xf32>
    %cst_20 = arith.constant dense<0.000000e+00> : vector<4xf32>
    %33 = vector.multi_reduction <add>, %32, %cst_20 [1] : vector<4x384xf32> to vector<4xf32>
    %34 = vector.shape_cast %33 : vector<4xf32> to vector<4x1xf32>
    %35 = arith.mulf %32, %32 : vector<4x384xf32>
    %cst_21 = arith.constant dense<0.000000e+00> : vector<4xf32>
    %36 = vector.multi_reduction <add>, %35, %cst_21 [1] : vector<4x384xf32> to vector<4xf32>
    %37 = vector.shape_cast %36 : vector<4xf32> to vector<4x1xf32>
    %38 = tpu.concatenate %34, %37 in 1 : vector<4x1xf32>, vector<4x1xf32> -> vector<4x2xf32>
    %c0_22 = arith.constant 0 : index
    %c0_23 = arith.constant 0 : index
    %c0_24 = arith.constant 0 : index
    %c0_25 = arith.constant 0 : index
    %39 = vector.load %arg6[%c0_22, %c0_23, %c0_24, %c0_25] : memref<1x1x4x2xf32, #tpu.memory_space<vmem>>, vector<1x1x4x2xf32>
    %40 = vector.shape_cast %39 : vector<1x1x4x2xf32> to vector<4x2xf32>
    %41 = vector.shape_cast %38 : vector<4x2xf32> to vector<1x1x4x2xf32>
    tpu.vector_store %arg6[%c0_22, %c0_23, %c0_24, %c0_25], %41 {strides = array<i32>} : memref<1x1x4x2xf32, #tpu.memory_space<vmem>>, vector<1x1x4x2xf32>,
    return
  }
  func.func @transform_0(%arg0: i32, %arg1: i32) -> (i32, i32) {
    %c0_i32 = arith.constant 0 : i32
    %c0_i32_0 = arith.constant 0 : i32
    %c0_i32_1 = arith.constant 0 : i32
    return %c0_i32, %c0_i32_0 : i32, i32
  }
  func.func @transform_1(%arg0: i32, %arg1: i32) -> (i32, i32) {
    %c0_i32 = arith.constant 0 : i32
    %c0_i32_0 = arith.constant 0 : i32
    return %c0_i32, %arg1 : i32, i32
  }
  func.func @transform_2(%arg0: i32, %arg1: i32) -> (i32, i32, i32) {
    %c0_i32 = arith.constant 0 : i32
    %c0_i32_0 = arith.constant 0 : i32
    %c0_i32_1 = arith.constant 0 : i32
    return %arg0, %c0_i32, %c0_i32_0 : i32, i32, i32
  }
  func.func @transform_3(%arg0: i32, %arg1: i32) -> (i32, i32, i32) {
    %c0_i32 = arith.constant 0 : i32
    %c0_i32_0 = arith.constant 0 : i32
    return %arg0, %c0_i32, %arg1 : i32, i32, i32
  }
  func.func @transform_4(%arg0: i32, %arg1: i32) -> (i32, i32, i32, i32) {
    %c0_i32 = arith.constant 0 : i32
    %c0_i32_0 = arith.constant 0 : i32
    %c0_i32_1 = arith.constant 0 : i32
    return %arg0, %arg1, %c0_i32, %c0_i32_0 : i32, i32, i32, i32
  }
}

module attributes {stable_mosaic.version = 11 : i64} {
  func.func @_bn_act_kernel(%arg0: i32, %arg1: i32, %arg2: memref<4x2xf32, #tpu.memory_space<vmem>>, %arg3: memref<1x4x384xbf16, #tpu.memory_space<vmem>>, %arg4: memref<1x4x384xbf16, #tpu.memory_space<vmem>>) attributes {dimension_semantics = [#tpu.dimension_semantics<parallel>, #tpu.dimension_semantics<parallel>], iteration_bounds = array<i64: 2, 1>, scalar_prefetch = 0 : i64, scratch_operands = 0 : i64, tpu.core_type = #tpu.core_type<tc>, window_params = [{pipeline_mode = #tpu.pipeline_mode<synchronous>, transform_indices = @transform_0, window_bounds = array<i64: 4, 2>}, {transform_indices = @transform_1, window_bounds = array<i64: 1, 4, 384>}, {transform_indices = @transform_2, window_bounds = array<i64: 1, 4, 384>}]} {
    %c0 = arith.constant 0 : index
    %c0_0 = arith.constant 0 : index
    %0 = vector.load %arg2[%c0, %c0_0] : memref<4x2xf32, #tpu.memory_space<vmem>>, vector<4x1xf32>
    %c0_1 = arith.constant 0 : index
    %c1 = arith.constant 1 : index
    %1 = vector.load %arg2[%c0_1, %c1] : memref<4x2xf32, #tpu.memory_space<vmem>>, vector<4x1xf32>
    %c0_2 = arith.constant 0 : index
    %c0_3 = arith.constant 0 : index
    %c0_4 = arith.constant 0 : index
    %2 = vector.load %arg3[%c0_2, %c0_3, %c0_4] : memref<1x4x384xbf16, #tpu.memory_space<vmem>>, vector<1x4x384xbf16>
    %3 = vector.shape_cast %2 : vector<1x4x384xbf16> to vector<4x384xbf16>
    %4 = arith.extf %3 : vector<4x384xbf16> to vector<4x384xf32>
    %5 = vector.broadcast %0 : vector<4x1xf32> to vector<4x384xf32>
    %6 = arith.mulf %4, %5 : vector<4x384xf32>
    %7 = vector.broadcast %1 : vector<4x1xf32> to vector<4x384xf32>
    %8 = arith.addf %6, %7 : vector<4x384xf32>
    %cst = arith.constant 0.000000e+00 : f32
    %9 = vector.broadcast %cst : f32 to vector<4x384xf32>
    %10 = arith.cmpf oge, %8, %9 : vector<4x384xf32>
    %cst_5 = arith.constant 0.229166672 : f32
    %11 = vector.broadcast %cst_5 : f32 to vector<4x384xf32>
    %12 = arith.mulf %11, %8 : vector<4x384xf32>
    %13 = arith.select %10, %8, %12 : vector<4x384xi1>, vector<4x384xf32>
    %14 = arith.truncf %13 : vector<4x384xf32> to vector<4x384xbf16>
    %c0_6 = arith.constant 0 : index
    %c0_7 = arith.constant 0 : index
    %c0_8 = arith.constant 0 : index
    %15 = vector.load %arg4[%c0_6, %c0_7, %c0_8] : memref<1x4x384xbf16, #tpu.memory_space<vmem>>, vector<1x4x384xbf16>
    %16 = vector.shape_cast %15 : vector<1x4x384xbf16> to vector<4x384xbf16>
    %17 = vector.shape_cast %14 : vector<4x384xbf16> to vector<1x4x384xbf16>
    tpu.vector_store %arg4[%c0_6, %c0_7, %c0_8], %17 {strides = array<i32>} : memref<1x4x384xbf16, #tpu.memory_space<vmem>>, vector<1x4x384xbf16>,
    return
  }
  func.func @transform_0(%arg0: i32, %arg1: i32) -> (i32, i32) {
    %c0_i32 = arith.constant 0 : i32
    %c0_i32_0 = arith.constant 0 : i32
    %c0_i32_1 = arith.constant 0 : i32
    return %c0_i32, %c0_i32_0 : i32, i32
  }
  func.func @transform_1(%arg0: i32, %arg1: i32) -> (i32, i32, i32) {
    %c0_i32 = arith.constant 0 : i32
    %c0_i32_0 = arith.constant 0 : i32
    return %arg0, %c0_i32, %arg1 : i32, i32, i32
  }
  func.func @transform_2(%arg0: i32, %arg1: i32) -> (i32, i32, i32) {
    %c0_i32 = arith.constant 0 : i32
    %c0_i32_0 = arith.constant 0 : i32
    return %arg0, %c0_i32, %arg1 : i32, i32, i32
  }
}

module attributes {stable_mosaic.version = 11 : i64} {
  func.func @kernel(%arg0: i32, %arg1: i32, %arg2: memref<4x8x16xbf16, #tpu.memory_space<vmem>>, %arg3: memref<4x8x16xbf16, #tpu.memory_space<vmem>>, %arg4: memref<8x1xf32, #tpu.memory_space<vmem>>, %arg5: memref<1x384xf32, #tpu.memory_space<vmem>>, %arg6: memref<1x4x422xbf16, #tpu.memory_space<vmem>>, %arg7: memref<1x4x422xbf16, #tpu.memory_space<vmem>>, %arg8: memref<1x4x8x384xbf16, #tpu.memory_space<vmem>>, %arg9: memref<1x4x8x384xbf16, #tpu.memory_space<vmem>>, %arg10: memref<1x1x8x2xf32, #tpu.memory_space<vmem>>, %arg11: memref<16x384xbf16, #tpu.memory_space<vmem>>, %arg12: memref<16x384xbf16, #tpu.memory_space<vmem>>) attributes {dimension_semantics = [#tpu.dimension_semantics<parallel>, #tpu.dimension_semantics<parallel>], iteration_bounds = array<i64: 2, 1>, scalar_prefetch = 0 : i64, scratch_operands = 2 : i64, tpu.core_type = #tpu.core_type<tc>, window_params = [{pipeline_mode = #tpu.pipeline_mode<synchronous>, transform_indices = @transform_0, window_bounds = array<i64: 4, 8, 16>}, {pipeline_mode = #tpu.pipeline_mode<synchronous>, transform_indices = @transform_1, window_bounds = array<i64: 4, 8, 16>}, {pipeline_mode = #tpu.pipeline_mode<synchronous>, transform_indices = @transform_2, window_bounds = array<i64: 8, 1>}, {transform_indices = @transform_3, window_bounds = array<i64: 1, 384>}, {transform_indices = @transform_4, window_bounds = array<i64: 1, 4, 422>}, {transform_indices = @transform_5, window_bounds = array<i64: 1, 4, 422>}, {transform_indices = @transform_6, window_bounds = array<i64: 1, 4, 8, 384>}, {transform_indices = @transform_7, window_bounds = array<i64: 1, 4, 8, 384>}, {transform_indices = @transform_8, window_bounds = array<i64: 1, 1, 8, 2>}]} {
    %c384_i32 = arith.constant 384 : i32
    %0 = arith.muli %arg1, %c384_i32 : i32
    %1 = tpu.assume_multiple %0, 384 : i32
    %c0 = arith.constant 0 : index
    %c0_0 = arith.constant 0 : index
    %2 = arith.index_cast %1 : i32 to index
    %3 = vector.load %arg6[%c0, %c0_0, %2] : memref<1x4x422xbf16, #tpu.memory_space<vmem>>, vector<1x4x422xbf16>
    %4 = vector.shape_cast %3 : vector<1x4x422xbf16> to vector<4x422xbf16>
    %c0_1 = arith.constant 0 : index
    %c0_2 = arith.constant 0 : index
    %5 = arith.index_cast %1 : i32 to index
    %6 = vector.load %arg7[%c0_1, %c0_2, %5] : memref<1x4x422xbf16, #tpu.memory_space<vmem>>, vector<1x4x422xbf16>
    %7 = vector.shape_cast %6 : vector<1x4x422xbf16> to vector<4x422xbf16>
    %c0_3 = arith.constant 0 : index
    %c0_4 = arith.constant 0 : index
    %c0_5 = arith.constant 0 : index
    %8 = vector.load %arg2[%c0_3, %c0_4, %c0_5] : memref<4x8x16xbf16, #tpu.memory_space<vmem>>, vector<4x8x16xbf16>
    %c0_6 = arith.constant 0 : index
    %c0_7 = arith.constant 0 : index
    %c0_8 = arith.constant 0 : index
    %9 = vector.load %arg3[%c0_6, %c0_7, %c0_8] : memref<4x8x16xbf16, #tpu.memory_space<vmem>>, vector<4x8x16xbf16>
    %c0_9 = arith.constant 0 : index
    %c0_10 = arith.constant 0 : index
    %10 = vector.load %arg4[%c0_9, %c0_10] : memref<8x1xf32, #tpu.memory_space<vmem>>, vector<8x1xf32>
    %c0_11 = arith.constant 0 : index
    %c0_12 = arith.constant 0 : index
    %11 = vector.load %arg5[%c0_11, %c0_12] : memref<1x384xf32, #tpu.memory_space<vmem>>, vector<1x384xf32>
    %cst = arith.constant 0.000000e+00 : f32
    %12 = vector.broadcast %cst : f32 to vector<8x1xf32>
    %cst_13 = arith.constant 0.000000e+00 : f32
    %13 = vector.broadcast %cst_13 : f32 to vector<8x1xf32>
    %14 = vector.extract_strided_slice %4 {offsets = [0, 0], sizes = [4, 384], strides = [1, 1]} : vector<4x422xbf16> to vector<4x384xbf16>
    %c0_14 = arith.constant 0 : index
    %c0_15 = arith.constant 0 : index
    %15 = vector.load %arg11[%c0_14, %c0_15] : memref<16x384xbf16, #tpu.memory_space<vmem>>, vector<4x384xbf16>
    tpu.vector_store %arg11[%c0_14, %c0_15], %14 {strides = array<i32>} : memref<16x384xbf16, #tpu.memory_space<vmem>>, vector<4x384xbf16>,
    %16 = vector.extract_strided_slice %7 {offsets = [0, 0], sizes = [4, 384], strides = [1, 1]} : vector<4x422xbf16> to vector<4x384xbf16>
    %c0_16 = arith.constant 0 : index
    %c0_17 = arith.constant 0 : index
    %17 = vector.load %arg12[%c0_16, %c0_17] : memref<16x384xbf16, #tpu.memory_space<vmem>>, vector<4x384xbf16>
    tpu.vector_store %arg12[%c0_16, %c0_17], %16 {strides = array<i32>} : memref<16x384xbf16, #tpu.memory_space<vmem>>, vector<4x384xbf16>,
    %18 = vector.extract_strided_slice %4 {offsets = [0, 1], sizes = [4, 384], strides = [1, 1]} : vector<4x422xbf16> to vector<4x384xbf16>
    %c4 = arith.constant 4 : index
    %c0_18 = arith.constant 0 : index
    %19 = vector.load %arg11[%c4, %c0_18] : memref<16x384xbf16, #tpu.memory_space<vmem>>, vector<4x384xbf16>
    tpu.vector_store %arg11[%c4, %c0_18], %18 {strides = array<i32>} : memref<16x384xbf16, #tpu.memory_space<vmem>>, vector<4x384xbf16>,
    %20 = vector.extract_strided_slice %7 {offsets = [0, 1], sizes = [4, 384], strides = [1, 1]} : vector<4x422xbf16> to vector<4x384xbf16>
    %c4_19 = arith.constant 4 : index
    %c0_20 = arith.constant 0 : index
    %21 = vector.load %arg12[%c4_19, %c0_20] : memref<16x384xbf16, #tpu.memory_space<vmem>>, vector<4x384xbf16>
    tpu.vector_store %arg12[%c4_19, %c0_20], %20 {strides = array<i32>} : memref<16x384xbf16, #tpu.memory_space<vmem>>, vector<4x384xbf16>,
    %22 = vector.extract_strided_slice %4 {offsets = [0, 18], sizes = [4, 384], strides = [1, 1]} : vector<4x422xbf16> to vector<4x384xbf16>
    %c8 = arith.constant 8 : index
    %c0_21 = arith.constant 0 : index
    %23 = vector.load %arg11[%c8, %c0_21] : memref<16x384xbf16, #tpu.memory_space<vmem>>, vector<4x384xbf16>
    tpu.vector_store %arg11[%c8, %c0_21], %22 {strides = array<i32>} : memref<16x384xbf16, #tpu.memory_space<vmem>>, vector<4x384xbf16>,
    %24 = vector.extract_strided_slice %7 {offsets = [0, 18], sizes = [4, 384], strides = [1, 1]} : vector<4x422xbf16> to vector<4x384xbf16>
    %c8_22 = arith.constant 8 : index
    %c0_23 = arith.constant 0 : index
    %25 = vector.load %arg12[%c8_22, %c0_23] : memref<16x384xbf16, #tpu.memory_space<vmem>>, vector<4x384xbf16>
    tpu.vector_store %arg12[%c8_22, %c0_23], %24 {strides = array<i32>} : memref<16x384xbf16, #tpu.memory_space<vmem>>, vector<4x384xbf16>,
    %26 = vector.extract_strided_slice %4 {offsets = [0, 19], sizes = [4, 384], strides = [1, 1]} : vector<4x422xbf16> to vector<4x384xbf16>
    %c12 = arith.constant 12 : index
    %c0_24 = arith.constant 0 : index
    %27 = vector.load %arg11[%c12, %c0_24] : memref<16x384xbf16, #tpu.memory_space<vmem>>, vector<4x384xbf16>
    tpu.vector_store %arg11[%c12, %c0_24], %26 {strides = array<i32>} : memref<16x384xbf16, #tpu.memory_space<vmem>>, vector<4x384xbf16>,
    %28 = vector.extract_strided_slice %7 {offsets = [0, 19], sizes = [4, 384], strides = [1, 1]} : vector<4x422xbf16> to vector<4x384xbf16>
    %c12_25 = arith.constant 12 : index
    %c0_26 = arith.constant 0 : index
    %29 = vector.load %arg12[%c12_25, %c0_26] : memref<16x384xbf16, #tpu.memory_space<vmem>>, vector<4x384xbf16>
    tpu.vector_store %arg12[%c12_25, %c0_26], %28 {strides = array<i32>} : memref<16x384xbf16, #tpu.memory_space<vmem>>, vector<4x384xbf16>,
    %30 = vector.extract_strided_slice %8 {offsets = [0, 0, 0], sizes = [1, 8, 16], strides = [1, 1, 1]} : vector<4x8x16xbf16> to vector<1x8x16xbf16>
    %31 = vector.shape_cast %30 : vector<1x8x16xbf16> to vector<8x16xbf16>
    %c0_27 = arith.constant 0 : index
    %c0_28 = arith.constant 0 : index
    %32 = vector.load %arg11[%c0_27, %c0_28] : memref<16x384xbf16, #tpu.memory_space<vmem>>, vector<16x384xbf16>
    %cst_29 = arith.constant dense<0.000000e+00> : vector<8x384xf32>
    %33 = tpu.matmul %31, %32, %cst_29 {dimension_numbers = #tpu.dot_dimension_numbers<[1], [0], [0], [1], [0, 0, 1, 1], [], []>} : vector<8x16xbf16>, vector<16x384xbf16>, vector<8x384xf32> -> vector<8x384xf32>
    %34 = vector.extract_strided_slice %9 {offsets = [0, 0, 0], sizes = [1, 8, 16], strides = [1, 1, 1]} : vector<4x8x16xbf16> to vector<1x8x16xbf16>
    %35 = vector.shape_cast %34 : vector<1x8x16xbf16> to vector<8x16xbf16>
    %c0_30 = arith.constant 0 : index
    %c0_31 = arith.constant 0 : index
    %36 = vector.load %arg12[%c0_30, %c0_31] : memref<16x384xbf16, #tpu.memory_space<vmem>>, vector<16x384xbf16>
    %cst_32 = arith.constant dense<0.000000e+00> : vector<8x384xf32>
    %37 = tpu.matmul %35, %36, %cst_32 {dimension_numbers = #tpu.dot_dimension_numbers<[1], [0], [0], [1], [0, 0, 1, 1], [], []>} : vector<8x16xbf16>, vector<16x384xbf16>, vector<8x384xf32> -> vector<8x384xf32>
    %38 = vector.broadcast %10 : vector<8x1xf32> to vector<8x384xf32>
    %39 = arith.addf %37, %38 : vector<8x384xf32>
    %40 = arith.truncf %33 : vector<8x384xf32> to vector<8x384xbf16>
    %c0_33 = arith.constant 0 : index
    %c0_34 = arith.constant 0 : index
    %c0_35 = arith.constant 0 : index
    %c0_36 = arith.constant 0 : index
    %41 = vector.load %arg8[%c0_33, %c0_34, %c0_35, %c0_36] : memref<1x4x8x384xbf16, #tpu.memory_space<vmem>>, vector<1x1x8x384xbf16>
    %42 = vector.shape_cast %41 : vector<1x1x8x384xbf16> to vector<8x384xbf16>
    %43 = vector.shape_cast %40 : vector<8x384xbf16> to vector<1x1x8x384xbf16>
    tpu.vector_store %arg8[%c0_33, %c0_34, %c0_35, %c0_36], %43 {strides = array<i32>} : memref<1x4x8x384xbf16, #tpu.memory_space<vmem>>, vector<1x1x8x384xbf16>,
    %44 = arith.truncf %39 : vector<8x384xf32> to vector<8x384xbf16>
    %c0_37 = arith.constant 0 : index
    %c0_38 = arith.constant 0 : index
    %c0_39 = arith.constant 0 : index
    %c0_40 = arith.constant 0 : index
    %45 = vector.load %arg9[%c0_37, %c0_38, %c0_39, %c0_40] : memref<1x4x8x384xbf16, #tpu.memory_space<vmem>>, vector<1x1x8x384xbf16>
    %46 = vector.shape_cast %45 : vector<1x1x8x384xbf16> to vector<8x384xbf16>
    %47 = vector.shape_cast %44 : vector<8x384xbf16> to vector<1x1x8x384xbf16>
    tpu.vector_store %arg9[%c0_37, %c0_38, %c0_39, %c0_40], %47 {strides = array<i32>} : memref<1x4x8x384xbf16, #tpu.memory_space<vmem>>, vector<1x1x8x384xbf16>,
    %48 = vector.broadcast %11 : vector<1x384xf32> to vector<8x384xf32>
    %49 = arith.mulf %33, %48 : vector<8x384xf32>
    %cst_41 = arith.constant dense<0.000000e+00> : vector<8xf32>
    %50 = vector.multi_reduction <add>, %49, %cst_41 [1] : vector<8x384xf32> to vector<8xf32>
    %51 = vector.shape_cast %50 : vector<8xf32> to vector<8x1xf32>
    %52 = arith.addf %12, %51 : vector<8x1xf32>
    %53 = arith.mulf %49, %49 : vector<8x384xf32>
    %cst_42 = arith.constant dense<0.000000e+00> : vector<8xf32>
    %54 = vector.multi_reduction <add>, %53, %cst_42 [1] : vector<8x384xf32> to vector<8xf32>
    %55 = vector.shape_cast %54 : vector<8xf32> to vector<8x1xf32>
    %56 = arith.addf %13, %55 : vector<8x1xf32>
    %57 = vector.extract_strided_slice %4 {offsets = [0, 1], sizes = [4, 384], strides = [1, 1]} : vector<4x422xbf16> to vector<4x384xbf16>
    %c0_43 = arith.constant 0 : index
    %c0_44 = arith.constant 0 : index
    %58 = vector.load %arg11[%c0_43, %c0_44] : memref<16x384xbf16, #tpu.memory_space<vmem>>, vector<4x384xbf16>
    tpu.vector_store %arg11[%c0_43, %c0_44], %57 {strides = array<i32>} : memref<16x384xbf16, #tpu.memory_space<vmem>>, vector<4x384xbf16>,
    %59 = vector.extract_strided_slice %7 {offsets = [0, 1], sizes = [4, 384], strides = [1, 1]} : vector<4x422xbf16> to vector<4x384xbf16>
    %c0_45 = arith.constant 0 : index
    %c0_46 = arith.constant 0 : index
    %60 = vector.load %arg12[%c0_45, %c0_46] : memref<16x384xbf16, #tpu.memory_space<vmem>>, vector<4x384xbf16>
    tpu.vector_store %arg12[%c0_45, %c0_46], %59 {strides = array<i32>} : memref<16x384xbf16, #tpu.memory_space<vmem>>, vector<4x384xbf16>,
    %61 = vector.extract_strided_slice %4 {offsets = [0, 2], sizes = [4, 384], strides = [1, 1]} : vector<4x422xbf16> to vector<4x384xbf16>
    %c4_47 = arith.constant 4 : index
    %c0_48 = arith.constant 0 : index
    %62 = vector.load %arg11[%c4_47, %c0_48] : memref<16x384xbf16, #tpu.memory_space<vmem>>, vector<4x384xbf16>
    tpu.vector_store %arg11[%c4_47, %c0_48], %61 {strides = array<i32>} : memref<16x384xbf16, #tpu.memory_space<vmem>>, vector<4x384xbf16>,
    %63 = vector.extract_strided_slice %7 {offsets = [0, 2], sizes = [4, 384], strides = [1, 1]} : vector<4x422xbf16> to vector<4x384xbf16>
    %c4_49 = arith.constant 4 : index
    %c0_50 = arith.constant 0 : index
    %64 = vector.load %arg12[%c4_49, %c0_50] : memref<16x384xbf16, #tpu.memory_space<vmem>>, vector<4x384xbf16>
    tpu.vector_store %arg12[%c4_49, %c0_50], %63 {strides = array<i32>} : memref<16x384xbf16, #tpu.memory_space<vmem>>, vector<4x384xbf16>,
    %65 = vector.extract_strided_slice %4 {offsets = [0, 19], sizes = [4, 384], strides = [1, 1]} : vector<4x422xbf16> to vector<4x384xbf16>
    %c8_51 = arith.constant 8 : index
    %c0_52 = arith.constant 0 : index
    %66 = vector.load %arg11[%c8_51, %c0_52] : memref<16x384xbf16, #tpu.memory_space<vmem>>, vector<4x384xbf16>
    tpu.vector_store %arg11[%c8_51, %c0_52], %65 {strides = array<i32>} : memref<16x384xbf16, #tpu.memory_space<vmem>>, vector<4x384xbf16>,
    %67 = vector.extract_strided_slice %7 {offsets = [0, 19], sizes = [4, 384], strides = [1, 1]} : vector<4x422xbf16> to vector<4x384xbf16>
    %c8_53 = arith.constant 8 : index
    %c0_54 = arith.constant 0 : index
    %68 = vector.load %arg12[%c8_53, %c0_54] : memref<16x384xbf16, #tpu.memory_space<vmem>>, vector<4x384xbf16>
    tpu.vector_store %arg12[%c8_53, %c0_54], %67 {strides = array<i32>} : memref<16x384xbf16, #tpu.memory_space<vmem>>, vector<4x384xbf16>,
    %69 = vector.extract_strided_slice %4 {offsets = [0, 20], sizes = [4, 384], strides = [1, 1]} : vector<4x422xbf16> to vector<4x384xbf16>
    %c12_55 = arith.constant 12 : index
    %c0_56 = arith.constant 0 : index
    %70 = vector.load %arg11[%c12_55, %c0_56] : memref<16x384xbf16, #tpu.memory_space<vmem>>, vector<4x384xbf16>
    tpu.vector_store %arg11[%c12_55, %c0_56], %69 {strides = array<i32>} : memref<16x384xbf16, #tpu.memory_space<vmem>>, vector<4x384xbf16>,
    %71 = vector.extract_strided_slice %7 {offsets = [0, 20], sizes = [4, 384], strides = [1, 1]} : vector<4x422xbf16> to vector<4x384xbf16>
    %c12_57 = arith.constant 12 : index
    %c0_58 = arith.constant 0 : index
    %72 = vector.load %arg12[%c12_57, %c0_58] : memref<16x384xbf16, #tpu.memory_space<vmem>>, vector<4x384xbf16>
    tpu.vector_store %arg12[%c12_57, %c0_58], %71 {strides = array<i32>} : memref<16x384xbf16, #tpu.memory_space<vmem>>, vector<4x384xbf16>,
    %73 = vector.extract_strided_slice %8 {offsets = [1, 0, 0], sizes = [1, 8, 16], strides = [1, 1, 1]} : vector<4x8x16xbf16> to vector<1x8x16xbf16>
    %74 = vector.shape_cast %73 : vector<1x8x16xbf16> to vector<8x16xbf16>
    %c0_59 = arith.constant 0 : index
    %c0_60 = arith.constant 0 : index
    %75 = vector.load %arg11[%c0_59, %c0_60] : memref<16x384xbf16, #tpu.memory_space<vmem>>, vector<16x384xbf16>
    %cst_61 = arith.constant dense<0.000000e+00> : vector<8x384xf32>
    %76 = tpu.matmul %74, %75, %cst_61 {dimension_numbers = #tpu.dot_dimension_numbers<[1], [0], [0], [1], [0, 0, 1, 1], [], []>} : vector<8x16xbf16>, vector<16x384xbf16>, vector<8x384xf32> -> vector<8x384xf32>
    %77 = vector.extract_strided_slice %9 {offsets = [1, 0, 0], sizes = [1, 8, 16], strides = [1, 1, 1]} : vector<4x8x16xbf16> to vector<1x8x16xbf16>
    %78 = vector.shape_cast %77 : vector<1x8x16xbf16> to vector<8x16xbf16>
    %c0_62 = arith.constant 0 : index
    %c0_63 = arith.constant 0 : index
    %79 = vector.load %arg12[%c0_62, %c0_63] : memref<16x384xbf16, #tpu.memory_space<vmem>>, vector<16x384xbf16>
    %cst_64 = arith.constant dense<0.000000e+00> : vector<8x384xf32>
    %80 = tpu.matmul %78, %79, %cst_64 {dimension_numbers = #tpu.dot_dimension_numbers<[1], [0], [0], [1], [0, 0, 1, 1], [], []>} : vector<8x16xbf16>, vector<16x384xbf16>, vector<8x384xf32> -> vector<8x384xf32>
    %81 = vector.broadcast %10 : vector<8x1xf32> to vector<8x384xf32>
    %82 = arith.addf %80, %81 : vector<8x384xf32>
    %83 = arith.truncf %76 : vector<8x384xf32> to vector<8x384xbf16>
    %c0_65 = arith.constant 0 : index
    %c1 = arith.constant 1 : index
    %c0_66 = arith.constant 0 : index
    %c0_67 = arith.constant 0 : index
    %84 = vector.load %arg8[%c0_65, %c1, %c0_66, %c0_67] : memref<1x4x8x384xbf16, #tpu.memory_space<vmem>>, vector<1x1x8x384xbf16>
    %85 = vector.shape_cast %84 : vector<1x1x8x384xbf16> to vector<8x384xbf16>
    %86 = vector.shape_cast %83 : vector<8x384xbf16> to vector<1x1x8x384xbf16>
    tpu.vector_store %arg8[%c0_65, %c1, %c0_66, %c0_67], %86 {strides = array<i32>} : memref<1x4x8x384xbf16, #tpu.memory_space<vmem>>, vector<1x1x8x384xbf16>,
    %87 = arith.truncf %82 : vector<8x384xf32> to vector<8x384xbf16>
    %c0_68 = arith.constant 0 : index
    %c1_69 = arith.constant 1 : index
    %c0_70 = arith.constant 0 : index
    %c0_71 = arith.constant 0 : index
    %88 = vector.load %arg9[%c0_68, %c1_69, %c0_70, %c0_71] : memref<1x4x8x384xbf16, #tpu.memory_space<vmem>>, vector<1x1x8x384xbf16>
    %89 = vector.shape_cast %88 : vector<1x1x8x384xbf16> to vector<8x384xbf16>
    %90 = vector.shape_cast %87 : vector<8x384xbf16> to vector<1x1x8x384xbf16>
    tpu.vector_store %arg9[%c0_68, %c1_69, %c0_70, %c0_71], %90 {strides = array<i32>} : memref<1x4x8x384xbf16, #tpu.memory_space<vmem>>, vector<1x1x8x384xbf16>,
    %91 = vector.broadcast %11 : vector<1x384xf32> to vector<8x384xf32>
    %92 = arith.mulf %76, %91 : vector<8x384xf32>
    %cst_72 = arith.constant dense<0.000000e+00> : vector<8xf32>
    %93 = vector.multi_reduction <add>, %92, %cst_72 [1] : vector<8x384xf32> to vector<8xf32>
    %94 = vector.shape_cast %93 : vector<8xf32> to vector<8x1xf32>
    %95 = arith.addf %52, %94 : vector<8x1xf32>
    %96 = arith.mulf %92, %92 : vector<8x384xf32>
    %cst_73 = arith.constant dense<0.000000e+00> : vector<8xf32>
    %97 = vector.multi_reduction <add>, %96, %cst_73 [1] : vector<8x384xf32> to vector<8xf32>
    %98 = vector.shape_cast %97 : vector<8xf32> to vector<8x1xf32>
    %99 = arith.addf %56, %98 : vector<8x1xf32>
    %100 = vector.extract_strided_slice %4 {offsets = [0, 18], sizes = [4, 384], strides = [1, 1]} : vector<4x422xbf16> to vector<4x384xbf16>
    %c0_74 = arith.constant 0 : index
    %c0_75 = arith.constant 0 : index
    %101 = vector.load %arg11[%c0_74, %c0_75] : memref<16x384xbf16, #tpu.memory_space<vmem>>, vector<4x384xbf16>
    tpu.vector_store %arg11[%c0_74, %c0_75], %100 {strides = array<i32>} : memref<16x384xbf16, #tpu.memory_space<vmem>>, vector<4x384xbf16>,
    %102 = vector.extract_strided_slice %7 {offsets = [0, 18], sizes = [4, 384], strides = [1, 1]} : vector<4x422xbf16> to vector<4x384xbf16>
    %c0_76 = arith.constant 0 : index
    %c0_77 = arith.constant 0 : index
    %103 = vector.load %arg12[%c0_76, %c0_77] : memref<16x384xbf16, #tpu.memory_space<vmem>>, vector<4x384xbf16>
    tpu.vector_store %arg12[%c0_76, %c0_77], %102 {strides = array<i32>} : memref<16x384xbf16, #tpu.memory_space<vmem>>, vector<4x384xbf16>,
    %104 = vector.extract_strided_slice %4 {offsets = [0, 19], sizes = [4, 384], strides = [1, 1]} : vector<4x422xbf16> to vector<4x384xbf16>
    %c4_78 = arith.constant 4 : index
    %c0_79 = arith.constant 0 : index
    %105 = vector.load %arg11[%c4_78, %c0_79] : memref<16x384xbf16, #tpu.memory_space<vmem>>, vector<4x384xbf16>
    tpu.vector_store %arg11[%c4_78, %c0_79], %104 {strides = array<i32>} : memref<16x384xbf16, #tpu.memory_space<vmem>>, vector<4x384xbf16>,
    %106 = vector.extract_strided_slice %7 {offsets = [0, 19], sizes = [4, 384], strides = [1, 1]} : vector<4x422xbf16> to vector<4x384xbf16>
    %c4_80 = arith.constant 4 : index
    %c0_81 = arith.constant 0 : index
    %107 = vector.load %arg12[%c4_80, %c0_81] : memref<16x384xbf16, #tpu.memory_space<vmem>>, vector<4x384xbf16>
    tpu.vector_store %arg12[%c4_80, %c0_81], %106 {strides = array<i32>} : memref<16x384xbf16, #tpu.memory_space<vmem>>, vector<4x384xbf16>,
    %108 = vector.extract_strided_slice %4 {offsets = [0, 36], sizes = [4, 384], strides = [1, 1]} : vector<4x422xbf16> to vector<4x384xbf16>
    %c8_82 = arith.constant 8 : index
    %c0_83 = arith.constant 0 : index
    %109 = vector.load %arg11[%c8_82, %c0_83] : memref<16x384xbf16, #tpu.memory_space<vmem>>, vector<4x384xbf16>
    tpu.vector_store %arg11[%c8_82, %c0_83], %108 {strides = array<i32>} : memref<16x384xbf16, #tpu.memory_space<vmem>>, vector<4x384xbf16>,
    %110 = vector.extract_strided_slice %7 {offsets = [0, 36], sizes = [4, 384], strides = [1, 1]} : vector<4x422xbf16> to vector<4x384xbf16>
    %c8_84 = arith.constant 8 : index
    %c0_85 = arith.constant 0 : index
    %111 = vector.load %arg12[%c8_84, %c0_85] : memref<16x384xbf16, #tpu.memory_space<vmem>>, vector<4x384xbf16>
    tpu.vector_store %arg12[%c8_84, %c0_85], %110 {strides = array<i32>} : memref<16x384xbf16, #tpu.memory_space<vmem>>, vector<4x384xbf16>,
    %112 = vector.extract_strided_slice %4 {offsets = [0, 37], sizes = [4, 384], strides = [1, 1]} : vector<4x422xbf16> to vector<4x384xbf16>
    %c12_86 = arith.constant 12 : index
    %c0_87 = arith.constant 0 : index
    %113 = vector.load %arg11[%c12_86, %c0_87] : memref<16x384xbf16, #tpu.memory_space<vmem>>, vector<4x384xbf16>
    tpu.vector_store %arg11[%c12_86, %c0_87], %112 {strides = array<i32>} : memref<16x384xbf16, #tpu.memory_space<vmem>>, vector<4x384xbf16>,
    %114 = vector.extract_strided_slice %7 {offsets = [0, 37], sizes = [4, 384], strides = [1, 1]} : vector<4x422xbf16> to vector<4x384xbf16>
    %c12_88 = arith.constant 12 : index
    %c0_89 = arith.constant 0 : index
    %115 = vector.load %arg12[%c12_88, %c0_89] : memref<16x384xbf16, #tpu.memory_space<vmem>>, vector<4x384xbf16>
    tpu.vector_store %arg12[%c12_88, %c0_89], %114 {strides = array<i32>} : memref<16x384xbf16, #tpu.memory_space<vmem>>, vector<4x384xbf16>,
    %116 = vector.extract_strided_slice %8 {offsets = [2, 0, 0], sizes = [1, 8, 16], strides = [1, 1, 1]} : vector<4x8x16xbf16> to vector<1x8x16xbf16>
    %117 = vector.shape_cast %116 : vector<1x8x16xbf16> to vector<8x16xbf16>
    %c0_90 = arith.constant 0 : index
    %c0_91 = arith.constant 0 : index
    %118 = vector.load %arg11[%c0_90, %c0_91] : memref<16x384xbf16, #tpu.memory_space<vmem>>, vector<16x384xbf16>
    %cst_92 = arith.constant dense<0.000000e+00> : vector<8x384xf32>
    %119 = tpu.matmul %117, %118, %cst_92 {dimension_numbers = #tpu.dot_dimension_numbers<[1], [0], [0], [1], [0, 0, 1, 1], [], []>} : vector<8x16xbf16>, vector<16x384xbf16>, vector<8x384xf32> -> vector<8x384xf32>
    %120 = vector.extract_strided_slice %9 {offsets = [2, 0, 0], sizes = [1, 8, 16], strides = [1, 1, 1]} : vector<4x8x16xbf16> to vector<1x8x16xbf16>
    %121 = vector.shape_cast %120 : vector<1x8x16xbf16> to vector<8x16xbf16>
    %c0_93 = arith.constant 0 : index
    %c0_94 = arith.constant 0 : index
    %122 = vector.load %arg12[%c0_93, %c0_94] : memref<16x384xbf16, #tpu.memory_space<vmem>>, vector<16x384xbf16>
    %cst_95 = arith.constant dense<0.000000e+00> : vector<8x384xf32>
    %123 = tpu.matmul %121, %122, %cst_95 {dimension_numbers = #tpu.dot_dimension_numbers<[1], [0], [0], [1], [0, 0, 1, 1], [], []>} : vector<8x16xbf16>, vector<16x384xbf16>, vector<8x384xf32> -> vector<8x384xf32>
    %124 = vector.broadcast %10 : vector<8x1xf32> to vector<8x384xf32>
    %125 = arith.addf %123, %124 : vector<8x384xf32>
    %126 = arith.truncf %119 : vector<8x384xf32> to vector<8x384xbf16>
    %c0_96 = arith.constant 0 : index
    %c2 = arith.constant 2 : index
    %c0_97 = arith.constant 0 : index
    %c0_98 = arith.constant 0 : index
    %127 = vector.load %arg8[%c0_96, %c2, %c0_97, %c0_98] : memref<1x4x8x384xbf16, #tpu.memory_space<vmem>>, vector<1x1x8x384xbf16>
    %128 = vector.shape_cast %127 : vector<1x1x8x384xbf16> to vector<8x384xbf16>
    %129 = vector.shape_cast %126 : vector<8x384xbf16> to vector<1x1x8x384xbf16>
    tpu.vector_store %arg8[%c0_96, %c2, %c0_97, %c0_98], %129 {strides = array<i32>} : memref<1x4x8x384xbf16, #tpu.memory_space<vmem>>, vector<1x1x8x384xbf16>,
    %130 = arith.truncf %125 : vector<8x384xf32> to vector<8x384xbf16>
    %c0_99 = arith.constant 0 : index
    %c2_100 = arith.constant 2 : index
    %c0_101 = arith.constant 0 : index
    %c0_102 = arith.constant 0 : index
    %131 = vector.load %arg9[%c0_99, %c2_100, %c0_101, %c0_102] : memref<1x4x8x384xbf16, #tpu.memory_space<vmem>>, vector<1x1x8x384xbf16>
    %132 = vector.shape_cast %131 : vector<1x1x8x384xbf16> to vector<8x384xbf16>
    %133 = vector.shape_cast %130 : vector<8x384xbf16> to vector<1x1x8x384xbf16>
    tpu.vector_store %arg9[%c0_99, %c2_100, %c0_101, %c0_102], %133 {strides = array<i32>} : memref<1x4x8x384xbf16, #tpu.memory_space<vmem>>, vector<1x1x8x384xbf16>,
    %134 = vector.broadcast %11 : vector<1x384xf32> to vector<8x384xf32>
    %135 = arith.mulf %119, %134 : vector<8x384xf32>
    %cst_103 = arith.constant dense<0.000000e+00> : vector<8xf32>
    %136 = vector.multi_reduction <add>, %135, %cst_103 [1] : vector<8x384xf32> to vector<8xf32>
    %137 = vector.shape_cast %136 : vector<8xf32> to vector<8x1xf32>
    %138 = arith.addf %95, %137 : vector<8x1xf32>
    %139 = arith.mulf %135, %135 : vector<8x384xf32>
    %cst_104 = arith.constant dense<0.000000e+00> : vector<8xf32>
    %140 = vector.multi_reduction <add>, %139, %cst_104 [1] : vector<8x384xf32> to vector<8xf32>
    %141 = vector.shape_cast %140 : vector<8xf32> to vector<8x1xf32>
    %142 = arith.addf %99, %141 : vector<8x1xf32>
    %143 = vector.extract_strided_slice %4 {offsets = [0, 19], sizes = [4, 384], strides = [1, 1]} : vector<4x422xbf16> to vector<4x384xbf16>
    %c0_105 = arith.constant 0 : index
    %c0_106 = arith.constant 0 : index
    %144 = vector.load %arg11[%c0_105, %c0_106] : memref<16x384xbf16, #tpu.memory_space<vmem>>, vector<4x384xbf16>
    tpu.vector_store %arg11[%c0_105, %c0_106], %143 {strides = array<i32>} : memref<16x384xbf16, #tpu.memory_space<vmem>>, vector<4x384xbf16>,
    %145 = vector.extract_strided_slice %7 {offsets = [0, 19], sizes = [4, 384], strides = [1, 1]} : vector<4x422xbf16> to vector<4x384xbf16>
    %c0_107 = arith.constant 0 : index
    %c0_108 = arith.constant 0 : index
    %146 = vector.load %arg12[%c0_107, %c0_108] : memref<16x384xbf16, #tpu.memory_space<vmem>>, vector<4x384xbf16>
    tpu.vector_store %arg12[%c0_107, %c0_108], %145 {strides = array<i32>} : memref<16x384xbf16, #tpu.memory_space<vmem>>, vector<4x384xbf16>,
    %147 = vector.extract_strided_slice %4 {offsets = [0, 20], sizes = [4, 384], strides = [1, 1]} : vector<4x422xbf16> to vector<4x384xbf16>
    %c4_109 = arith.constant 4 : index
    %c0_110 = arith.constant 0 : index
    %148 = vector.load %arg11[%c4_109, %c0_110] : memref<16x384xbf16, #tpu.memory_space<vmem>>, vector<4x384xbf16>
    tpu.vector_store %arg11[%c4_109, %c0_110], %147 {strides = array<i32>} : memref<16x384xbf16, #tpu.memory_space<vmem>>, vector<4x384xbf16>,
    %149 = vector.extract_strided_slice %7 {offsets = [0, 20], sizes = [4, 384], strides = [1, 1]} : vector<4x422xbf16> to vector<4x384xbf16>
    %c4_111 = arith.constant 4 : index
    %c0_112 = arith.constant 0 : index
    %150 = vector.load %arg12[%c4_111, %c0_112] : memref<16x384xbf16, #tpu.memory_space<vmem>>, vector<4x384xbf16>
    tpu.vector_store %arg12[%c4_111, %c0_112], %149 {strides = array<i32>} : memref<16x384xbf16, #tpu.memory_space<vmem>>, vector<4x384xbf16>,
    %151 = vector.extract_strided_slice %4 {offsets = [0, 37], sizes = [4, 384], strides = [1, 1]} : vector<4x422xbf16> to vector<4x384xbf16>
    %c8_113 = arith.constant 8 : index
    %c0_114 = arith.constant 0 : index
    %152 = vector.load %arg11[%c8_113, %c0_114] : memref<16x384xbf16, #tpu.memory_space<vmem>>, vector<4x384xbf16>
    tpu.vector_store %arg11[%c8_113, %c0_114], %151 {strides = array<i32>} : memref<16x384xbf16, #tpu.memory_space<vmem>>, vector<4x384xbf16>,
    %153 = vector.extract_strided_slice %7 {offsets = [0, 37], sizes = [4, 384], strides = [1, 1]} : vector<4x422xbf16> to vector<4x384xbf16>
    %c8_115 = arith.constant 8 : index
    %c0_116 = arith.constant 0 : index
    %154 = vector.load %arg12[%c8_115, %c0_116] : memref<16x384xbf16, #tpu.memory_space<vmem>>, vector<4x384xbf16>
    tpu.vector_store %arg12[%c8_115, %c0_116], %153 {strides = array<i32>} : memref<16x384xbf16, #tpu.memory_space<vmem>>, vector<4x384xbf16>,
    %155 = vector.extract_strided_slice %4 {offsets = [0, 38], sizes = [4, 384], strides = [1, 1]} : vector<4x422xbf16> to vector<4x384xbf16>
    %c12_117 = arith.constant 12 : index
    %c0_118 = arith.constant 0 : index
    %156 = vector.load %arg11[%c12_117, %c0_118] : memref<16x384xbf16, #tpu.memory_space<vmem>>, vector<4x384xbf16>
    tpu.vector_store %arg11[%c12_117, %c0_118], %155 {strides = array<i32>} : memref<16x384xbf16, #tpu.memory_space<vmem>>, vector<4x384xbf16>,
    %157 = vector.extract_strided_slice %7 {offsets = [0, 38], sizes = [4, 384], strides = [1, 1]} : vector<4x422xbf16> to vector<4x384xbf16>
    %c12_119 = arith.constant 12 : index
    %c0_120 = arith.constant 0 : index
    %158 = vector.load %arg12[%c12_119, %c0_120] : memref<16x384xbf16, #tpu.memory_space<vmem>>, vector<4x384xbf16>
    tpu.vector_store %arg12[%c12_119, %c0_120], %157 {strides = array<i32>} : memref<16x384xbf16, #tpu.memory_space<vmem>>, vector<4x384xbf16>,
    %159 = vector.extract_strided_slice %8 {offsets = [3, 0, 0], sizes = [1, 8, 16], strides = [1, 1, 1]} : vector<4x8x16xbf16> to vector<1x8x16xbf16>
    %160 = vector.shape_cast %159 : vector<1x8x16xbf16> to vector<8x16xbf16>
    %c0_121 = arith.constant 0 : index
    %c0_122 = arith.constant 0 : index
    %161 = vector.load %arg11[%c0_121, %c0_122] : memref<16x384xbf16, #tpu.memory_space<vmem>>, vector<16x384xbf16>
    %cst_123 = arith.constant dense<0.000000e+00> : vector<8x384xf32>
    %162 = tpu.matmul %160, %161, %cst_123 {dimension_numbers = #tpu.dot_dimension_numbers<[1], [0], [0], [1], [0, 0, 1, 1], [], []>} : vector<8x16xbf16>, vector<16x384xbf16>, vector<8x384xf32> -> vector<8x384xf32>
    %163 = vector.extract_strided_slice %9 {offsets = [3, 0, 0], sizes = [1, 8, 16], strides = [1, 1, 1]} : vector<4x8x16xbf16> to vector<1x8x16xbf16>
    %164 = vector.shape_cast %163 : vector<1x8x16xbf16> to vector<8x16xbf16>
    %c0_124 = arith.constant 0 : index
    %c0_125 = arith.constant 0 : index
    %165 = vector.load %arg12[%c0_124, %c0_125] : memref<16x384xbf16, #tpu.memory_space<vmem>>, vector<16x384xbf16>
    %cst_126 = arith.constant dense<0.000000e+00> : vector<8x384xf32>
    %166 = tpu.matmul %164, %165, %cst_126 {dimension_numbers = #tpu.dot_dimension_numbers<[1], [0], [0], [1], [0, 0, 1, 1], [], []>} : vector<8x16xbf16>, vector<16x384xbf16>, vector<8x384xf32> -> vector<8x384xf32>
    %167 = vector.broadcast %10 : vector<8x1xf32> to vector<8x384xf32>
    %168 = arith.addf %166, %167 : vector<8x384xf32>
    %169 = arith.truncf %162 : vector<8x384xf32> to vector<8x384xbf16>
    %c0_127 = arith.constant 0 : index
    %c3 = arith.constant 3 : index
    %c0_128 = arith.constant 0 : index
    %c0_129 = arith.constant 0 : index
    %170 = vector.load %arg8[%c0_127, %c3, %c0_128, %c0_129] : memref<1x4x8x384xbf16, #tpu.memory_space<vmem>>, vector<1x1x8x384xbf16>
    %171 = vector.shape_cast %170 : vector<1x1x8x384xbf16> to vector<8x384xbf16>
    %172 = vector.shape_cast %169 : vector<8x384xbf16> to vector<1x1x8x384xbf16>
    tpu.vector_store %arg8[%c0_127, %c3, %c0_128, %c0_129], %172 {strides = array<i32>} : memref<1x4x8x384xbf16, #tpu.memory_space<vmem>>, vector<1x1x8x384xbf16>,
    %173 = arith.truncf %168 : vector<8x384xf32> to vector<8x384xbf16>
    %c0_130 = arith.constant 0 : index
    %c3_131 = arith.constant 3 : index
    %c0_132 = arith.constant 0 : index
    %c0_133 = arith.constant 0 : index
    %174 = vector.load %arg9[%c0_130, %c3_131, %c0_132, %c0_133] : memref<1x4x8x384xbf16, #tpu.memory_space<vmem>>, vector<1x1x8x384xbf16>
    %175 = vector.shape_cast %174 : vector<1x1x8x384xbf16> to vector<8x384xbf16>
    %176 = vector.shape_cast %173 : vector<8x384xbf16> to vector<1x1x8x384xbf16>
    tpu.vector_store %arg9[%c0_130, %c3_131, %c0_132, %c0_133], %176 {strides = array<i32>} : memref<1x4x8x384xbf16, #tpu.memory_space<vmem>>, vector<1x1x8x384xbf16>,
    %177 = vector.broadcast %11 : vector<1x384xf32> to vector<8x384xf32>
    %178 = arith.mulf %162, %177 : vector<8x384xf32>
    %cst_134 = arith.constant dense<0.000000e+00> : vector<8xf32>
    %179 = vector.multi_reduction <add>, %178, %cst_134 [1] : vector<8x384xf32> to vector<8xf32>
    %180 = vector.shape_cast %179 : vector<8xf32> to vector<8x1xf32>
    %181 = arith.addf %138, %180 : vector<8x1xf32>
    %182 = arith.mulf %178, %178 : vector<8x384xf32>
    %cst_135 = arith.constant dense<0.000000e+00> : vector<8xf32>
    %183 = vector.multi_reduction <add>, %182, %cst_135 [1] : vector<8x384xf32> to vector<8xf32>
    %184 = vector.shape_cast %183 : vector<8xf32> to vector<8x1xf32>
    %185 = arith.addf %142, %184 : vector<8x1xf32>
    %186 = tpu.concatenate %181, %185 in 1 : vector<8x1xf32>, vector<8x1xf32> -> vector<8x2xf32>
    %c0_136 = arith.constant 0 : index
    %c0_137 = arith.constant 0 : index
    %c0_138 = arith.constant 0 : index
    %c0_139 = arith.constant 0 : index
    %187 = vector.load %arg10[%c0_136, %c0_137, %c0_138, %c0_139] : memref<1x1x8x2xf32, #tpu.memory_space<vmem>>, vector<1x1x8x2xf32>
    %188 = vector.shape_cast %187 : vector<1x1x8x2xf32> to vector<8x2xf32>
    %189 = vector.shape_cast %186 : vector<8x2xf32> to vector<1x1x8x2xf32>
    tpu.vector_store %arg10[%c0_136, %c0_137, %c0_138, %c0_139], %189 {strides = array<i32>} : memref<1x1x8x2xf32, #tpu.memory_space<vmem>>, vector<1x1x8x2xf32>,
    return
  }
  func.func @transform_0(%arg0: i32, %arg1: i32) -> (i32, i32, i32) {
    %c0_i32 = arith.constant 0 : i32
    %c0_i32_0 = arith.constant 0 : i32
    %c0_i32_1 = arith.constant 0 : i32
    %c0_i32_2 = arith.constant 0 : i32
    return %c0_i32, %c0_i32_0, %c0_i32_1 : i32, i32, i32
  }
  func.func @transform_1(%arg0: i32, %arg1: i32) -> (i32, i32, i32) {
    %c0_i32 = arith.constant 0 : i32
    %c0_i32_0 = arith.constant 0 : i32
    %c0_i32_1 = arith.constant 0 : i32
    %c0_i32_2 = arith.constant 0 : i32
    return %c0_i32, %c0_i32_0, %c0_i32_1 : i32, i32, i32
  }
  func.func @transform_2(%arg0: i32, %arg1: i32) -> (i32, i32) {
    %c0_i32 = arith.constant 0 : i32
    %c0_i32_0 = arith.constant 0 : i32
    %c0_i32_1 = arith.constant 0 : i32
    return %c0_i32, %c0_i32_0 : i32, i32
  }
  func.func @transform_3(%arg0: i32, %arg1: i32) -> (i32, i32) {
    %c0_i32 = arith.constant 0 : i32
    %c0_i32_0 = arith.constant 0 : i32
    return %c0_i32, %arg1 : i32, i32
  }
  func.func @transform_4(%arg0: i32, %arg1: i32) -> (i32, i32, i32) {
    %c0_i32 = arith.constant 0 : i32
    %c0_i32_0 = arith.constant 0 : i32
    %c0_i32_1 = arith.constant 0 : i32
    return %arg0, %c0_i32, %c0_i32_0 : i32, i32, i32
  }
  func.func @transform_5(%arg0: i32, %arg1: i32) -> (i32, i32, i32) {
    %c0_i32 = arith.constant 0 : i32
    %c0_i32_0 = arith.constant 0 : i32
    %c0_i32_1 = arith.constant 0 : i32
    return %arg0, %c0_i32, %c0_i32_0 : i32, i32, i32
  }
  func.func @transform_6(%arg0: i32, %arg1: i32) -> (i32, i32, i32, i32) {
    %c0_i32 = arith.constant 0 : i32
    %c0_i32_0 = arith.constant 0 : i32
    %c0_i32_1 = arith.constant 0 : i32
    return %arg0, %c0_i32, %c0_i32_0, %arg1 : i32, i32, i32, i32
  }
  func.func @transform_7(%arg0: i32, %arg1: i32) -> (i32, i32, i32, i32) {
    %c0_i32 = arith.constant 0 : i32
    %c0_i32_0 = arith.constant 0 : i32
    %c0_i32_1 = arith.constant 0 : i32
    return %arg0, %c0_i32, %c0_i32_0, %arg1 : i32, i32, i32, i32
  }
  func.func @transform_8(%arg0: i32, %arg1: i32) -> (i32, i32, i32, i32) {
    %c0_i32 = arith.constant 0 : i32
    %c0_i32_0 = arith.constant 0 : i32
    %c0_i32_1 = arith.constant 0 : i32
    return %arg0, %arg1, %c0_i32, %c0_i32_0 : i32, i32, i32, i32
  }
}

module attributes {stable_mosaic.version = 11 : i64} {
  func.func @_bn_act_skip_kernel(%arg0: i32, %arg1: i32, %arg2: memref<8x2xf32, #tpu.memory_space<vmem>>, %arg3: memref<1x4x8x384xbf16, #tpu.memory_space<vmem>>, %arg4: memref<1x4x8x384xbf16, #tpu.memory_space<vmem>>, %arg5: memref<1x4x8x384xf32, #tpu.memory_space<vmem>>) attributes {dimension_semantics = [#tpu.dimension_semantics<parallel>, #tpu.dimension_semantics<parallel>], iteration_bounds = array<i64: 2, 1>, scalar_prefetch = 0 : i64, scratch_operands = 0 : i64, tpu.core_type = #tpu.core_type<tc>, window_params = [{pipeline_mode = #tpu.pipeline_mode<synchronous>, transform_indices = @transform_0, window_bounds = array<i64: 8, 2>}, {transform_indices = @transform_1, window_bounds = array<i64: 1, 4, 8, 384>}, {transform_indices = @transform_2, window_bounds = array<i64: 1, 4, 8, 384>}, {transform_indices = @transform_3, window_bounds = array<i64: 1, 4, 8, 384>}]} {
    %c0 = arith.constant 0 : index
    %c0_0 = arith.constant 0 : index
    %0 = vector.load %arg2[%c0, %c0_0] : memref<8x2xf32, #tpu.memory_space<vmem>>, vector<8x1xf32>
    %c0_1 = arith.constant 0 : index
    %c1 = arith.constant 1 : index
    %1 = vector.load %arg2[%c0_1, %c1] : memref<8x2xf32, #tpu.memory_space<vmem>>, vector<8x1xf32>
    %c0_2 = arith.constant 0 : index
    %c0_3 = arith.constant 0 : index
    %c0_4 = arith.constant 0 : index
    %c0_5 = arith.constant 0 : index
    %2 = vector.load %arg3[%c0_2, %c0_3, %c0_4, %c0_5] : memref<1x4x8x384xbf16, #tpu.memory_space<vmem>>, vector<1x4x8x384xbf16>
    %3 = vector.shape_cast %2 : vector<1x4x8x384xbf16> to vector<4x8x384xbf16>
    %4 = arith.extf %3 : vector<4x8x384xbf16> to vector<4x8x384xf32>
    %5 = vector.shape_cast %0 : vector<8x1xf32> to vector<1x8x1xf32>
    %6 = vector.broadcast %5 : vector<1x8x1xf32> to vector<4x8x384xf32>
    %7 = arith.mulf %4, %6 : vector<4x8x384xf32>
    %8 = vector.shape_cast %1 : vector<8x1xf32> to vector<1x8x1xf32>
    %9 = vector.broadcast %8 : vector<1x8x1xf32> to vector<4x8x384xf32>
    %10 = arith.addf %7, %9 : vector<4x8x384xf32>
    %c0_6 = arith.constant 0 : index
    %c0_7 = arith.constant 0 : index
    %c0_8 = arith.constant 0 : index
    %c0_9 = arith.constant 0 : index
    %11 = vector.load %arg4[%c0_6, %c0_7, %c0_8, %c0_9] : memref<1x4x8x384xbf16, #tpu.memory_space<vmem>>, vector<1x4x8x384xbf16>
    %12 = vector.shape_cast %11 : vector<1x4x8x384xbf16> to vector<4x8x384xbf16>
    %13 = arith.extf %12 : vector<4x8x384xbf16> to vector<4x8x384xf32>
    %14 = arith.addf %10, %13 : vector<4x8x384xf32>
    %cst = arith.constant 0.000000e+00 : f32
    %15 = vector.broadcast %cst : f32 to vector<4x8x384xf32>
    %16 = arith.cmpf oge, %14, %15 : vector<4x8x384xf32>
    %cst_10 = arith.constant 0.229166672 : f32
    %17 = vector.broadcast %cst_10 : f32 to vector<4x8x384xf32>
    %18 = arith.mulf %17, %14 : vector<4x8x384xf32>
    %19 = arith.select %16, %14, %18 : vector<4x8x384xi1>, vector<4x8x384xf32>
    %c0_11 = arith.constant 0 : index
    %c0_12 = arith.constant 0 : index
    %c0_13 = arith.constant 0 : index
    %c0_14 = arith.constant 0 : index
    %20 = vector.load %arg5[%c0_11, %c0_12, %c0_13, %c0_14] : memref<1x4x8x384xf32, #tpu.memory_space<vmem>>, vector<1x4x8x384xf32>
    %21 = vector.shape_cast %20 : vector<1x4x8x384xf32> to vector<4x8x384xf32>
    %22 = vector.shape_cast %19 : vector<4x8x384xf32> to vector<1x4x8x384xf32>
    tpu.vector_store %arg5[%c0_11, %c0_12, %c0_13, %c0_14], %22 {strides = array<i32>} : memref<1x4x8x384xf32, #tpu.memory_space<vmem>>, vector<1x4x8x384xf32>,
    return
  }
  func.func @transform_0(%arg0: i32, %arg1: i32) -> (i32, i32) {
    %c0_i32 = arith.constant 0 : i32
    %c0_i32_0 = arith.constant 0 : i32
    %c0_i32_1 = arith.constant 0 : i32
    return %c0_i32, %c0_i32_0 : i32, i32
  }
  func.func @transform_1(%arg0: i32, %arg1: i32) -> (i32, i32, i32, i32) {
    %c0_i32 = arith.constant 0 : i32
    %c0_i32_0 = arith.constant 0 : i32
    %c0_i32_1 = arith.constant 0 : i32
    return %arg0, %c0_i32, %c0_i32_0, %arg1 : i32, i32, i32, i32
  }
  func.func @transform_2(%arg0: i32, %arg1: i32) -> (i32, i32, i32, i32) {
    %c0_i32 = arith.constant 0 : i32
    %c0_i32_0 = arith.constant 0 : i32
    %c0_i32_1 = arith.constant 0 : i32
    return %arg0, %c0_i32, %c0_i32_0, %arg1 : i32, i32, i32, i32
  }
  func.func @transform_3(%arg0: i32, %arg1: i32) -> (i32, i32, i32, i32) {
    %c0_i32 = arith.constant 0 : i32
    %c0_i32_0 = arith.constant 0 : i32
    %c0_i32_1 = arith.constant 0 : i32
    return %arg0, %c0_i32, %c0_i32_0, %arg1 : i32, i32, i32, i32
  }
}

</mosaic_0001>

<bundles_post_ra>
// kernel: res_up_forward.5
= control target key start
LH: loop header
LB: loop body
LE: loop exit
PB: predicated region body
PF: predicated region fallthrough
CT: control target
= control target key end

     0   :  { %s412_s9 = smov 0   ;;  %s414_s10 = smov 0   ;;  %s455_s0 = inlined_call_operand.vmem [shape: f32[4,2], index: 0, kind: input, shape index: {}]   ;;  %s456_s1 = inlined_call_operand.vmem [shape: bf16[2,4,384], index: 1, kind: input, shape index: {}]   ;;  %s457_s2 = inlined_call_operand.vmem [shape: bf16[2,4,384], index: 2, kind: output, shape index: {}]  }
   0x1   :  { %s416_s11 = smov 0  }
   0x2 LB: > { %s24_s12 = sadd.s32 1, %s388_s10  ;;  %p335_p0 = scmp.ge.s32.totalorder %s392_s11, 1  ;;  %s392_s11 = sphi %s416_s11, %s12_s11   ;;  %s388_s10 = sphi %s414_s10, %s459_s10   ;;  %s384_s9 = sphi %s412_s9, %s458_s9  }
   0x3   : > { %p26_p1 = scmp.ge.s32.totalorder %s24_s12, 2  ;;  %p133_p2 = scmp.lt.s32.totalorder %s392_s11, 3 }
   0x5   : > { %s461_s12 = smov (%p26_p1, %s24_s12), 0  ;;  %p134_p3 = pnand %p335_p0, %p133_p2 }
   0x6   : > { %p164_p4 = scmp.lt.s32.totalorder (!%p134_p3), %s384_s9, 1 }
   0x7   : > { %137 = sbr.rel (%p134_p3) target bundleno = 161 (0xa1), region = 28 }
   0xc   : > { %v183_v0 = vld [vmem:[%s455_s0] sm:$0xf]  ;;  %v394_v1 = vmov 0   ;;  %v395_v2 = vmov 1   ;;  %s463_s9 = smov (!%p164_p4, %s384_s9), 1  ;;  %vm232_vm2 = vcmask 1041408  }
   0xd   : > { %368 = vset.pattern.permute.xlu0 %v394_v1  ;;  %s340_s15 = smul.u32 6, %s463_s9  ;;  %v396_v3 = vmov 839922192   ;;  %vm236_vm3 = vcmask 1045508   ;;  %vm240_vm4 = vcmask 1043456  }
   0xe   : > { %189 = vperm.xlu0 %368, %v183_v0   ;;  %v192_v4 = vunpack.c.l.s4 %v396_v3 }
   0xf   : > { %s171_s18 = scalar_lea.vmem %s456_s1, %s340_s15  ;;  %s181_s21 = scalar_lea.vmem %s457_s2, %s340_s15 }
  0x10   : > { %v193_v6 = vunpack.c.0.s8 %v192_v4  ;;  %v184_v7 = vld [vmem:[%s171_s18] sm:$0x3f] }
  0x11   : > { %v185_v8 = vunpack.c.l.bf16 %v184_v7  ;;  %v186_v9 = vunpack.c.h.bf16 %v184_v7 }
  0x16   : > { %369 = vset.pattern.permute.xlu0 %v395_v2 }
  0x17   : > { %199 = vperm.xlu0 %369, %v183_v0  }
  0x80   : > { %v190_v5 = vpop.permute.xlu0 %189 }
  0x81   : > { %v194_v10 = vperm.slane %v190_v5, %v193_v6 }
  0x83   : > { %v196_v12 = vmul.f32 %v194_v10, %v185_v8  ;;  %v197_v13 = vmul.f32 %v194_v10, %v186_v9 }
  0x89   : > { %v200_v11 = vpop.permute.xlu0 %199 }
  0x8a   : > { %v204_v14 = vperm.slane %v200_v11, %v193_v6 }
  0x8c   : > { %v206_v15 = vadd.f32 %v204_v14, %v196_v12  ;;  %v207_v16 = vadd.f32 %v204_v14, %v197_v13 }
  0x8e   : > { %vm208_vm0 = vcmp.ge.f32.partialorder %v206_v15, 0.0  ;;  %vm209_vm1 = vcmp.ge.f32.partialorder %v207_v16, 0.0  ;;  %v210_v17 = vmul.f32 0.22916667, %v206_v15  ;;  %v211_v18 = vmul.f32 0.22916667, %v207_v16 }
  0x90   : > { %v212_v19 = vsel %vm208_vm0, %v206_v15, %v210_v17  ;;  %v213_v20 = vsel %vm209_vm1, %v207_v16, %v211_v18 }
  0x91   : > { %216 = vst [vmem:[#allocation1] ss:$2 sm:$0xff] %v212_v19 }
  0x92   : > { %218 = vst [vmem:[#allocation1 + $0x10] ss:$2 sm:$0xff] %v213_v20 }
  0x98   : > { %v219_v21 = vld.sshfl [vmem:[#allocation1] sm:$0xff pattern:$0x75316420]  ;;  %v220_v22 = vld.sshfl [vmem:[#allocation1 + $0x8] sm:$0xff pattern:$0x75316420] }
  0x99   : > { %v221_v23 = vld.sshfl [vmem:[#allocation1 + $0x10] sm:$0xff pattern:$0x75316420]  ;;  %v225_v24 = vpack.c.bf16 %v220_v22, %v219_v21 }
  0x9a   : > { %v226_v25 = vpack.c.bf16 %v221_v23, %v221_v23 }
  0x9b   : > { %v229_v26 = vrot.slane %v225_v24, 2 }
  0x9c   : > { %v230_v27 = vrot.slane %v226_v25, 4  ;;  %v231_v28 = vrot.slane %v226_v25, 6 }
  0x9d   : > { %v235_v29 = vsel %vm232_vm2, %v225_v24, %v229_v26 }
  0x9e   : > { %v239_v30 = vsel %vm236_vm3, %v230_v27, %v231_v28 }
  0x9f   : > { %v241_v31 = vsel %vm240_vm4, %v235_v29, %v239_v30 }
  0xa0   : > { %243 = vst [vmem:[%s181_s21] sm:$0x3f] %v241_v31 }
  0xa1 PF: > { %s12_s11 = sadd.s32 1, %s392_s11   ;;  %s458_s9 = smov %s388_s10 }
  0xa2   : > { %p9_p5 = scmp.ge.s32.totalorder %s12_s11, 4   ;;  %s459_s10 = smov %s461_s12 }
  0xa4   :  { %11 = sbr.rel (!%p9_p5) target bundleno = 2 (0x2), region = 59 }

// kernel: res_up_forward.4
= control target key start
LH: loop header
LB: loop body
LE: loop exit
PB: predicated region body
PF: predicated region fallthrough
CT: control target
= control target key end

     0   :  { %s857_s15 = smov 0   ;;  %s859_s16 = smov 0   ;;  %s935_s0 = inlined_call_operand.vmem [shape: bf16[4,36], index: 0, kind: input, shape index: {}]   ;;  %s936_s1 = inlined_call_operand.vmem [shape: f32[1,384], index: 1, kind: input, shape index: {}]   ;;  %s937_s2 = inlined_call_operand.vmem [shape: bf16[2,4,422], index: 2, kind: input, shape index: {}]   ;;  %s938_s3 = inlined_call_operand.vmem [shape: bf16[2,4,384], index: 3, kind: output, shape index: {0}]   ;;  %s939_s4 = inlined_call_operand.vmem [shape: f32[2,1,4,2], index: 4, kind: output, shape index: {1}]  }
   0x1   :  { %s861_s17 = smov 0  }
   0x2 LB: > { %s27_s18 = sadd.s32 1, %s818_s16  ;;  %p726_p0 = scmp.ge.s32.totalorder %s822_s17, 1  ;;  %s822_s17 = sphi %s861_s17, %s15_s17   ;;  %s818_s16 = sphi %s859_s16, %s941_s16   ;;  %s814_s15 = sphi %s857_s15, %s940_s15  }
   0x3   : > { %p29_p1 = scmp.ge.s32.totalorder %s27_s18, 2  ;;  %p191_p2 = scmp.lt.s32.totalorder %s822_s17, 3 }
   0x5   : > { %s943_s18 = smov (%p29_p1, %s27_s18), 0  ;;  %p192_p3 = pnand %p726_p0, %p191_p2 }
   0x6   : > { %p237_p4 = scmp.lt.s32.totalorder (!%p192_p3), %s814_s15, 1  ;;  %s824_s23 = smov (!%p192_p3), 127  }
   0x7   : > { %195 = sbr.rel (%p192_p3) target bundleno = 498 (0x1f2), region = 32  ;;  %s825_s24 = smov (!%p192_p3), 126  }
   0x8   : > { %s826_s25 = smov (!%p192_p3), 109   ;;  %s827_s26 = smov (!%p192_p3), 108  }
   0x9   : > { %s828_s27 = smov (!%p192_p3), 92   ;;  %s829_s28 = smov (!%p192_p3), 91  }
   0xa   : > { %s830_s29 = smov (!%p192_p3), 90   ;;  %s831_s30 = smov (!%p192_p3), 110  }
   0xc   : > { %s945_s15 = smov (!%p237_p4, %s814_s15), 1  ;;  %vm307_vm0 = vcmask 1031168   ;;  %vm288_vm1 = vcmask 1039360   ;;  %vm385_vm2 = vcmask 752640   ;;  %vm286_vm3 = vcmask 1043456  }
   0xd   : > { %s760_s19 = sshll.u32 %s945_s15, 3  ;;  %vm346_vm4 = vcmask 891904   ;;  %vm366_vm5 = vcmask 883712   ;;  %vm405_vm6 = vcmask 744448   ;;  %vm424_vm7 = vcmask 736256   ;;  %s767_s9 = smul.u32 6, %s945_s15 }
   0xe   : > { %s241_s22 = scalar_lea.vmem %s937_s2, %s760_s19  ;;  %vm486_vm8 = vcmask 1041408   ;;  %vm327_vm9 = vcmask 900096   ;;  %vm482_vm10 = vcmask 293888   ;;  %vm545_vm11 = vcmask 1045508   ;;  %s730_s13 = sshll.u32 %s945_s15, 2 }
   0xf   : > { %v265_v0 = vld [vmem:[%s241_s22] sm:$0xff]  ;;  %s250_s12 = scalar_lea.vmem %s938_s3, %s767_s9  ;;  %vm581_vm12 = vcmask 7168   ;;  %s258_s20 = scalar_lea.vmem %s939_s4, %s730_s13  ;;  %vm583_vm13 = vcmask 11264  }
  0x10   : > { %267 = vst [vmem:[#allocation1] ss:$2 sm:$0xff] %v265_v0 }
  0x17   : > { %v268_v1 = vld.sshfl [vmem:[#allocation1] sm:$0xff pattern:$0x75643120]  ;;  %v269_v2 = vld.sshfl [vmem:[#allocation1 + $0x8] sm:$0xff pattern:$0x75643120] }
  0x18   : > { %275 = vst [vmem:[#allocation1 + $0x1] ss:$2 sm:$0xff] %v265_v0 }
  0x19   : > { %272 = vst [vmem:[#allocation2] sm:$0x33] %v268_v1 }
  0x1a   : > { %273 = vst [vmem:[#allocation2 + $0x8] sm:$0x3] %v269_v2 }
  0x1f   : > { %v278_v3 = vld.sshfl [vmem:[#allocation1 + $0x8] sm:$0xff pattern:$0x75643120]  ;;  %v276_v4 = vld.sshfl [vmem:[#allocation1] sm:$0xff pattern:$0x75643120] }
  0x20   : > { %282 = vrot.lane.b32.xlu1 %v278_v3, %s824_s23  ;;  %295 = vst [vmem:[#allocation1] ss:$2 sm:$0xff] %v265_v0 }
  0x27   : > { %v296_v5 = vld.sshfl [vmem:[#allocation1] sm:$0xff pattern:$0x75643120]  ;;  %v298_v6 = vld.sshfl [vmem:[#allocation1 + $0x8] sm:$0xff pattern:$0x75643120] }
  0x28   : > { %315 = vst [vmem:[#allocation1 + $0x1] ss:$2 sm:$0xff] %v265_v0  ;;  %302 = vrot.lane.b32.xlu2 %v298_v6, %s825_s24 }
  0x2f   : > { %v316_v7 = vld.sshfl [vmem:[#allocation1] sm:$0xff pattern:$0x75643120]  ;;  %v318_v8 = vld.sshfl [vmem:[#allocation1 + $0x8] sm:$0xff pattern:$0x75643120] }
  0x30   : > { %334 = vst [vmem:[#allocation1] ss:$2 sm:$0xff] %v265_v0 }
  0x37   : > { %v337_v9 = vld.sshfl [vmem:[#allocation1 + $0x8] sm:$0xff pattern:$0x75643120]  ;;  %v335_v10 = vld.sshfl [vmem:[#allocation1] sm:$0xff pattern:$0x75643120] }
  0x38   : > { %341 = vrot.lane.b32.xlu1 %v337_v9, %s826_s25  ;;  %354 = vst [vmem:[#allocation1 + $0x1] ss:$2 sm:$0xff] %v265_v0  ;;  %339 = vrot.lane.b32.xlu0 %v335_v10, %s826_s25 }
  0x3f   : > { %v357_v11 = vld.sshfl [vmem:[#allocation1 + $0x8] sm:$0xff pattern:$0x75643120]  ;;  %v355_v12 = vld.sshfl [vmem:[#allocation1] sm:$0xff pattern:$0x75643120] }
  0x40   : > { %361 = vrot.lane.b32.xlu1 %v357_v11, %s827_s26  ;;  %373 = vst [vmem:[#allocation1] ss:$2 sm:$0xff] %v265_v0 }
  0x47   : > { %v376_v13 = vld.sshfl [vmem:[#allocation1 + $0x8] sm:$0xff pattern:$0x75643120]  ;;  %v374_v14 = vld.sshfl [vmem:[#allocation1] sm:$0xff pattern:$0x75643120] }
  0x48   : > { %359 = vrot.lane.b32.xlu1 %v355_v12, %s827_s26  ;;  %380 = vrot.lane.b32.xlu2 %v376_v13, %s828_s27  ;;  %393 = vst [vmem:[#allocation1 + $0x1] ss:$2 sm:$0xff] %v265_v0 }
  0x4f   : > { %v394_v15 = vld.sshfl [vmem:[#allocation1] sm:$0xff pattern:$0x75643120]  ;;  %v396_v16 = vld.sshfl [vmem:[#allocation1 + $0x8] sm:$0xff pattern:$0x75643120] }
  0x50   : > { %280 = vrot.lane.b32.xlu1 %v276_v4, %s824_s23  ;;  %398 = vrot.lane.b32.xlu0 %v394_v15, %s829_s28  ;;  %412 = vst [vmem:[#allocation1] ss:$2 sm:$0xff] %v265_v0 }
  0x51   : > { %378 = vrot.lane.b32.xlu2 %v374_v14, %s828_s27 }
  0x57   : > { %v415_v17 = vld.sshfl [vmem:[#allocation1 + $0x8] sm:$0xff pattern:$0x75643120]  ;;  %v413_v18 = vld.sshfl [vmem:[#allocation1] sm:$0xff pattern:$0x75643120] }
  0x58   : > { %419 = vrot.lane.b32.xlu0 %v415_v17, %s830_s29 }
  0x59   : > { %400 = vrot.lane.b32.xlu2 %v396_v16, %s829_s28 }
  0x60   : > { %417 = vrot.lane.b32.xlu0 %v413_v18, %s830_s29 }
  0x61   : > { %300 = vrot.lane.b32.xlu2 %v296_v5, %s825_s24 }
  0x68   : > { %322 = vrot.lane.b32.xlu0 %v318_v8, %s831_s30 }
  0x70   : > { %320 = vrot.lane.b32.xlu0 %v316_v7, %s831_s30 }
  0x82   : > { %v303_v19 = vpop.permute.xlu2 %302 }
  0x83   : > { %v305_v20 = vrot.slane %v303_v19, 4 }
  0x85   : > { %v309_v21 = vsel %vm307_vm0, %v303_v19, %v305_v20 }
  0x86   : > { %313 = vst [vmem:[#allocation2 + $0x14] sm:$0x3] %v309_v21 }
  0x92   : > { %v283_v22 = vpop.permute.xlu1 %282 }
  0x93   : > { %v285_v23 = vrot.slane %v283_v22, 4 }
  0x95   : > { %v290_v24 = vsel %vm288_vm1, %v283_v22, %v285_v23 }
  0x96   : > { %294 = vst [vmem:[#allocation2 + $0x8] sm:$0xc] %v290_v24 }
  0xa2   : > { %v381_v25 = vpop.permute.xlu2 %380 }
  0xa3   : > { %v383_v26 = vrot.slane %v381_v25, 4 }
  0xa5   : > { %v387_v27 = vsel %vm385_vm2, %v381_v25, %v383_v26  ;;  %v741_v25 = vld [vmem:[#allocation2 + $0x8] sm:$0xf] }
  0xa6   : > { %391 = vst [vmem:[#allocation2 + $0x2c] sm:$0x3] %v387_v27 }
  0xaa   : > { %v342_v28 = vpop.permute.xlu1 %341  ;;  %v340_v29 = vpop.permute.xlu0 %339 }
  0xab   : > { %v344_v30 = vrot.slane %v342_v28, 4  ;;  %v379_v31 = vpop.permute.xlu2 %378  ;;  %v343_v32 = vrot.slane %v340_v29, 4 }
  0xac   : > { %v382_v33 = vrot.slane %v379_v31, 4 }
  0xad   : > { %v348_v34 = vsel %vm346_vm4, %v342_v28, %v344_v30  ;;  %v345_v35 = vsel %vm286_vm3, %v343_v32, %v344_v30 }
  0xae   : > { %352 = vst [vmem:[#allocation2 + $0x20] sm:$0x3] %v348_v34  ;;  %v384_v36 = vsel %vm286_vm3, %v382_v33, %v383_v26  ;;  %v347_v37 = vsel %vm346_vm4, %v340_v29, %v345_v35  ;;  %v431_v34 = vld [vmem:[%s935_s0] sm:$0x3] }
  0xaf   : > { %v386_v38 = vsel %vm385_vm2, %v379_v31, %v384_v36  ;;  %351 = vst [vmem:[#allocation2 + $0x18] sm:$0x33] %v347_v37 }
  0xb0   : > { %390 = vst [vmem:[#allocation2 + $0x24] sm:$0x33] %v386_v38 }
  0xb2   : > { %v362_v39 = vpop.permute.xlu1 %361 }
  0xb3   : > { %v364_v40 = vrot.slane %v362_v39, 4  ;;  %v401_v41 = vpop.permute.xlu2 %400 }
  0xb4   : > { %v403_v42 = vrot.slane %v401_v41, 4 }
  0xb5   : > { %v368_v43 = vsel %vm366_vm5, %v362_v39, %v364_v40 }
  0xb6   : > { %372 = vst [vmem:[#allocation2 + $0x20] sm:$0xc] %v368_v43  ;;  %v407_v44 = vsel %vm405_vm6, %v401_v41, %v403_v42  ;;  %v553_v41 = vld [vmem:[%s936_s1] sm:$0x7] }
  0xb7   : > { %411 = vst [vmem:[#allocation2 + $0x2c] sm:$0xc] %v407_v44  ;;  %v555_v43 = vperm.slane %v553_v41, 0 }
  0xba   : > { %v360_v45 = vpop.permute.xlu1 %359 }
  0xbb   : > { %v363_v46 = vrot.slane %v360_v45, 4  ;;  %v301_v47 = vpop.permute.xlu2 %300 }
  0xbc   : > { %v304_v48 = vrot.slane %v301_v47, 4 }
  0xbd   : > { %v365_v49 = vsel %vm286_vm3, %v363_v46, %v364_v40  ;;  %v753_v9 = vld [vmem:[#allocation2 + $0x20] sm:$0xf] }
  0xbe   : > { %v367_v50 = vsel %vm366_vm5, %v360_v45, %v365_v49  ;;  %v306_v51 = vsel %vm286_vm3, %v304_v48, %v305_v20  ;;  %v766_v10 = vld [vmem:[#allocation2 + $0x28] sm:$0xf0]  ;;  %v556_v45 = vperm.slane %v553_v41, 1 }
  0xbf   : > { %371 = vst [vmem:[#allocation2 + $0x18] sm:$0xcc] %v367_v50  ;;  %v308_v52 = vsel %vm307_vm0, %v301_v47, %v306_v51  ;;  %v754_v13 = vor.u32 %v766_v10, %v753_v9 }
  0xc0   : > { %312 = vst [vmem:[#allocation2 + $0xc] sm:$0x33] %v308_v52 }
  0xc2   : > { %v281_v53 = vpop.permute.xlu1 %280  ;;  %v399_v54 = vpop.permute.xlu0 %398 }
  0xc3   : > { %v284_v55 = vrot.slane %v281_v53, 4  ;;  %v402_v56 = vrot.slane %v399_v54, 4 }
  0xc5   : > { %v287_v57 = vsel %vm286_vm3, %v284_v55, %v285_v23  ;;  %v404_v58 = vsel %vm286_vm3, %v402_v56, %v403_v42  ;;  %v557_v42 = vperm.slane %v553_v41, 2 }
  0xc6   : > { %v289_v59 = vsel %vm288_vm1, %v281_v53, %v287_v57  ;;  %v406_v60 = vsel %vm405_vm6, %v399_v54, %v404_v58  ;;  %v745_v27 = vld [vmem:[#allocation2 + $0x18] sm:$0xf]  ;;  %v764_v28 = vld [vmem:[#allocation2 + $0x1c] sm:$0xf] }
  0xc7   : > { %293 = vst [vmem:[#allocation2] sm:$0xcc] %v289_v59 }
  0xc8   : > { %410 = vst [vmem:[#allocation2 + $0x24] sm:$0xcc] %v406_v60 }
  0xca   : > { %v420_v61 = vpop.permute.xlu0 %419 }
  0xcb   : > { %v422_v62 = vrot.slane %v420_v61, 4 }
  0xcd   : > { %v426_v63 = vsel %vm424_vm7, %v420_v61, %v422_v62 }
  0xce   : > { %430 = vst [vmem:[#allocation2 + $0x38] sm:$0x3] %v426_v63  ;;  %v733_v35 = vld [vmem:[#allocation2] sm:$0xf]  ;;  %v761_v37 = vld [vmem:[#allocation2 + $0x4] sm:$0xf] }
  0xcf   : > { %v765_v20 = vld [vmem:[#allocation2 + $0x20] sm:$0xf0]  ;;  %v747_v24 = vld [vmem:[#allocation2 + $0x24] sm:$0xf0] }
  0xd0   : > { %v746_v31 = vor.u32 %v765_v20, %v745_v27  ;;  %v750_v32 = vor.u32 %v764_v28, %v747_v24 }
  0xd2   : > { %v418_v0 = vpop.permute.xlu0 %417 }
  0xd3   : > { %v421_v1 = vrot.slane %v418_v0, 4 }
  0xd5   : > { %v423_v2 = vsel %vm286_vm3, %v421_v1, %v422_v62  ;;  %v441_v3 = vld [vmem:[#allocation2 + $0x38] sm:$0x3] }
  0xd6   : > { %v425_v4 = vsel %vm424_vm7, %v418_v0, %v423_v2  ;;  %v466_v5 = vunpack.c.l.b16 %v441_v3 }
  0xd7   : > { %429 = vst [vmem:[#allocation2 + $0x30] sm:$0x33] %v425_v4 }
  0xd8   : > { %v475_v6 = vpack.c.b16 %v466_v5, %v466_v5 }
  0xda   : > { %v323_v7 = vpop.permute.xlu0 %322  ;;  %v494_v8 = vsel %vm486_vm8, %v475_v6, 0 }
  0xdb   : > { %v325_v11 = vrot.slane %v323_v7, 4  ;;  %527 = vmatpush.bf16.msra.mxu2 %v494_v8 }
  0xdd   : > { %v329_v12 = vsel %vm327_vm9, %v323_v7, %v325_v11 }
  0xde   : > { %333 = vst [vmem:[#allocation2 + $0x14] sm:$0xc] %v329_v12  ;;  %v440_v14 = vld [vmem:[#allocation2 + $0x30] sm:$0x33] }
  0xdf   : > { %528 = vmatpush.bf16.msra.mxu2 %v754_v13  ;;  %v464_v15 = vunpack.c.l.b16 %v440_v14  ;;  %v465_v16 = vunpack.c.h.b16 %v440_v14 }
  0xe1   : > { %v473_v17 = vpack.c.b16 %v464_v15, %v464_v15  ;;  %v474_v18 = vpack.c.b16 %v465_v16, %v465_v16 }
  0xe2   : > { %v321_v19 = vpop.permute.xlu0 %320 }
  0xe3   : > { %v324_v21 = vrot.slane %v321_v19, 4  ;;  %v488_v22 = vsel %vm486_vm8, %v473_v17, 0  ;;  %v491_v23 = vsel %vm486_vm8, %v474_v18, 0 }
  0xe4   : > { %501 = vmatpush.bf16.msra.mxu0 %v488_v22  ;;  %514 = vmatpush.bf16.msra.mxu1 %v491_v23 }
  0xe5   : > { %v326_v26 = vsel %vm286_vm3, %v324_v21, %v325_v11  ;;  %v763_v29 = vld [vmem:[#allocation2 + $0x10] sm:$0xf0] }
  0xe6   : > { %v328_v30 = vsel %vm327_vm9, %v321_v19, %v326_v26  ;;  %v742_v33 = vor.u32 %v763_v29, %v741_v25 }
  0xe7   : > { %332 = vst [vmem:[#allocation2 + $0xc] sm:$0xcc] %v328_v30 }
  0xe8   : > { %502 = vmatpush.bf16.msra.mxu0 %v746_v31  ;;  %515 = vmatpush.bf16.msra.mxu1 %v750_v32 }
  0xe9   : > { %529 = vmatpush.bf16.msra.mxu2 %v742_v33 }
  0xec   : > { %757 = vmatmul.msk.bf16.vlgmr.msra.gmra.mxu2 %vm482_vm10, %v431_v34 }
  0xee   : > { %v762_v36 = vld [vmem:[#allocation2 + $0x8] sm:$0xf0]  ;;  %v735_v38 = vld [vmem:[#allocation2 + $0xc] sm:$0xf0] }
  0xef   : > { %v734_v39 = vor.u32 %v762_v36, %v733_v35  ;;  %v738_v40 = vor.u32 %v761_v37, %v735_v38 }
  0xf1   : > { %503 = vmatpush.bf16.msra.mxu0 %v734_v39  ;;  %516 = vmatpush.bf16.msra.mxu1 %v738_v40 }
  0xf4   : > { %755 = vmatmul.msk.bf16.vlgmr.msra.gmra.mxu0 %vm482_vm10, %v431_v34  ;;  %756 = vmatmul.msk.bf16.vlgmr.msra.gmra.mxu1 %vm482_vm10, %v431_v34 }
 0x16f   : > { %v531_v44 = vpop.f32.mrf.mxu2 }
 0x170   : > { %v536_v46 = vpack.c.bf16 %v531_v44, %v531_v44  ;;  %v563_v47 = vmul.f32 %v557_v42, %v531_v44 }
 0x171   : > { %v505_v48 = vpop.f32.mrf.mxu0  ;;  %v518_v49 = vpop.f32.mrf.mxu1 }
 0x172   : > { %v540_v50 = vrot.slane %v536_v46, 4  ;;  %v541_v51 = vrot.slane %v536_v46, 6  ;;  %v561_v52 = vmul.f32 %v555_v43, %v505_v48  ;;  %v573_v53 = vmul.f32 %v563_v47, %v563_v47 }
 0x173   : > { %v535_v54 = vpack.c.bf16 %v518_v49, %v505_v48  ;;  %v562_v55 = vmul.f32 %v556_v45, %v518_v49  ;;  %v567_v58 = vsel %vm286_vm3, %v563_v47, 0.0 }
 0x174   : > { %v564_v56 = vsel %vm286_vm3, %v561_v52, 0.0  ;;  %v571_v57 = vmul.f32 %v561_v52, %v561_v52  ;;  %v548_v59 = vsel %vm545_vm11, %v540_v50, %v541_v51  ;;  %v577_v4 = vsel %vm286_vm3, %v573_v53, 0.0 }
 0x175   : > { %v539_v60 = vrot.slane %v535_v54, 2  ;;  %v565_v61 = vsel %vm286_vm3, %v562_v55, 0.0  ;;  %v572_v62 = vmul.f32 %v562_v55, %v562_v55 }
 0x176   : > { %v566_v63 = vadd.f32 %v565_v61, %v564_v56  ;;  %v574_v0 = vsel %vm286_vm3, %v571_v57, 0.0 }
 0x177   : > { %v544_v1 = vsel %vm486_vm8, %v535_v54, %v539_v60  ;;  %v533_v2 = vpop.f32.mrf.mxu2  ;;  %v575_v3 = vsel %vm286_vm3, %v572_v62, 0.0 }
 0x178   : > { %v550_v5 = vsel %vm286_vm3, %v544_v1, %v548_v59  ;;  %v568_v6 = vadd.f32 %v567_v58, %v566_v63  ;;  %v576_v7 = vadd.f32 %v575_v3, %v574_v0 }
 0x179   : > { %552 = vst [vmem:[%s250_s12] sm:$0x3f] %v550_v5  ;;  %v507_v8 = vpop.f32.mrf.mxu0  ;;  %v520_v9 = vpop.f32.mrf.mxu1 }
 0x17a   : > { %569 = vadd.xlane.f32.xlu1 %v568_v6  ;;  %v578_v10 = vadd.f32 %v577_v4, %v576_v7 }
 0x17c   : > { %579 = vadd.xlane.f32.xlu2 %v578_v10 }
 0x1ed   : > { %v570_v11 = vpop.xlane.xlu1 %569 }
 0x1ef   : > { %v580_v12 = vpop.xlane.xlu2 %579 }
 0x1f0   : > { %v582_v13 = vsel %vm581_vm12, %v570_v11, %v580_v12 }
 0x1f1   : > { %584 = vst.msk [vmem:[%s258_s20] sm:$0xf] %vm583_vm13, %v582_v13 }
 0x1f2 PF: > { %s15_s17 = sadd.s32 1, %s822_s17   ;;  %s940_s15 = smov %s818_s16 }
 0x1f3   : > { %p12_p5 = scmp.ge.s32.totalorder %s15_s17, 4   ;;  %s941_s16 = smov %s943_s18 }
 0x1f5   :  { %14 = sbr.rel (!%p12_p5) target bundleno = 2 (0x2), region = 82 }

// kernel: res_up_forward.7
= control target key start
LH: loop header
LB: loop body
LE: loop exit
PB: predicated region body
PF: predicated region fallthrough
CT: control target
= control target key end

     0   :  { %s571_s12 = smov 0   ;;  %s573_s13 = smov 0   ;;  %s645_s0 = inlined_call_operand.vmem [shape: f32[8,2], index: 0, kind: input, shape index: {}]   ;;  %s646_s1 = inlined_call_operand.vmem [shape: bf16[2,4,8,384], index: 1, kind: input, shape index: {}]   ;;  %s647_s2 = inlined_call_operand.vmem [shape: bf16[2,4,8,384], index: 2, kind: input, shape index: {}]   ;;  %s648_s3 = inlined_call_operand.vmem [shape: f32[2,4,8,384], index: 3, kind: output, shape index: {}]  }
   0x1   :  { %s575_s14 = smov 0  }
   0x2 LB: > { %s25_s15 = sadd.s32 1, %s543_s13  ;;  %p489_p0 = scmp.ge.s32.totalorder %s547_s14, 1  ;;  %s547_s14 = sphi %s575_s14, %s13_s14   ;;  %s543_s13 = sphi %s573_s13, %s650_s13   ;;  %s539_s12 = sphi %s571_s12, %s649_s12  }
   0x3   : > { %p27_p1 = scmp.ge.s32.totalorder %s25_s15, 2  ;;  %p175_p2 = scmp.lt.s32.totalorder %s547_s14, 3 }
   0x5   : > { %s652_s15 = smov (%p27_p1, %s25_s15), 0  ;;  %p176_p3 = pnand %p489_p0, %p175_p2 }
   0x6   : > { %p217_p4 = scmp.lt.s32.totalorder (!%p176_p3), %s539_s12, 1 }
   0x7   : > { %179 = sbr.rel (%p176_p3) target bundleno = 160 (0xa0), region = 32 }
   0xc   : > { %v246_v0 = vld [vmem:[%s645_s0] sm:$0xff]  ;;  %v549_v1 = vmov 0   ;;  %v550_v2 = vmov 1   ;;  %s654_s12 = smov (!%p217_p4, %s539_s12), 1 }
   0xd   : > { %523 = vset.pattern.permute.xlu0 %v549_v1  ;;  %s495_s18 = smul.u32 48, %s654_s12 }
   0xe   : > { %269 = vperm.xlu0 %523, %v246_v0   ;;  %s496_s25 = smul.u32 96, %s654_s12 }
   0xf   : > { %s224_s21 = scalar_lea.vmem %s646_s1, %s495_s18  ;;  %s601_s24 = scalar_lea.vmem %s647_s2, %s495_s18 }
  0x10   : > { %v247_v4 = vld [vmem:[%s224_s21] sm:$0xff]  ;;  %v248_v5 = vld [vmem:[%s224_s21 + $0x8] sm:$0xf]  ;;  %v249_v6 = vld [vmem:[%s224_s21 + $0xc] sm:$0xff]  ;;  %s615_s28 = scalar_lea.vmem %s648_s3, %s496_s25 }
  0x11   : > { %v250_v7 = vld [vmem:[%s224_s21 + $0x14] sm:$0xf]  ;;  %v251_v8 = vld [vmem:[%s224_s21 + $0x18] sm:$0xff]  ;;  %v252_v9 = vld [vmem:[%s224_s21 + $0x20] sm:$0xf]  ;;  %v255_v12 = vunpack.c.l.bf16 %v247_v4  ;;  %v256_v13 = vunpack.c.h.bf16 %v247_v4  ;;  %v257_v14 = vunpack.c.l.bf16 %v248_v5  ;;  %v258_v17 = vunpack.c.l.bf16 %v249_v6 }
  0x12   : > { %v253_v10 = vld [vmem:[%s224_s21 + $0x24] sm:$0xff]  ;;  %v254_v11 = vld [vmem:[%s224_s21 + $0x2c] sm:$0xf]  ;;  %v259_v18 = vunpack.c.h.bf16 %v249_v6  ;;  %v260_v19 = vunpack.c.l.bf16 %v250_v7  ;;  %v261_v20 = vunpack.c.l.bf16 %v251_v8  ;;  %v303_v22 = vld [vmem:[%s601_s24 + $0x14] sm:$0xf]  ;;  %v262_v24 = vunpack.c.h.bf16 %v251_v8 }
  0x13   : > { %v300_v15 = vld [vmem:[%s601_s24] sm:$0xff]  ;;  %v301_v16 = vld [vmem:[%s601_s24 + $0x8] sm:$0xf]  ;;  %v302_v21 = vld [vmem:[%s601_s24 + $0xc] sm:$0xff]  ;;  %v263_v25 = vunpack.c.l.bf16 %v252_v9  ;;  %v264_v26 = vunpack.c.l.bf16 %v253_v10  ;;  %v265_v27 = vunpack.c.h.bf16 %v253_v10  ;;  %v266_v28 = vunpack.c.l.bf16 %v254_v11 }
  0x14   : > { %v304_v23 = vld [vmem:[%s601_s24 + $0x18] sm:$0xff]  ;;  %v305_v29 = vld [vmem:[%s601_s24 + $0x20] sm:$0xf]  ;;  %v308_v30 = vunpack.c.l.bf16 %v300_v15  ;;  %v309_v31 = vunpack.c.h.bf16 %v300_v15  ;;  %v310_v32 = vunpack.c.l.bf16 %v301_v16  ;;  %v311_v33 = vunpack.c.l.bf16 %v302_v21  ;;  %v306_v58 = vld [vmem:[%s601_s24 + $0x24] sm:$0xff] }
  0x15   : > { %v312_v34 = vunpack.c.h.bf16 %v302_v21  ;;  %v313_v35 = vunpack.c.l.bf16 %v303_v22  ;;  %v314_v36 = vunpack.c.l.bf16 %v304_v23  ;;  %v315_v44 = vunpack.c.h.bf16 %v304_v23  ;;  %v307_v62 = vld [vmem:[%s601_s24 + $0x2c] sm:$0xf] }
  0x16   : > { %524 = vset.pattern.permute.xlu0 %v550_v2  ;;  %v316_v45 = vunpack.c.l.bf16 %v305_v29  ;;  %v317_v6 = vunpack.c.l.bf16 %v306_v58  ;;  %v318_v7 = vunpack.c.h.bf16 %v306_v58  ;;  %v319_v10 = vunpack.c.l.bf16 %v307_v62 }
  0x17   : > { %285 = vperm.xlu0 %524, %v246_v0  }
  0x80   : > { %v270_v3 = vpop.permute.xlu0 %269 }
  0x81   : > { %v272_v37 = vmul.f32 %v270_v3, %v255_v12  ;;  %v273_v38 = vmul.f32 %v270_v3, %v256_v13  ;;  %v274_v39 = vmul.f32 %v270_v3, %v257_v14  ;;  %v275_v40 = vmul.f32 %v270_v3, %v258_v17 }
  0x82   : > { %v276_v42 = vmul.f32 %v270_v3, %v259_v18  ;;  %v277_v43 = vmul.f32 %v270_v3, %v260_v19  ;;  %v278_v50 = vmul.f32 %v270_v3, %v261_v20  ;;  %v279_v51 = vmul.f32 %v270_v3, %v262_v24 }
  0x83   : > { %v280_v52 = vmul.f32 %v270_v3, %v263_v25  ;;  %v281_v54 = vmul.f32 %v270_v3, %v264_v26  ;;  %v282_v55 = vmul.f32 %v270_v3, %v265_v27  ;;  %v283_v56 = vmul.f32 %v270_v3, %v266_v28 }
  0x89   : > { %v286_v41 = vpop.permute.xlu0 %285 }
  0x8a   : > { %v288_v46 = vadd.f32 %v286_v41, %v272_v37  ;;  %v289_v47 = vadd.f32 %v286_v41, %v273_v38  ;;  %v290_v48 = vadd.f32 %v286_v41, %v274_v39  ;;  %v291_v49 = vadd.f32 %v286_v41, %v275_v40 }
  0x8b   : > { %v292_v53 = vadd.f32 %v286_v41, %v276_v42  ;;  %v293_v57 = vadd.f32 %v286_v41, %v277_v43  ;;  %v294_v59 = vadd.f32 %v286_v41, %v278_v50  ;;  %v295_v60 = vadd.f32 %v286_v41, %v279_v51 }
  0x8c   : > { %v296_v61 = vadd.f32 %v286_v41, %v280_v52  ;;  %v320_v63 = vadd.f32 %v308_v30, %v288_v46  ;;  %v321_v0 = vadd.f32 %v309_v31, %v289_v47  ;;  %v322_v1 = vadd.f32 %v310_v32, %v290_v48 }
  0x8d   : > { %v323_v2 = vadd.f32 %v311_v33, %v291_v49  ;;  %v324_v4 = vadd.f32 %v312_v34, %v292_v53  ;;  %v297_v5 = vadd.f32 %v286_v41, %v281_v54  ;;  %v298_v8 = vadd.f32 %v286_v41, %v282_v55 }
  0x8e   : > { %v299_v9 = vadd.f32 %v286_v41, %v283_v56  ;;  %v325_v11 = vadd.f32 %v313_v35, %v293_v57  ;;  %v326_v3 = vadd.f32 %v314_v36, %v294_v59  ;;  %v327_v12 = vadd.f32 %v315_v44, %v295_v60 }
  0x8f   : > { %v328_v13 = vadd.f32 %v316_v45, %v296_v61  ;;  %vm332_vm0 = vcmp.ge.f32.partialorder %v320_v63, 0.0  ;;  %vm333_vm1 = vcmp.ge.f32.partialorder %v321_v0, 0.0  ;;  %vm334_vm2 = vcmp.ge.f32.partialorder %v322_v1, 0.0 }
  0x90   : > { %vm335_vm3 = vcmp.ge.f32.partialorder %v323_v2, 0.0  ;;  %vm336_vm4 = vcmp.ge.f32.partialorder %v324_v4, 0.0  ;;  %v329_v14 = vadd.f32 %v317_v6, %v297_v5  ;;  %v344_v15 = vmul.f32 0.22916667, %v320_v63 }
  0x91   : > { %v345_v16 = vmul.f32 0.22916667, %v321_v0  ;;  %v346_v17 = vmul.f32 0.22916667, %v322_v1  ;;  %v330_v18 = vadd.f32 %v318_v7, %v298_v8  ;;  %v347_v19 = vmul.f32 0.22916667, %v323_v2 }
  0x92   : > { %v348_v20 = vmul.f32 0.22916667, %v324_v4  ;;  %v349_v21 = vmul.f32 0.22916667, %v325_v11  ;;  %v331_v22 = vadd.f32 %v319_v10, %v299_v9  ;;  %vm337_vm5 = vcmp.ge.f32.partialorder %v325_v11, 0.0 }
  0x93   : > { %v350_v23 = vmul.f32 0.22916667, %v326_v3  ;;  %v356_v24 = vsel %vm332_vm0, %v320_v63, %v344_v15  ;;  %vm338_vm6 = vcmp.ge.f32.partialorder %v326_v3, 0.0  ;;  %vm339_vm7 = vcmp.ge.f32.partialorder %v327_v12, 0.0 }
  0x94   : > { %v351_v25 = vmul.f32 0.22916667, %v327_v12  ;;  %v357_v26 = vsel %vm333_vm1, %v321_v0, %v345_v16  ;;  %368 = vst [vmem:[%s615_s28] sm:$0xff] %v356_v24  ;;  %v352_v27 = vmul.f32 0.22916667, %v328_v13  ;;  %v358_v28 = vsel %vm334_vm2, %v322_v1, %v346_v17 }
  0x95   : > { %v359_v29 = vsel %vm335_vm3, %v323_v2, %v347_v19  ;;  %v360_v30 = vsel %vm336_vm4, %v324_v4, %v348_v20  ;;  %369 = vst [vmem:[%s615_s28 + $0x8] sm:$0xff] %v357_v26  ;;  %vm340_vm8 = vcmp.ge.f32.partialorder %v328_v13, 0.0  ;;  %v353_v31 = vmul.f32 0.22916667, %v329_v14 }
  0x96   : > { %v361_v32 = vsel %vm337_vm5, %v325_v11, %v349_v21  ;;  %370 = vst [vmem:[%s615_s28 + $0x10] sm:$0xff] %v358_v28  ;;  %vm341_vm9 = vcmp.ge.f32.partialorder %v329_v14, 0.0  ;;  %v354_v33 = vmul.f32 0.22916667, %v330_v18  ;;  %v362_v34 = vsel %vm338_vm6, %v326_v3, %v350_v23 }
  0x97   : > { %371 = vst [vmem:[%s615_s28 + $0x18] sm:$0xff] %v359_v29  ;;  %vm342_vm10 = vcmp.ge.f32.partialorder %v330_v18, 0.0  ;;  %v355_v35 = vmul.f32 0.22916667, %v331_v22  ;;  %v363_v36 = vsel %vm339_vm7, %v327_v12, %v351_v25  ;;  %vm343_vm11 = vcmp.ge.f32.partialorder %v331_v22, 0.0 }
  0x98   : > { %372 = vst [vmem:[%s615_s28 + $0x20] sm:$0xff] %v360_v30  ;;  %v364_v37 = vsel %vm340_vm8, %v328_v13, %v352_v27  ;;  %v365_v38 = vsel %vm341_vm9, %v329_v14, %v353_v31  ;;  %v366_v39 = vsel %vm342_vm10, %v330_v18, %v354_v33 }
  0x99   : > { %373 = vst [vmem:[%s615_s28 + $0x28] sm:$0xff] %v361_v32  ;;  %v367_v40 = vsel %vm343_vm11, %v331_v22, %v355_v35 }
  0x9a   : > { %374 = vst [vmem:[%s615_s28 + $0x30] sm:$0xff] %v362_v34 }
  0x9b   : > { %375 = vst [vmem:[%s615_s28 + $0x38] sm:$0xff] %v363_v36 }
  0x9c   : > { %376 = vst [vmem:[%s615_s28 + $0x40] sm:$0xff] %v364_v37 }
  0x9d   : > { %377 = vst [vmem:[%s615_s28 + $0x48] sm:$0xff] %v365_v38 }
  0x9e   : > { %378 = vst [vmem:[%s615_s28 + $0x50] sm:$0xff] %v366_v39 }
  0x9f   : > { %379 = vst [vmem:[%s615_s28 + $0x58] sm:$0xff] %v367_v40 }
  0xa0 PF: > { %s13_s14 = sadd.s32 1, %s547_s14   ;;  %s649_s12 = smov %s543_s13 }
  0xa1   : > { %p10_p5 = scmp.ge.s32.totalorder %s13_s14, 4   ;;  %s650_s13 = smov %s652_s15 }
  0xa3   :  { %12 = sbr.rel (!%p10_p5) target bundleno = 2 (0x2), region = 65 }

// kernel: res_up_forward.6
= control target key start
LH: loop header
LB: loop body
LE: loop exit
PB: predicated region body
PF: predicated region fallthrough
CT: control target
= control target key end

     0   :  { %s2112_s27 = smov 0   ;;  %s2114_s28 = smov 0   ;;  %s2482_s0 = inlined_call_operand.vmem [shape: bf16[4,8,16], index: 0, kind: input, shape index: {}]   ;;  %s2483_s1 = inlined_call_operand.vmem [shape: bf16[4,8,16], index: 1, kind: input, shape index: {}]   ;;  %s2484_s2 = inlined_call_operand.vmem [shape: f32[8,1], index: 2, kind: input, shape index: {}]   ;;  %s2485_s3 = inlined_call_operand.vmem [shape: f32[1,384], index: 3, kind: input, shape index: {}]   ;;  %s2486_s4 = inlined_call_operand.vmem [shape: bf16[2,4,422], index: 4, kind: input, shape index: {}]   ;;  %s2487_s5 = inlined_call_operand.vmem [shape: bf16[2,4,422], index: 5, kind: input, shape index: {}]   ;;  %s2488_s6 = inlined_call_operand.vmem [shape: bf16[2,4,8,384], index: 6, kind: output, shape index: {0}]   ;;  %s2489_s7 = inlined_call_operand.vmem [shape: bf16[2,4,8,384], index: 7, kind: output, shape index: {1}]   ;;  %s2490_s8 = inlined_call_operand.vmem [shape: f32[2,1,8,2], index: 8, kind: output, shape index: {2}]  }
   0x1   :  { %s2116_s29 = smov 0  }
   0x2 LB: > { %s31_s30 = sadd.s32 1, %s2052_s28  ;;  %p1831_p0 = scmp.ge.s32.totalorder %s2056_s29, 1  ;;  %s2056_s29 = sphi %s2116_s29, %s19_s29   ;;  %s2052_s28 = sphi %s2114_s28, %s2492_s28   ;;  %s2048_s27 = sphi %s2112_s27, %s2491_s27  }
   0x3   : > { %p33_p1 = scmp.ge.s32.totalorder %s31_s30, 2  ;;  %p305_p2 = scmp.lt.s32.totalorder %s2056_s29, 3 }
   0x5   : > { %s2494_s30 = smov (%p33_p1, %s31_s30), 0  ;;  %p306_p3 = pnand %p1831_p0, %p305_p2 }
   0x6   : > { %p373_p4 = scmp.lt.s32.totalorder (!%p306_p3), %s2048_s27, 1  ;;  %s2058_s16 = smov (!%p306_p3), 127  }
   0x7   : > { %309 = sbr.rel (%p306_p3) target bundleno = 656 (0x290), region = 44  ;;  %s2059_s17 = smov (!%p306_p3), 110  }
   0x8   : > { %s2060_s18 = smov (!%p306_p3), 109   ;;  %s2061_s19 = smov (!%p306_p3), 126  }
   0x9   : > { %s2062_s20 = smov (!%p306_p3), 108   ;;  %s2063_s21 = smov (!%p306_p3), 92  }
   0xa   : > { %s2064_s22 = smov (!%p306_p3), 91   ;;  %s2065_s10 = smov (!%p306_p3), 90  }
   0xc   : > { %s2496_s27 = smov (!%p373_p4, %s2048_s27), 1  ;;  %vm460_vm0 = vcmask 1039360   ;;  %vm458_vm1 = vcmask 1043456   ;;  %vm498_vm2 = vcmask 900096   ;;  %vm536_vm3 = vcmask 891904  }
   0xd   : > { %s2133_s9 = sshll.u32 %s2496_s27, 3  ;;  %vm772_vm4 = vcmask 1031168   ;;  %vm582_vm5 = vcmask 130048   ;;  %vm847_vm6 = vcmask 883712   ;;  %vm1109_vm7 = vcmask 752640  }
   0xe   : > { %s377_s12 = scalar_lea.vmem %s2486_s4, %s2133_s9  ;;  %s382_s15 = scalar_lea.vmem %s2487_s5, %s2133_s9  ;;  %vm1147_vm8 = vcmask 744448   ;;  %vm1446_vm9 = vcmask 736256   ;;  %vm1622_vm10 = vcmask 7168   ;;  %vm1624_vm11 = vcmask 15360  }
   0xf   : > { %v2139_v0 = vld [vmem:[%s377_s12] sm:$0xff] }
  0x10   : > { %431 = vst [vmem:[#allocation1] ss:$2 sm:$0xff] %v2139_v0  ;;  %v2146_v1 = vld [vmem:[%s382_s15] sm:$0xff] }
  0x17   : > { %v432_v2 = vld.sshfl [vmem:[#allocation1] sm:$0xff pattern:$0x75643120]  ;;  %v433_v3 = vld.sshfl [vmem:[#allocation1 + $0x8] sm:$0xff pattern:$0x75643120] }
  0x18   : > { %439 = vst [vmem:[#allocation1] ss:$2 sm:$0xff] %v2146_v1 }
  0x19   : > { %436 = vst [vmem:[#allocation2] sm:$0x33] %v432_v2 }
  0x1a   : > { %437 = vst [vmem:[#allocation2 + $0x8] sm:$0x3] %v433_v3 }
  0x1f   : > { %v440_v4 = vld.sshfl [vmem:[#allocation1] sm:$0xff pattern:$0x75643120]  ;;  %v441_v5 = vld.sshfl [vmem:[#allocation1 + $0x8] sm:$0xff pattern:$0x75643120] }
  0x20   : > { %447 = vst [vmem:[#allocation1 + $0x1] ss:$2 sm:$0xff] %v2139_v0 }
  0x21   : > { %444 = vst [vmem:[#allocation3] sm:$0x33] %v440_v4 }
  0x22   : > { %445 = vst [vmem:[#allocation3 + $0x8] sm:$0x3] %v441_v5 }
  0x27   : > { %v448_v6 = vld.sshfl [vmem:[#allocation1] sm:$0xff pattern:$0x75643120]  ;;  %v450_v7 = vld.sshfl [vmem:[#allocation1 + $0x8] sm:$0xff pattern:$0x75643120] }
  0x28   : > { %452 = vrot.lane.b32.xlu0 %v448_v6, %s2058_s16  ;;  %468 = vst [vmem:[#allocation1 + $0x1] ss:$2 sm:$0xff] %v2146_v1 }
  0x2f   : > { %v471_v8 = vld.sshfl [vmem:[#allocation1 + $0x8] sm:$0xff pattern:$0x75643120]  ;;  %v469_v9 = vld.sshfl [vmem:[#allocation1] sm:$0xff pattern:$0x75643120] }
  0x30   : > { %475 = vrot.lane.b32.xlu1 %v471_v8, %s2058_s16  ;;  %486 = vst [vmem:[#allocation1] ss:$2 sm:$0xff] %v2139_v0  ;;  %454 = vrot.lane.b32.xlu0 %v450_v7, %s2058_s16 }
  0x37   : > { %v487_v10 = vld.sshfl [vmem:[#allocation1] sm:$0xff pattern:$0x75643120]  ;;  %v489_v11 = vld.sshfl [vmem:[#allocation1 + $0x8] sm:$0xff pattern:$0x75643120] }
  0x38   : > { %491 = vrot.lane.b32.xlu1 %v487_v10, %s2059_s17  ;;  %473 = vrot.lane.b32.xlu0 %v469_v9, %s2058_s16  ;;  %505 = vst [vmem:[#allocation1] ss:$2 sm:$0xff] %v2146_v1 }
  0x3f   : > { %v508_v12 = vld.sshfl [vmem:[#allocation1 + $0x8] sm:$0xff pattern:$0x75643120]  ;;  %v506_v13 = vld.sshfl [vmem:[#allocation1] sm:$0xff pattern:$0x75643120] }
  0x40   : > { %493 = vrot.lane.b32.xlu1 %v489_v11, %s2059_s17  ;;  %512 = vrot.lane.b32.xlu0 %v508_v12, %s2059_s17  ;;  %524 = vst [vmem:[#allocation1 + $0x1] ss:$2 sm:$0xff] %v2139_v0 }
  0x41   : > { %510 = vrot.lane.b32.xlu2 %v506_v13, %s2059_s17 }
  0x47   : > { %v525_v14 = vld.sshfl [vmem:[#allocation1] sm:$0xff pattern:$0x75643120]  ;;  %v527_v15 = vld.sshfl [vmem:[#allocation1 + $0x8] sm:$0xff pattern:$0x75643120] }
  0x48   : > { %544 = vst [vmem:[#allocation1 + $0x1] ss:$2 sm:$0xff] %v2146_v1 }
  0x49   : > { %529 = vrot.lane.b32.xlu2 %v525_v14, %s2060_s18 }
  0x4f   : > { %v545_v16 = vld.sshfl [vmem:[#allocation1] sm:$0xff pattern:$0x75643120]  ;;  %v547_v17 = vld.sshfl [vmem:[#allocation1 + $0x8] sm:$0xff pattern:$0x75643120] }
  0x50   : > { %549 = vrot.lane.b32.xlu1 %v545_v16, %s2060_s18  ;;  %723 = vst [vmem:[#allocation1] ss:$2 sm:$0xff] %v2139_v0 }
  0x51   : > { %531 = vrot.lane.b32.xlu2 %v527_v15, %s2060_s18 }
  0x57   : > { %v726_v18 = vld.sshfl [vmem:[#allocation1 + $0x8] sm:$0xff pattern:$0x75643120]  ;;  %v724_v19 = vld.sshfl [vmem:[#allocation1] sm:$0xff pattern:$0x75643120] }
  0x58   : > { %730 = vrot.lane.b32.xlu1 %v726_v18, %s2058_s16  ;;  %728 = vrot.lane.b32.xlu0 %v724_v19, %s2058_s16  ;;  %741 = vst [vmem:[#allocation1] ss:$2 sm:$0xff] %v2146_v1 }
  0x59   : > { %551 = vrot.lane.b32.xlu2 %v547_v17, %s2060_s18 }
  0x5f   : > { %v744_v20 = vld.sshfl [vmem:[#allocation1 + $0x8] sm:$0xff pattern:$0x75643120]  ;;  %v742_v21 = vld.sshfl [vmem:[#allocation1] sm:$0xff pattern:$0x75643120] }
  0x60   : > { %748 = vrot.lane.b32.xlu0 %v744_v20, %s2058_s16  ;;  %760 = vst [vmem:[#allocation1 + $0x1] ss:$2 sm:$0xff] %v2139_v0 }
  0x61   : > { %746 = vrot.lane.b32.xlu2 %v742_v21, %s2058_s16 }
  0x67   : > { %v761_v22 = vld.sshfl [vmem:[#allocation1] sm:$0xff pattern:$0x75643120]  ;;  %v763_v23 = vld.sshfl [vmem:[#allocation1 + $0x8] sm:$0xff pattern:$0x75643120] }
  0x68   : > { %780 = vst [vmem:[#allocation1 + $0x1] ss:$2 sm:$0xff] %v2146_v1  ;;  %767 = vrot.lane.b32.xlu0 %v763_v23, %s2061_s19 }
  0x69   : > { %765 = vrot.lane.b32.xlu2 %v761_v22, %s2061_s19 }
  0x6f   : > { %v781_v24 = vld.sshfl [vmem:[#allocation1] sm:$0xff pattern:$0x75643120]  ;;  %v783_v25 = vld.sshfl [vmem:[#allocation1 + $0x8] sm:$0xff pattern:$0x75643120] }
  0x70   : > { %785 = vrot.lane.b32.xlu1 %v781_v24, %s2061_s19  ;;  %798 = vst [vmem:[#allocation1] ss:$2 sm:$0xff] %v2139_v0 }
  0x71   : > { %787 = vrot.lane.b32.xlu2 %v783_v25, %s2061_s19 }
  0x77   : > { %v799_v26 = vld.sshfl [vmem:[#allocation1] sm:$0xff pattern:$0x75643120]  ;;  %v801_v27 = vld.sshfl [vmem:[#allocation1 + $0x8] sm:$0xff pattern:$0x75643120] }
  0x78   : > { %803 = vrot.lane.b32.xlu1 %v799_v26, %s2060_s18  ;;  %816 = vst [vmem:[#allocation1] ss:$2 sm:$0xff] %v2146_v1 }
  0x79   : > { %805 = vrot.lane.b32.xlu2 %v801_v27, %s2060_s18 }
  0x7f   : > { %v819_v28 = vld.sshfl [vmem:[#allocation1 + $0x8] sm:$0xff pattern:$0x75643120]  ;;  %v817_v29 = vld.sshfl [vmem:[#allocation1] sm:$0xff pattern:$0x75643120] }
  0x80   : > { %823 = vrot.lane.b32.xlu1 %v819_v28, %s2060_s18  ;;  %821 = vrot.lane.b32.xlu0 %v817_v29, %s2060_s18  ;;  %835 = vst [vmem:[#allocation1 + $0x1] ss:$2 sm:$0xff] %v2139_v0 }
  0x87   : > { %v838_v30 = vld.sshfl [vmem:[#allocation1 + $0x8] sm:$0xff pattern:$0x75643120]  ;;  %v836_v31 = vld.sshfl [vmem:[#allocation1] sm:$0xff pattern:$0x75643120] }
  0x88   : > { %842 = vrot.lane.b32.xlu1 %v838_v30, %s2062_s20  ;;  %840 = vrot.lane.b32.xlu0 %v836_v31, %s2062_s20  ;;  %855 = vst [vmem:[#allocation1 + $0x1] ss:$2 sm:$0xff] %v2146_v1 }
  0x8f   : > { %v858_v32 = vld.sshfl [vmem:[#allocation1 + $0x8] sm:$0xff pattern:$0x75643120]  ;;  %v856_v33 = vld.sshfl [vmem:[#allocation1] sm:$0xff pattern:$0x75643120] }
  0x90   : > { %862 = vrot.lane.b32.xlu0 %v858_v32, %s2062_s20  ;;  %1023 = vst [vmem:[#allocation1] ss:$2 sm:$0xff] %v2139_v0  ;;  %860 = vrot.lane.b32.xlu2 %v856_v33, %s2062_s20 }
  0x97   : > { %v1024_v34 = vld.sshfl [vmem:[#allocation1] sm:$0xff pattern:$0x75643120]  ;;  %v1026_v35 = vld.sshfl [vmem:[#allocation1 + $0x8] sm:$0xff pattern:$0x75643120] }
  0x98   : > { %1028 = vrot.lane.b32.xlu1 %v1024_v34, %s2059_s17  ;;  %1041 = vst [vmem:[#allocation1] ss:$2 sm:$0xff] %v2146_v1  ;;  %1030 = vrot.lane.b32.xlu2 %v1026_v35, %s2059_s17 }
  0x9a   : > { %v453_v40 = vpop.permute.xlu0 %452 }
  0x9b   : > { %v456_v44 = vrot.slane %v453_v40, 4  ;;  %v511_v47 = vpop.permute.xlu2 %510 }
  0x9c   : > { %v514_v5 = vrot.slane %v511_v47, 4 }
  0x9f   : > { %v1044_v36 = vld.sshfl [vmem:[#allocation1 + $0x8] sm:$0xff pattern:$0x75643120]  ;;  %v1042_v37 = vld.sshfl [vmem:[#allocation1] sm:$0xff pattern:$0x75643120] }
  0xa0   : > { %1048 = vrot.lane.b32.xlu1 %v1044_v36, %s2059_s17  ;;  %1046 = vrot.lane.b32.xlu0 %v1042_v37, %s2059_s17  ;;  %1060 = vst [vmem:[#allocation1 + $0x1] ss:$2 sm:$0xff] %v2139_v0 }
  0xa2   : > { %v476_v41 = vpop.permute.xlu1 %475  ;;  %v455_v48 = vpop.permute.xlu0 %454 }
  0xa3   : > { %v478_v42 = vrot.slane %v476_v41, 4  ;;  %v457_v50 = vrot.slane %v455_v48, 4  ;;  %v530_v57 = vpop.permute.xlu2 %529 }
  0xa4   : > { %v533_v6 = vrot.slane %v530_v57, 4 }
  0xa5   : > { %v481_v43 = vsel %vm460_vm0, %v476_v41, %v478_v42  ;;  %v459_v51 = vsel %vm458_vm1, %v456_v44, %v457_v50  ;;  %v462_v52 = vsel %vm460_vm0, %v455_v48, %v457_v50 }
  0xa6   : > { %485 = vst [vmem:[#allocation3 + $0x8] sm:$0xc] %v481_v43  ;;  %v461_v53 = vsel %vm460_vm0, %v453_v40, %v459_v51 }
  0xa7   : > { %v1063_v38 = vld.sshfl [vmem:[#allocation1 + $0x8] sm:$0xff pattern:$0x75643120]  ;;  %v1061_v39 = vld.sshfl [vmem:[#allocation1] sm:$0xff pattern:$0x75643120] }
  0xa8   : > { %1067 = vrot.lane.b32.xlu1 %v1063_v38, %s2060_s18  ;;  %1065 = vrot.lane.b32.xlu0 %v1061_v39, %s2060_s18  ;;  %1079 = vst [vmem:[#allocation1 + $0x1] ss:$2 sm:$0xff] %v2146_v1 }
  0xa9   : > { %466 = vst [vmem:[#allocation2 + $0x8] sm:$0xc] %v462_v52 }
  0xaa   : > { %v492_v49 = vpop.permute.xlu1 %491  ;;  %465 = vst [vmem:[#allocation2] sm:$0xcc] %v461_v53  ;;  %v474_v58 = vpop.permute.xlu0 %473 }
  0xab   : > { %v495_v54 = vrot.slane %v492_v49, 4  ;;  %v477_v60 = vrot.slane %v474_v58, 4  ;;  %v532_v9 = vpop.permute.xlu2 %531 }
  0xac   : > { %v534_v10 = vrot.slane %v532_v9, 4 }
  0xad   : > { %v479_v62 = vsel %vm458_vm1, %v477_v60, %v478_v42  ;;  %v1864_v44 = vld [vmem:[#allocation3 + $0x8] sm:$0xf] }
  0xae   : > { %v480_v3 = vsel %vm460_vm0, %v474_v58, %v479_v62  ;;  %v535_v13 = vsel %vm458_vm1, %v533_v6, %v534_v10  ;;  %v538_v14 = vsel %vm536_vm3, %v532_v9, %v534_v10 }
  0xaf   : > { %v1082_v45 = vld.sshfl [vmem:[#allocation1 + $0x8] sm:$0xff pattern:$0x75643120]  ;;  %v1080_v46 = vld.sshfl [vmem:[#allocation1] sm:$0xff pattern:$0x75643120]  ;;  %v537_v16 = vsel %vm536_vm3, %v530_v57, %v535_v13 }
  0xb0   : > { %1086 = vrot.lane.b32.xlu0 %v1082_v45, %s2060_s18  ;;  %1097 = vst [vmem:[#allocation1] ss:$2 sm:$0xff] %v2139_v0  ;;  %1084 = vrot.lane.b32.xlu2 %v1080_v46, %s2060_s18  ;;  %v1849_v32 = vld [vmem:[#allocation2 + $0x8] sm:$0xf] }
  0xb1   : > { %484 = vst [vmem:[#allocation3] sm:$0xcc] %v480_v3  ;;  %v1975_v39 = vld [vmem:[#allocation2 + $0x4] sm:$0xf]  ;;  %v1841_v40 = vld [vmem:[#allocation2] sm:$0xf] }
  0xb2   : > { %v494_v59 = vpop.permute.xlu1 %493  ;;  %v513_v11 = vpop.permute.xlu0 %512  ;;  %542 = vst [vmem:[#allocation2 + $0x14] sm:$0xc] %v538_v14 }
  0xb3   : > { %v496_v61 = vrot.slane %v494_v59, 4  ;;  %v515_v12 = vrot.slane %v513_v11, 4  ;;  %541 = vst [vmem:[#allocation2 + $0xc] sm:$0xcc] %v537_v16  ;;  %v552_v23 = vpop.permute.xlu2 %551 }
  0xb4   : > { %v554_v24 = vrot.slane %v552_v23, 4 }
  0xb5   : > { %v497_v63 = vsel %vm458_vm1, %v495_v54, %v496_v61  ;;  %v500_v2 = vsel %vm498_vm2, %v494_v59, %v496_v61  ;;  %v516_v17 = vsel %vm458_vm1, %v514_v5, %v515_v12  ;;  %v518_v18 = vsel %vm498_vm2, %v513_v11, %v515_v12 }
  0xb6   : > { %v499_v4 = vsel %vm498_vm2, %v492_v49, %v497_v63  ;;  %504 = vst [vmem:[#allocation2 + $0x14] sm:$0x3] %v500_v2  ;;  %v517_v19 = vsel %vm498_vm2, %v511_v47, %v516_v17  ;;  %v557_v26 = vsel %vm536_vm3, %v552_v23, %v554_v24 }
  0xb7   : > { %v1098_v55 = vld.sshfl [vmem:[#allocation1] sm:$0xff pattern:$0x75643120]  ;;  %v1100_v56 = vld.sshfl [vmem:[#allocation1 + $0x8] sm:$0xff pattern:$0x75643120] }
  0xb8   : > { %1116 = vst [vmem:[#allocation1] ss:$2 sm:$0xff] %v2146_v1  ;;  %1104 = vrot.lane.b32.xlu0 %v1100_v56, %s2063_s21  ;;  %1102 = vrot.lane.b32.xlu2 %v1098_v55, %s2063_s21  ;;  %v1978_v47 = vld [vmem:[#allocation3 + $0x4] sm:$0xf]  ;;  %v1856_v57 = vld [vmem:[#allocation3] sm:$0xf] }
  0xb9   : > { %503 = vst [vmem:[#allocation2 + $0xc] sm:$0x33] %v499_v4 }
  0xba   : > { %521 = vst [vmem:[#allocation3 + $0xc] sm:$0x33] %v517_v19 }
  0xbb   : > { %522 = vst [vmem:[#allocation3 + $0x14] sm:$0x3] %v518_v18  ;;  %v747_v38 = vpop.permute.xlu2 %746 }
  0xbc   : > { %561 = vst [vmem:[#allocation3 + $0x14] sm:$0xc] %v557_v26  ;;  %v750_v41 = vrot.slane %v747_v38, 4 }
  0xbd   : > { %v1977_v56 = vld [vmem:[#allocation2 + $0x10] sm:$0xf0] }
  0xbe   : > { %v1850_v60 = vor.u32 %v1977_v56, %v1849_v32 }
  0xbf   : > { %v1117_v7 = vld.sshfl [vmem:[#allocation1] sm:$0xff pattern:$0x75643120]  ;;  %v1119_v8 = vld.sshfl [vmem:[#allocation1 + $0x8] sm:$0xff pattern:$0x75643120] }
  0xc0   : > { %1121 = vrot.lane.b32.xlu1 %v1117_v7, %s2063_s21  ;;  %1135 = vst [vmem:[#allocation1 + $0x1] ss:$2 sm:$0xff] %v2139_v0  ;;  %1123 = vrot.lane.b32.xlu2 %v1119_v8, %s2063_s21  ;;  %v1976_v53 = vld [vmem:[#allocation2 + $0x8] sm:$0xf0]  ;;  %v1843_v55 = vld [vmem:[#allocation2 + $0xc] sm:$0xf0] }
  0xc1   : > { %v1842_v54 = vor.u32 %v1976_v53, %v1841_v40  ;;  %v1846_v58 = vor.u32 %v1975_v39, %v1843_v55  ;;  %619 = vmatpush.bf16.msra.mxu2 %v1850_v60  ;;  %s1999_s21 = smul.u32 48, %s2496_s27 }
  0xc2   : > { %v550_v15 = vpop.permute.xlu1 %549 }
  0xc3   : > { %v553_v20 = vrot.slane %v550_v15, 4  ;;  %v766_v51 = vpop.permute.xlu2 %765  ;;  %593 = vmatpush.bf16.msra.mxu0 %v1842_v54  ;;  %v1980_v4 = vld [vmem:[#allocation3 + $0x10] sm:$0xf0]  ;;  %606 = vmatpush.bf16.msra.mxu1 %v1846_v58  ;;  %s2373_s24 = scalar_lea.vmem %s2488_s6, %s1999_s21  ;;  %s2432_s14 = scalar_lea.vmem %s2489_s7, %s1999_s21 }
  0xc4   : > { %v769_v52 = vrot.slane %v766_v51, 4  ;;  %v1865_v5 = vor.u32 %v1980_v4, %v1864_v44 }
  0xc5   : > { %v555_v25 = vsel %vm458_vm1, %v553_v20, %v554_v24 }
  0xc6   : > { %v556_v29 = vsel %vm536_vm3, %v550_v15, %v555_v25 }
  0xc7   : > { %v1136_v21 = vld.sshfl [vmem:[#allocation1] sm:$0xff pattern:$0x75643120]  ;;  %v1138_v22 = vld.sshfl [vmem:[#allocation1 + $0x8] sm:$0xff pattern:$0x75643120]  ;;  %686 = vmatpush.bf16.msrb.mxu1 %v1865_v5 }
  0xc8   : > { %1140 = vrot.lane.b32.xlu1 %v1136_v21, %s2064_s22  ;;  %1155 = vst [vmem:[#allocation1 + $0x1] ss:$2 sm:$0xff] %v2146_v1  ;;  %1142 = vrot.lane.b32.xlu2 %v1138_v22, %s2064_s22 }
  0xc9   : > { %560 = vst [vmem:[#allocation3 + $0xc] sm:$0xcc] %v556_v29 }
  0xca   : > { %v731_v27 = vpop.permute.xlu1 %730  ;;  %v729_v28 = vpop.permute.xlu0 %728 }
  0xcb   : > { %v733_v30 = vrot.slane %v731_v27, 4  ;;  %v732_v31 = vrot.slane %v729_v28, 4  ;;  %v788_v11 = vpop.permute.xlu2 %787 }
  0xcc   : > { %v790_v12 = vrot.slane %v788_v11, 4 }
  0xcd   : > { %v736_v33 = vsel %vm460_vm0, %v731_v27, %v733_v30  ;;  %v734_v34 = vsel %vm458_vm1, %v732_v31, %v733_v30  ;;  %v420_v30 = vld [vmem:[%s2482_s0] sm:$0xf] }
  0xce   : > { %740 = vst [vmem:[#allocation2 + $0x8] sm:$0x3] %v736_v33  ;;  %v735_v35 = vsel %vm460_vm0, %v729_v28, %v734_v34  ;;  %v793_v14 = vsel %vm772_vm4, %v788_v11, %v790_v12  ;;  %1853 = vmatmul.msk.bf16.vlgmr.msra.gmra.mxu2 %vm582_vm5, %v420_v30  ;;  %1851 = vmatmul.msk.bf16.vlgmr.msra.gmra.mxu0 %vm582_vm5, %v420_v30 }
  0xcf   : > { %v1158_v36 = vld.sshfl [vmem:[#allocation1 + $0x8] sm:$0xff pattern:$0x75643120]  ;;  %v1156_v37 = vld.sshfl [vmem:[#allocation1] sm:$0xff pattern:$0x75643120]  ;;  %1852 = vmatmul.msk.bf16.vlgmr.msra.gmra.mxu1 %vm582_vm5, %v420_v30 }
  0xd0   : > { %1162 = vrot.lane.b32.xlu1 %v1158_v36, %s2064_s22  ;;  %1160 = vrot.lane.b32.xlu0 %v1156_v37, %s2064_s22  ;;  %1323 = vst [vmem:[#allocation1] ss:$2 sm:$0xff] %v2139_v0  ;;  %v1979_v61 = vld [vmem:[#allocation3 + $0x8] sm:$0xf0]  ;;  %v1858_v62 = vld [vmem:[#allocation3 + $0xc] sm:$0xf0] }
  0xd1   : > { %739 = vst [vmem:[#allocation2] sm:$0x33] %v735_v35  ;;  %v1857_v2 = vor.u32 %v1979_v61, %v1856_v57  ;;  %v1861_v3 = vor.u32 %v1978_v47, %v1858_v62 }
  0xd2   : > { %v749_v42 = vpop.permute.xlu0 %748  ;;  %797 = vst [vmem:[#allocation3 + $0x8] sm:$0xc] %v793_v14 }
  0xd3   : > { %v751_v43 = vrot.slane %v749_v42, 4  ;;  %660 = vmatpush.bf16.msra.mxu3 %v1857_v2  ;;  %673 = vmatpush.bf16.msrb.mxu0 %v1861_v3  ;;  %v806_v20 = vpop.permute.xlu2 %805 }
  0xd4   : > { %v808_v21 = vrot.slane %v806_v20, 4 }
  0xd5   : > { %v752_v45 = vsel %vm458_vm1, %v750_v41, %v751_v43  ;;  %v754_v46 = vsel %vm460_vm0, %v749_v42, %v751_v43  ;;  %v424_v42 = vld [vmem:[%s2483_s1] sm:$0xf] }
  0xd6   : > { %758 = vst [vmem:[#allocation3 + $0x8] sm:$0x3] %v754_v46  ;;  %v753_v50 = vsel %vm460_vm0, %v747_v38, %v752_v45  ;;  %v811_v23 = vsel %vm536_vm3, %v806_v20, %v808_v21  ;;  %1866 = vmatmul.msk.bf16.vlgmr.msra.gmra.mxu3 %vm582_vm5, %v424_v42 }
  0xd7   : > { %v1326_v48 = vld.sshfl [vmem:[#allocation1 + $0x8] sm:$0xff pattern:$0x75643120]  ;;  %v1324_v49 = vld.sshfl [vmem:[#allocation1] sm:$0xff pattern:$0x75643120] }
  0xd8   : > { %1330 = vrot.lane.b32.xlu0 %v1326_v48, %s2060_s18  ;;  %1341 = vst [vmem:[#allocation1] ss:$2 sm:$0xff] %v2146_v1  ;;  %1328 = vrot.lane.b32.xlu2 %v1324_v49, %s2060_s18 }
  0xd9   : > { %757 = vst [vmem:[#allocation3] sm:$0x33] %v753_v50 }
  0xda   : > { %v768_v59 = vpop.permute.xlu0 %767  ;;  %815 = vst [vmem:[#allocation2 + $0x14] sm:$0x3] %v811_v23 }
  0xdb   : > { %v770_v63 = vrot.slane %v768_v59, 4 }
  0xdd   : > { %v771_v6 = vsel %vm458_vm1, %v769_v52, %v770_v63  ;;  %v774_v7 = vsel %vm772_vm4, %v768_v59, %v770_v63  ;;  %v1894_v11 = vld [vmem:[#allocation3 + $0x8] sm:$0xf] }
  0xde   : > { %v773_v8 = vsel %vm772_vm4, %v766_v51, %v771_v6  ;;  %778 = vst [vmem:[#allocation2 + $0x8] sm:$0xc] %v774_v7  ;;  %1867 = vmatmul.msk.bf16.vlgmr.msrb.gmra.mxu0 %vm582_vm5, %v424_v42 }
  0xdf   : > { %v2238_v9 = vld.sshfl [vmem:[#allocation1] sm:$0xff pattern:$0x75643120]  ;;  %v2240_v10 = vld.sshfl [vmem:[#allocation1 + $0x8] sm:$0xff pattern:$0x75643120]  ;;  %1868 = vmatmul.msk.bf16.vlgmr.msrb.gmra.mxu1 %vm582_vm5, %v424_v42 }
  0xe0   : > { %1360 = vst [vmem:[#allocation1 + $0x1] ss:$2 sm:$0xff] %v2139_v0 }
  0xe1   : > { %777 = vst [vmem:[#allocation2] sm:$0xcc] %v773_v8 }
  0xe2   : > { %v786_v13 = vpop.permute.xlu1 %785 }
  0xe3   : > { %v789_v15 = vrot.slane %v786_v13, 4 }
  0xe5   : > { %v791_v16 = vsel %vm458_vm1, %v789_v15, %v790_v12  ;;  %v1879_v45 = vld [vmem:[#allocation2 + $0x8] sm:$0xf]  ;;  %v421_v12 = vld [vmem:[%s2482_s0 + $0x4] sm:$0xf] }
  0xe6   : > { %v792_v17 = vsel %vm772_vm4, %v786_v13, %v791_v16 }
  0xe7   : > { %v1361_v18 = vld.sshfl [vmem:[#allocation1] sm:$0xff pattern:$0x75643120]  ;;  %v1363_v19 = vld.sshfl [vmem:[#allocation1 + $0x8] sm:$0xff pattern:$0x75643120] }
  0xe8   : > { %1365 = vrot.lane.b32.xlu1 %v1361_v18, %s2062_s20  ;;  %1379 = vst [vmem:[#allocation1 + $0x1] ss:$2 sm:$0xff] %v2146_v1  ;;  %1367 = vrot.lane.b32.xlu2 %v1363_v19, %s2062_s20  ;;  %v1981_v61 = vld [vmem:[#allocation2 + $0x4] sm:$0xf] }
  0xe9   : > { %796 = vst [vmem:[#allocation3] sm:$0xcc] %v792_v17 }
  0xea   : > { %v804_v22 = vpop.permute.xlu1 %803  ;;  %v861_v29 = vpop.permute.xlu2 %860 }
  0xeb   : > { %v807_v24 = vrot.slane %v804_v22, 4  ;;  %v864_v54 = vrot.slane %v861_v29, 4 }
  0xed   : > { %v809_v25 = vsel %vm458_vm1, %v807_v24, %v808_v21 }
  0xee   : > { %v810_v26 = vsel %vm536_vm3, %v804_v22, %v809_v25 }
  0xef   : > { %v2252_v27 = vld.sshfl [vmem:[#allocation1] sm:$0xff pattern:$0x75643120]  ;;  %v2254_v28 = vld.sshfl [vmem:[#allocation1 + $0x8] sm:$0xff pattern:$0x75643120] }
  0xf0   : > { %1397 = vst [vmem:[#allocation1] ss:$2 sm:$0xff] %v2139_v0  ;;  %v1984_v13 = vld [vmem:[#allocation3 + $0x4] sm:$0xf]  ;;  %v1886_v14 = vld [vmem:[#allocation3] sm:$0xf] }
  0xf1   : > { %814 = vst [vmem:[#allocation2 + $0xc] sm:$0x33] %v810_v26 }
  0xf2   : > { %v824_v31 = vpop.permute.xlu1 %823  ;;  %v822_v32 = vpop.permute.xlu0 %821 }
  0xf3   : > { %v826_v33 = vrot.slane %v824_v31, 4  ;;  %v825_v34 = vrot.slane %v822_v32, 4  ;;  %v1031_v40 = vpop.permute.xlu2 %1030 }
  0xf4   : > { %v1033_v41 = vrot.slane %v1031_v40, 4 }
  0xf5   : > { %v829_v35 = vsel %vm536_vm3, %v824_v31, %v826_v33  ;;  %v827_v36 = vsel %vm458_vm1, %v825_v34, %v826_v33 }
  0xf6   : > { %833 = vst [vmem:[#allocation3 + $0x14] sm:$0x3] %v829_v35  ;;  %v828_v37 = vsel %vm536_vm3, %v822_v32, %v827_v36  ;;  %v1036_v46 = vsel %vm498_vm2, %v1031_v40, %v1033_v41 }
  0xf7   : > { %v1400_v38 = vld.sshfl [vmem:[#allocation1 + $0x8] sm:$0xff pattern:$0x75643120]  ;;  %v1398_v39 = vld.sshfl [vmem:[#allocation1] sm:$0xff pattern:$0x75643120] }
  0xf8   : > { %1404 = vrot.lane.b32.xlu1 %v1400_v38, %s2064_s22  ;;  %1402 = vrot.lane.b32.xlu0 %v1398_v39, %s2064_s22  ;;  %1415 = vst [vmem:[#allocation1] ss:$2 sm:$0xff] %v2146_v1 }
  0xf9   : > { %832 = vst [vmem:[#allocation3 + $0xc] sm:$0x33] %v828_v37 }
  0xfa   : > { %v843_v43 = vpop.permute.xlu1 %842  ;;  %v841_v44 = vpop.permute.xlu0 %840  ;;  %1040 = vst [vmem:[#allocation2 + $0x8] sm:$0x3] %v1036_v46 }
  0xfb   : > { %v845_v47 = vrot.slane %v843_v43, 4  ;;  %v844_v48 = vrot.slane %v841_v44, 4 }
  0xfd   : > { %v849_v49 = vsel %vm847_vm6, %v843_v43, %v845_v47  ;;  %v846_v50 = vsel %vm458_vm1, %v844_v48, %v845_v47 }
  0xfe   : > { %853 = vst [vmem:[#allocation2 + $0x14] sm:$0xc] %v849_v49  ;;  %v848_v51 = vsel %vm847_vm6, %v841_v44, %v846_v50 }
  0xff   : > { %v2277_v52 = vld.sshfl [vmem:[#allocation1] sm:$0xff pattern:$0x75643120]  ;;  %v2279_v53 = vld.sshfl [vmem:[#allocation1 + $0x8] sm:$0xff pattern:$0x75643120] }
 0x100   : > { %1434 = vst [vmem:[#allocation1 + $0x1] ss:$2 sm:$0xff] %v2139_v0  ;;  %1346 = vrot.lane.b32.xlu1 %v2238_v9, %s2060_s18  ;;  %v1871_v0 = vld [vmem:[#allocation2] sm:$0xf] }
 0x101   : > { %852 = vst [vmem:[#allocation2 + $0xc] sm:$0xcc] %v848_v51 }
 0x102   : > { %v863_v55 = vpop.permute.xlu0 %862 }
 0x103   : > { %v865_v56 = vrot.slane %v863_v55, 4 }
 0x105   : > { %v866_v57 = vsel %vm458_vm1, %v864_v54, %v865_v56  ;;  %v868_v58 = vsel %vm847_vm6, %v863_v55, %v865_v56  ;;  %v1983_v59 = vld [vmem:[#allocation2 + $0x10] sm:$0xf0] }
 0x106   : > { %v867_v60 = vsel %vm847_vm6, %v861_v29, %v866_v57  ;;  %872 = vst [vmem:[#allocation3 + $0x14] sm:$0xc] %v868_v58  ;;  %v1880_v62 = vor.u32 %v1983_v59, %v1879_v45 }
 0x107   : > { %v1437_v63 = vld.sshfl [vmem:[#allocation1 + $0x8] sm:$0xff pattern:$0x75643120]  ;;  %871 = vst [vmem:[#allocation3 + $0xc] sm:$0xcc] %v867_v60 }
 0x108   : > { %1441 = vrot.lane.b32.xlu0 %v1437_v63, %s2065_s10  ;;  %v1982_v2 = vld [vmem:[#allocation2 + $0x8] sm:$0xf0]  ;;  %v1873_v3 = vld [vmem:[#allocation2 + $0xc] sm:$0xf0]  ;;  %929 = vmatpush.bf16.msra.mxu0 %v1880_v62  ;;  %v422_v62 = vld [vmem:[%s2482_s0 + $0x8] sm:$0xf] }
 0x109   : > { %v1872_v4 = vor.u32 %v1982_v2, %v1871_v0  ;;  %v1876_v5 = vor.u32 %v1981_v61, %v1873_v3  ;;  %v1435_v6 = vld.sshfl [vmem:[#allocation1] sm:$0xff pattern:$0x75643120]  ;;  %1386 = vrot.lane.b32.xlu1 %v2254_v28, %s2062_s20 }
 0x10a   : > { %v1029_v7 = vpop.permute.xlu1 %1028  ;;  %1439 = vrot.lane.b32.xlu2 %v1435_v6, %s2065_s10  ;;  %1454 = vst [vmem:[#allocation1 + $0x1] ss:$2 sm:$0xff] %v2146_v1  ;;  %v2294_v8 = vpop.permute.xlu2 %1084 }
 0x10b   : > { %v1032_v9 = vrot.slane %v1029_v7, 4  ;;  %903 = vmatpush.bf16.msrb.mxu2 %v1872_v4  ;;  %916 = vmatpush.bf16.msrb.mxu3 %v1876_v5  ;;  %v1088_v40 = vrot.slane %v2294_v8, 4  ;;  %v2066_v4 = vmov 0   ;;  %v428_v5 = vld [vmem:[%s2484_s2] sm:$0xff] }
 0x10c   : > { %1883 = vmatmul.msk.bf16.vlgmr.msra.gmra.mxu0 %vm582_vm5, %v421_v12  ;;  %2033 = vset.pattern.permute.xlu0 %v2066_v4 }
 0x10d   : > { %v1034_v15 = vsel %vm458_vm1, %v1032_v9, %v1033_v41  ;;  %v1986_v16 = vld [vmem:[#allocation3 + $0x10] sm:$0xf0] }
 0x10e   : > { %v1035_v17 = vsel %vm498_vm2, %v1029_v7, %v1034_v15  ;;  %v1985_v18 = vld [vmem:[#allocation3 + $0x8] sm:$0xf0]  ;;  %v1888_v19 = vld [vmem:[#allocation3 + $0xc] sm:$0xf0]  ;;  %v1895_v1 = vor.u32 %v1986_v16, %v1894_v11  ;;  %1881 = vmatmul.msk.bf16.vlgmr.msrb.gmra.mxu2 %vm582_vm5, %v421_v12  ;;  %1882 = vmatmul.msk.bf16.vlgmr.msrb.gmra.mxu3 %vm582_vm5, %v421_v12 }
 0x10f   : > { %1039 = vst [vmem:[#allocation2] sm:$0x33] %v1035_v17  ;;  %v1887_v20 = vor.u32 %v1985_v18, %v1886_v14  ;;  %v1891_v21 = vor.u32 %v1984_v13, %v1888_v19 }
 0x110   : > { %991 = vmatpush.bf16.msra.mxu3 %v1895_v1  ;;  %1384 = vrot.lane.b32.xlu0 %v2252_v27, %s2062_s20  ;;  %v425_v27 = vld [vmem:[%s2483_s1 + $0x4] sm:$0xf] }
 0x111   : > { %965 = vmatpush.bf16.msra.mxu1 %v1887_v20  ;;  %978 = vmatpush.bf16.msra.mxu2 %v1891_v21  ;;  %v1455_v55 = vld.sshfl [vmem:[#allocation1] sm:$0xff pattern:$0x75643120] }
 0x112   : > { %v1049_v22 = vpop.permute.xlu1 %1048  ;;  %v1047_v23 = vpop.permute.xlu0 %1046  ;;  %1348 = vrot.lane.b32.xlu2 %v2240_v10, %s2060_s18  ;;  %1459 = vrot.lane.b32.xlu1 %v1455_v55, %s2065_s10  ;;  %s409_s18 = scalar_lea.vmem %s2490_s8, %s2133_s9 }
 0x113   : > { %v1051_v24 = vrot.slane %v1049_v22, 4  ;;  %v1050_v25 = vrot.slane %v1047_v23, 4  ;;  %v1103_v26 = vpop.permute.xlu2 %1102 }
 0x114   : > { %1896 = vmatmul.msk.bf16.vlgmr.msra.gmra.mxu1 %vm582_vm5, %v425_v27  ;;  %v1106_v49 = vrot.slane %v1103_v26, 4 }
 0x115   : > { %v1054_v28 = vsel %vm498_vm2, %v1049_v22, %v1051_v24  ;;  %v1052_v29 = vsel %vm458_vm1, %v1050_v25, %v1051_v24 }
 0x116   : > { %1058 = vst [vmem:[#allocation3 + $0x8] sm:$0x3] %v1054_v28  ;;  %v1053_v30 = vsel %vm498_vm2, %v1047_v23, %v1052_v29  ;;  %v1457_v29 = vld.sshfl [vmem:[#allocation1 + $0x8] sm:$0xff pattern:$0x75643120] }
 0x117   : > { %1057 = vst [vmem:[#allocation3] sm:$0x33] %v1053_v30 }
 0x118   : > { %1422 = vrot.lane.b32.xlu0 %v2279_v53, %s2064_s22 }
 0x11a   : > { %v1068_v10 = vpop.permute.xlu1 %1067  ;;  %v1066_v31 = vpop.permute.xlu0 %1065  ;;  %1420 = vrot.lane.b32.xlu2 %v2277_v52, %s2064_s22 }
 0x11b   : > { %v1070_v32 = vrot.slane %v1068_v10, 4  ;;  %v1069_v33 = vrot.slane %v1066_v31, 4  ;;  %v1124_v34 = vpop.permute.xlu2 %1123 }
 0x11c   : > { %v1126_v35 = vrot.slane %v1124_v34, 4 }
 0x11d   : > { %v1073_v36 = vsel %vm536_vm3, %v1068_v10, %v1070_v32  ;;  %v1071_v37 = vsel %vm458_vm1, %v1069_v33, %v1070_v32 }
 0x11e   : > { %1077 = vst [vmem:[#allocation2 + $0x8] sm:$0xc] %v1073_v36  ;;  %v1072_v38 = vsel %vm536_vm3, %v1066_v31, %v1071_v37  ;;  %v1129_v39 = vsel %vm1109_vm7, %v1124_v34, %v1126_v35  ;;  %1897 = vmatmul.msk.bf16.vlgmr.msra.gmra.mxu2 %vm582_vm5, %v425_v27  ;;  %1898 = vmatmul.msk.bf16.vlgmr.msra.gmra.mxu3 %vm582_vm5, %v425_v27 }
 0x11f   : > { %1076 = vst [vmem:[#allocation2] sm:$0xcc] %v1072_v38 }
 0x120   : > { %1133 = vst [vmem:[#allocation3 + $0x14] sm:$0x3] %v1129_v39  ;;  %631 = vperm.xlu0 %2033, %v428_v5   ;;  %v426_v39 = vld [vmem:[%s2483_s1 + $0x8] sm:$0xf] }
 0x122   : > { %v1087_v41 = vpop.permute.xlu0 %1086  ;;  %1461 = vrot.lane.b32.xlu2 %v1457_v29, %s2065_s10 }
 0x123   : > { %v1089_v42 = vrot.slane %v1087_v41, 4  ;;  %v1143_v43 = vpop.permute.xlu2 %1142 }
 0x124   : > { %v1145_v44 = vrot.slane %v1143_v43, 4 }
 0x125   : > { %v1090_v45 = vsel %vm458_vm1, %v1088_v40, %v1089_v42  ;;  %v1092_v46 = vsel %vm536_vm3, %v1087_v41, %v1089_v42  ;;  %v1913_v58 = vld [vmem:[#allocation2 + $0x8] sm:$0xf] }
 0x126   : > { %v1091_v47 = vsel %vm536_vm3, %v2294_v8, %v1090_v45  ;;  %1096 = vst [vmem:[#allocation3 + $0x8] sm:$0xc] %v1092_v46  ;;  %v1149_v48 = vsel %vm1147_vm8, %v1143_v43, %v1145_v44  ;;  %v1905_v14 = vld [vmem:[#allocation2] sm:$0xf]  ;;  %v1987_v15 = vld [vmem:[#allocation2 + $0x4] sm:$0xf] }
 0x127   : > { %1095 = vst [vmem:[#allocation3] sm:$0xcc] %v1091_v47 }
 0x128   : > { %1153 = vst [vmem:[#allocation2 + $0x14] sm:$0xc] %v1149_v48 }
 0x12a   : > { %v1105_v50 = vpop.permute.xlu0 %1104 }
 0x12b   : > { %v1107_v51 = vrot.slane %v1105_v50, 4 }
 0x12d   : > { %v1108_v52 = vsel %vm458_vm1, %v1106_v49, %v1107_v51  ;;  %v1111_v53 = vsel %vm1109_vm7, %v1105_v50, %v1107_v51 }
 0x12e   : > { %v1110_v54 = vsel %vm1109_vm7, %v1103_v26, %v1108_v52  ;;  %1115 = vst [vmem:[#allocation2 + $0x14] sm:$0x3] %v1111_v53  ;;  %v1928_v26 = vld [vmem:[#allocation3 + $0x8] sm:$0xf]  ;;  %v1920_v30 = vld [vmem:[#allocation3] sm:$0xf] }
 0x12f   : > { %1114 = vst [vmem:[#allocation2 + $0xc] sm:$0x33] %v1110_v54  ;;  %v1990_v27 = vld [vmem:[#allocation3 + $0x4] sm:$0xf]  ;;  %v429_v54 = vld [vmem:[%s2485_s3] sm:$0x7] }
 0x130   : > { %v2379_v55 = vperm.slane %v429_v54, 0 }
 0x132   : > { %v1122_v56 = vpop.permute.xlu1 %1121  ;;  %v1329_v63 = vpop.permute.xlu2 %1328 }
 0x133   : > { %v1125_v57 = vrot.slane %v1122_v56, 4  ;;  %v1332_v24 = vrot.slane %v1329_v63, 4 }
 0x135   : > { %v1127_v59 = vsel %vm458_vm1, %v1125_v57, %v1126_v35  ;;  %v1989_v60 = vld [vmem:[#allocation2 + $0x10] sm:$0xf0]  ;;  %v2381_v57 = vperm.slane %v429_v54, 1 }
 0x136   : > { %v1128_v0 = vsel %vm1109_vm7, %v1122_v56, %v1127_v59  ;;  %v1914_v61 = vor.u32 %v1989_v60, %v1913_v58 }
 0x137   : > { %1132 = vst [vmem:[#allocation3 + $0xc] sm:$0x33] %v1128_v0 }
 0x138   : > { %1229 = vmatpush.bf16.msrb.mxu2 %v1914_v61 }
 0x13a   : > { %v1141_v2 = vpop.permute.xlu1 %1140 }
 0x13b   : > { %v1144_v3 = vrot.slane %v1141_v2, 4  ;;  %1917 = vmatmul.msk.bf16.vlgmr.msrb.gmra.mxu2 %vm582_vm5, %v422_v62 }
 0x13d   : > { %v1146_v6 = vsel %vm458_vm1, %v1144_v3, %v1145_v44 }
 0x13e   : > { %v1148_v7 = vsel %vm1147_vm8, %v1141_v2, %v1146_v6  ;;  %v2386_v2 = vperm.slane %v429_v54, 2 }
 0x13f   : > { %1152 = vst [vmem:[#allocation2 + $0xc] sm:$0xcc] %v1148_v7 }
 0x142   : > { %v1163_v8 = vpop.permute.xlu1 %1162  ;;  %v1161_v9 = vpop.permute.xlu0 %1160 }
 0x143   : > { %v1165_v11 = vrot.slane %v1163_v8, 4  ;;  %v1164_v12 = vrot.slane %v1161_v9, 4  ;;  %v1368_v13 = vpop.permute.xlu2 %1367 }
 0x144   : > { %v1370_v16 = vrot.slane %v1368_v13, 4 }
 0x145   : > { %v1168_v17 = vsel %vm1147_vm8, %v1163_v8, %v1165_v11  ;;  %v1166_v18 = vsel %vm458_vm1, %v1164_v12, %v1165_v11 }
 0x146   : > { %1172 = vst [vmem:[#allocation3 + $0x14] sm:$0xc] %v1168_v17  ;;  %v1167_v19 = vsel %vm1147_vm8, %v1161_v9, %v1166_v18  ;;  %v1988_v1 = vld [vmem:[#allocation2 + $0x8] sm:$0xf0]  ;;  %v1907_v20 = vld [vmem:[#allocation2 + $0xc] sm:$0xf0]  ;;  %v1373_v21 = vsel %vm847_vm6, %v1368_v13, %v1370_v16 }
 0x147   : > { %1171 = vst [vmem:[#allocation3 + $0xc] sm:$0xcc] %v1167_v19  ;;  %v1906_v22 = vor.u32 %v1988_v1, %v1905_v14  ;;  %v1910_v23 = vor.u32 %v1987_v15, %v1907_v20 }
 0x148   : > { %1377 = vst [vmem:[#allocation2 + $0x8] sm:$0xc] %v1373_v21 }
 0x149   : > { %1203 = vmatpush.bf16.msrb.mxu0 %v1906_v22  ;;  %1216 = vmatpush.bf16.msrb.mxu1 %v1910_v23 }
 0x14a   : > { %v1331_v25 = vpop.permute.xlu0 %1330 }
 0x14b   : > { %v1333_v28 = vrot.slane %v1331_v25, 4  ;;  %v595_v51 = vpop.f32.mrf.mxu0 }
 0x14c   : > { %1915 = vmatmul.msk.bf16.vlgmr.msrb.gmra.mxu0 %vm582_vm5, %v422_v62  ;;  %1916 = vmatmul.msk.bf16.vlgmr.msrb.gmra.mxu1 %vm582_vm5, %v422_v62  ;;  %v608_v52 = vpop.f32.mrf.mxu1  ;;  %v707_v61 = vmul.f32 %v2379_v55, %v595_v51 }
 0x14d   : > { %v1992_v10 = vld [vmem:[#allocation3 + $0x10] sm:$0xf0]  ;;  %v1334_v31 = vsel %vm458_vm1, %v1332_v24, %v1333_v28  ;;  %v1336_v32 = vsel %vm536_vm3, %v1331_v25, %v1333_v28  ;;  %v692_v53 = vpack.c.bf16 %v608_v52, %v595_v51 }
 0x14e   : > { %v1991_v33 = vld [vmem:[#allocation3 + $0x8] sm:$0xf0]  ;;  %v1922_v34 = vld [vmem:[#allocation3 + $0xc] sm:$0xf0]  ;;  %v1929_v35 = vor.u32 %v1992_v10, %v1928_v26  ;;  %v1335_v36 = vsel %vm536_vm3, %v1329_v63, %v1334_v31  ;;  %1340 = vst [vmem:[#allocation2 + $0x8] sm:$0x3] %v1336_v32  ;;  %v708_v63 = vmul.f32 %v2381_v57, %v608_v52  ;;  %v715_v5 = vmul.f32 %v707_v61, %v707_v61 }
 0x14f   : > { %v1921_v37 = vor.u32 %v1991_v33, %v1920_v30  ;;  %v1925_v38 = vor.u32 %v1990_v27, %v1922_v34  ;;  %1339 = vst [vmem:[#allocation2] sm:$0x33] %v1335_v36  ;;  %v423_v36 = vld [vmem:[%s2482_s0 + $0xc] sm:$0xf] }
 0x150   : > { %1291 = vmatpush.bf16.msra.mxu1 %v1929_v35  ;;  %694 = vst [vmem:[%s2373_s24] sm:$0xff] %v692_v53  ;;  %v716_v11 = vmul.f32 %v708_v63, %v708_v63 }
 0x151   : > { %1265 = vmatpush.bf16.msrb.mxu3 %v1921_v37  ;;  %1278 = vmatpush.bf16.msra.mxu0 %v1925_v38  ;;  %v621_v56 = vpop.f32.mrf.mxu2 }
 0x152   : > { %v693_v58 = vpack.c.bf16 %v621_v56, %v621_v56  ;;  %v709_v12 = vmul.f32 %v2386_v2, %v621_v56  ;;  %v718_v19 = vadd.f32 %v716_v11, %v715_v5 }
 0x153   : > { %v597_v60 = vpop.f32.mrf.mxu0 }
 0x154   : > { %1930 = vmatmul.msk.bf16.vlgmr.msrb.gmra.mxu3 %vm582_vm5, %v426_v39  ;;  %695 = vst [vmem:[%s2373_s24 + $0x8] sm:$0xf] %v693_v58  ;;  %v610_v0 = vpop.f32.mrf.mxu1  ;;  %v717_v18 = vmul.f32 %v709_v12, %v709_v12 }
 0x155   : > { %v1947_v22 = vld [vmem:[#allocation2 + $0x8] sm:$0xf] }
 0x156   : > { %v719_v21 = vadd.f32 %v718_v19, %v717_v18 }
 0x158   : > { %720 = vadd.xlane.f32.xlu2 %v719_v21 }
 0x159   : > { %v623_v6 = vpop.f32.mrf.mxu2  ;;  %v2388_v7 = vpop.f32.mrf.mxu3 }
 0x15a   : > { %v1366_v40 = vpop.permute.xlu1 %1365 }
 0x15b   : > { %v1369_v41 = vrot.slane %v1366_v40, 4  ;;  %v2394_v14 = vpop.f32.mrf.mxu0 }
 0x15c   : > { %1931 = vmatmul.msk.bf16.vlgmr.msra.gmra.mxu0 %vm582_vm5, %v426_v39  ;;  %1932 = vmatmul.msk.bf16.vlgmr.msra.gmra.mxu1 %vm582_vm5, %v426_v39  ;;  %v2396_v15 = vpop.f32.mrf.mxu1  ;;  %v710_v39 = vadd.f32 %v708_v63, %v707_v61 }
 0x15d   : > { %v1371_v42 = vsel %vm458_vm1, %v1369_v41, %v1370_v16 }
 0x15e   : > { %v1372_v43 = vsel %vm847_vm6, %v1366_v40, %v1371_v42  ;;  %v711_v42 = vadd.f32 %v710_v39, %v709_v12 }
 0x15f   : > { %1376 = vst [vmem:[#allocation2] sm:$0xcc] %v1372_v43 }
 0x160   : > { %712 = vadd.xlane.f32.xlu1 %v711_v42  ;;  %v427_v42 = vld [vmem:[%s2483_s1 + $0xc] sm:$0xf] }
 0x161   : > { %v664_v24 = vpop.f32.mrf.mxu3 }
 0x163   : > { %v677_v32 = vpop.f32.mrf.mxu0 }
 0x164   : > { %v1440_v59 = vpop.permute.xlu2 %1439  ;;  %v690_v35 = vpop.f32.mrf.mxu1 }
 0x165   : > { %v1443_v62 = vrot.slane %v1440_v59, 4 }
 0x166   : > { %v1939_v23 = vld [vmem:[#allocation2] sm:$0xf]  ;;  %v1993_v29 = vld [vmem:[#allocation2 + $0x4] sm:$0xf] }
 0x16a   : > { %v1405_v44 = vpop.permute.xlu1 %1404  ;;  %v1403_v45 = vpop.permute.xlu0 %1402 }
 0x16b   : > { %v1407_v46 = vrot.slane %v1405_v44, 4  ;;  %v1406_v47 = vrot.slane %v1403_v45, 4 }
 0x16c   : > { %v1349_v17 = vpop.permute.xlu2 %1348 }
 0x16d   : > { %v1410_v48 = vsel %vm1147_vm8, %v1405_v44, %v1407_v46  ;;  %v1408_v49 = vsel %vm458_vm1, %v1406_v47, %v1407_v46  ;;  %v1351_v20 = vrot.slane %v1349_v17, 4 }
 0x16e   : > { %1414 = vst [vmem:[#allocation2 + $0x14] sm:$0x3] %v1410_v48  ;;  %v1409_v50 = vsel %vm1147_vm8, %v1403_v45, %v1408_v49 }
 0x16f   : > { %1413 = vst [vmem:[#allocation2 + $0xc] sm:$0x33] %v1409_v50  ;;  %v1354_v26 = vsel %vm536_vm3, %v1349_v17, %v1351_v20 }
 0x170   : > { %1358 = vst [vmem:[#allocation3 + $0x8] sm:$0x3] %v1354_v26 }
 0x172   : > { %v1347_v16 = vpop.permute.xlu1 %1346 }
 0x173   : > { %v1350_v1 = vrot.slane %v1347_v16, 4 }
 0x174   : > { %v1421_v58 = vpop.permute.xlu2 %1420 }
 0x175   : > { %v1352_v25 = vsel %vm458_vm1, %v1350_v1, %v1351_v20 }
 0x176   : > { %v1353_v30 = vsel %vm536_vm3, %v1347_v16, %v1352_v25 }
 0x177   : > { %1357 = vst [vmem:[#allocation3] sm:$0x33] %v1353_v30 }
 0x17a   : > { %v1442_v3 = vpop.permute.xlu0 %1441 }
 0x17b   : > { %v1444_v4 = vrot.slane %v1442_v3, 4  ;;  %v1387_v37 = vpop.permute.xlu1 %1386 }
 0x17c   : > { %v1389_v40 = vrot.slane %v1387_v37, 4  ;;  %v1462_v11 = vpop.permute.xlu2 %1461 }
 0x17d   : > { %v1448_v8 = vsel %vm1446_vm9, %v1442_v3, %v1444_v4  ;;  %v1445_v9 = vsel %vm458_vm1, %v1443_v62, %v1444_v4  ;;  %v1424_v4 = vrot.slane %v1421_v58, 4  ;;  %v1464_v16 = vrot.slane %v1462_v11, 4 }
 0x17e   : > { %1452 = vst [vmem:[#allocation2 + $0x14] sm:$0xc] %v1448_v8  ;;  %v1447_v13 = vsel %vm1446_vm9, %v1440_v59, %v1445_v9  ;;  %v1392_v43 = vsel %vm847_vm6, %v1387_v37, %v1389_v40 }
 0x17f   : > { %1451 = vst [vmem:[#allocation2 + $0xc] sm:$0xcc] %v1447_v13 }
 0x180   : > { %1396 = vst [vmem:[#allocation3 + $0x8] sm:$0xc] %v1392_v43 }
 0x182   : > { %v1385_v38 = vpop.permute.xlu0 %1384 }
 0x183   : > { %v1388_v41 = vrot.slane %v1385_v38, 4 }
 0x184   : > { %v1460_v17 = vpop.permute.xlu1 %1459 }
 0x185   : > { %v1995_v28 = vld [vmem:[#allocation2 + $0x10] sm:$0xf0]  ;;  %v1390_v44 = vsel %vm458_vm1, %v1388_v41, %v1389_v40  ;;  %v1463_v19 = vrot.slane %v1460_v17, 4 }
 0x186   : > { %v1948_v27 = vor.u32 %v1995_v28, %v1947_v22  ;;  %v1994_v10 = vld [vmem:[#allocation2 + $0x8] sm:$0xf0]  ;;  %v1941_v31 = vld [vmem:[#allocation2 + $0xc] sm:$0xf0]  ;;  %v1391_v45 = vsel %vm847_vm6, %v1385_v38, %v1390_v44  ;;  %v1467_v22 = vsel %vm1446_vm9, %v1462_v11, %v1464_v16 }
 0x187   : > { %v1940_v33 = vor.u32 %v1994_v10, %v1939_v23  ;;  %v1944_v34 = vor.u32 %v1993_v29, %v1941_v31  ;;  %1395 = vst [vmem:[#allocation3] sm:$0xcc] %v1391_v45  ;;  %v1465_v23 = vsel %vm458_vm1, %v1463_v19, %v1464_v16  ;;  %v1962_v31 = vld [vmem:[#allocation3 + $0x8] sm:$0xf] }
 0x188   : > { %1528 = vmatpush.bf16.msrb.mxu0 %v1948_v27  ;;  %v1466_v24 = vsel %vm1446_vm9, %v1460_v17, %v1465_v23  ;;  %1471 = vst [vmem:[#allocation3 + $0x14] sm:$0xc] %v1467_v22 }
 0x189   : > { %1502 = vmatpush.bf16.msra.mxu2 %v1940_v33  ;;  %1515 = vmatpush.bf16.msra.mxu3 %v1944_v34  ;;  %v931_v46 = vpop.f32.mrf.mxu0  ;;  %1470 = vst [vmem:[#allocation3 + $0xc] sm:$0xcc] %v1466_v24 }
 0x18a   : > { %v998_v47 = vpack.c.bf16 %v931_v46, %v931_v46  ;;  %v1009_v62 = vmul.f32 %v931_v46, %v2386_v2  ;;  %v1423_v9 = vpop.permute.xlu0 %1422 }
 0x18b   : > { %1951 = vmatmul.msk.bf16.vlgmr.msrb.gmra.mxu0 %vm582_vm5, %v423_v36  ;;  %v1425_v13 = vrot.slane %v1423_v9, 4 }
 0x18c   : > { %1949 = vmatmul.msk.bf16.vlgmr.msra.gmra.mxu2 %vm582_vm5, %v423_v36  ;;  %1950 = vmatmul.msk.bf16.vlgmr.msra.gmra.mxu3 %vm582_vm5, %v423_v36  ;;  %1900 = vst [vmem:[%s2373_s24 + $0x14] sm:$0xf] %v998_v47  ;;  %v1017_v5 = vmul.f32 %v1009_v62, %v1009_v62 }
 0x18d   : > { %v1426_v1 = vsel %vm458_vm1, %v1424_v4, %v1425_v13  ;;  %v1428_v21 = vsel %vm1147_vm8, %v1423_v9, %v1425_v13 }
 0x18e   : > { %v1427_v20 = vsel %vm1147_vm8, %v1421_v58, %v1426_v1  ;;  %1432 = vst [vmem:[#allocation3 + $0x14] sm:$0x3] %v1428_v21  ;;  %v1996_v32 = vld [vmem:[#allocation3 + $0x4] sm:$0xf]  ;;  %v1954_v33 = vld [vmem:[#allocation3] sm:$0xf] }
 0x18f   : > { %1431 = vst [vmem:[#allocation3 + $0xc] sm:$0x33] %v1427_v20 }
 0x191   : > { %v905_v48 = vpop.f32.mrf.mxu2  ;;  %v918_v49 = vpop.f32.mrf.mxu3 }
 0x192   : > { %v997_v50 = vpack.c.bf16 %v918_v49, %v905_v48  ;;  %v967_v51 = vpop.f32.mrf.mxu1  ;;  %v933_v52 = vpop.f32.mrf.mxu0  ;;  %v1007_v59 = vmul.f32 %v905_v48, %v2379_v55  ;;  %v1008_v60 = vmul.f32 %v918_v49, %v2381_v57 }
 0x193   : > { %v2421_v25 = vpop.permute.xlu0 %631 }
 0x194   : > { %1899 = vst [vmem:[%s2373_s24 + $0xc] sm:$0xff] %v997_v50  ;;  %v1015_v61 = vmul.f32 %v1007_v59, %v1007_v59  ;;  %v1016_v63 = vmul.f32 %v1008_v60, %v1008_v60  ;;  %v1010_v3 = vadd.f32 %v1008_v60, %v1007_v59  ;;  %v663_v26 = vadd.f32 %v2388_v7, %v2421_v25 }
 0x195   : > { %v676_v28 = vadd.f32 %v2394_v14, %v2421_v25  ;;  %v689_v29 = vadd.f32 %v2396_v15, %v2421_v25  ;;  %v968_v27 = vadd.f32 %v967_v51, %v2421_v25  ;;  %v1998_v36 = vld [vmem:[#allocation3 + $0x10] sm:$0xf0] }
 0x196   : > { %v1018_v6 = vadd.f32 %v1016_v63, %v1015_v61  ;;  %v1011_v8 = vadd.f32 %v1010_v3, %v1009_v62  ;;  %v1956_v15 = vld [vmem:[#allocation3 + $0xc] sm:$0xf0]  ;;  %v1963_v38 = vor.u32 %v1998_v36, %v1962_v31  ;;  %v1997_v39 = vld [vmem:[#allocation3 + $0x8] sm:$0xf0] }
 0x197   : > { %v696_v30 = vpack.c.bf16 %v676_v28, %v663_v26  ;;  %v697_v34 = vpack.c.bf16 %v689_v29, %v689_v29  ;;  %v1959_v40 = vor.u32 %v1996_v32, %v1956_v15  ;;  %v1955_v41 = vor.u32 %v1997_v39, %v1954_v33 }
 0x198   : > { %v1019_v12 = vadd.f32 %v1018_v6, %v1017_v5  ;;  %1012 = vadd.xlane.f32.xlu0 %v1011_v8  ;;  %1590 = vmatpush.bf16.msrb.mxu3 %v1963_v38 }
 0x199   : > { %v907_v53 = vpop.f32.mrf.mxu2  ;;  %v920_v54 = vpop.f32.mrf.mxu3  ;;  %698 = vst [vmem:[%s2432_s14] sm:$0xff] %v696_v30  ;;  %1577 = vmatpush.bf16.msrb.mxu2 %v1959_v40  ;;  %1564 = vmatpush.bf16.msrb.mxu1 %v1955_v41 }
 0x19a   : > { %v969_v56 = vpop.f32.mrf.mxu1  ;;  %1020 = vadd.xlane.f32.xlu2 %v1019_v12  ;;  %699 = vst [vmem:[%s2432_s14 + $0x8] sm:$0xf] %v697_v34 }
 0x19c   : > { %1966 = vmatmul.msk.bf16.vlgmr.msrb.gmra.mxu3 %vm582_vm5, %v427_v42  ;;  %1965 = vmatmul.msk.bf16.vlgmr.msrb.gmra.mxu2 %vm582_vm5, %v427_v42 }
 0x19d   : > { %1964 = vmatmul.msk.bf16.vlgmr.msrb.gmra.mxu1 %vm582_vm5, %v427_v42 }
 0x1a1   : > { %v980_v0 = vpop.f32.mrf.mxu2  ;;  %v993_v7 = vpop.f32.mrf.mxu3 }
 0x1a2   : > { %v981_v10 = vadd.f32 %v980_v0, %v2421_v25  ;;  %v994_v14 = vadd.f32 %v993_v7, %v2421_v25 }
 0x1a4   : > { %v1002_v35 = vpack.c.bf16 %v981_v10, %v968_v27  ;;  %v1003_v37 = vpack.c.bf16 %v994_v14, %v994_v14 }
 0x1a6   : > { %1901 = vst [vmem:[%s2432_s14 + $0xc] sm:$0xff] %v1002_v35 }
 0x1a7   : > { %1902 = vst [vmem:[%s2432_s14 + $0x14] sm:$0xf] %v1003_v37 }
 0x1a9   : > { %v982_v18 = vpop.f32.mrf.mxu2  ;;  %v995_v43 = vpop.f32.mrf.mxu3 }
 0x1be   : > { %v1231_v44 = vpop.f32.mrf.mxu2 }
 0x1bf   : > { %v1298_v45 = vpack.c.bf16 %v1231_v44, %v1231_v44  ;;  %v1309_v47 = vmul.f32 %v1231_v44, %v2386_v2 }
 0x1c1   : > { %1934 = vst [vmem:[%s2373_s24 + $0x20] sm:$0xf] %v1298_v45  ;;  %v1317_v58 = vmul.f32 %v1309_v47, %v1309_v47 }
 0x1c6   : > { %v1233_v46 = vpop.f32.mrf.mxu2 }
 0x1c9   : > { %v1205_v48 = vpop.f32.mrf.mxu0  ;;  %v1218_v49 = vpop.f32.mrf.mxu1 }
 0x1ca   : > { %v1307_v50 = vmul.f32 %v1205_v48, %v2379_v55  ;;  %v1297_v51 = vpack.c.bf16 %v1218_v49, %v1205_v48  ;;  %v1308_v52 = vmul.f32 %v1218_v49, %v2381_v57 }
 0x1cb   : > { %v721_v39 = vpop.xlane.xlu2 %720 }
 0x1cc   : > { %v1315_v53 = vmul.f32 %v1307_v50, %v1307_v50  ;;  %1933 = vst [vmem:[%s2373_s24 + $0x18] sm:$0xff] %v1297_v51  ;;  %v1316_v54 = vmul.f32 %v1308_v52, %v1308_v52  ;;  %v1310_v56 = vadd.f32 %v1308_v52, %v1307_v50 }
 0x1ce   : > { %v1311_v59 = vadd.f32 %v1310_v56, %v1309_v47  ;;  %v1318_v60 = vadd.f32 %v1316_v54, %v1315_v53 }
 0x1d0   : > { %1312 = vadd.xlane.f32.xlu1 %v1311_v59  ;;  %v1319_v0 = vadd.f32 %v1318_v60, %v1317_v58 }
 0x1d1   : > { %v1207_v61 = vpop.f32.mrf.mxu0  ;;  %v1220_v62 = vpop.f32.mrf.mxu1 }
 0x1d2   : > { %1320 = vadd.xlane.f32.xlu2 %v1319_v0 }
 0x1d3   : > { %v713_v40 = vpop.xlane.xlu1 %712 }
 0x1d7   : > { %v1267_v63 = vpop.f32.mrf.mxu3 }
 0x1d8   : > { %v1268_v3 = vadd.f32 %v1267_v63, %v2421_v25 }
 0x1d9   : > { %v1280_v4 = vpop.f32.mrf.mxu0 }
 0x1da   : > { %v1281_v5 = vadd.f32 %v1280_v4, %v2421_v25 }
 0x1dc   : > { %v1302_v6 = vpack.c.bf16 %v1281_v5, %v1268_v3 }
 0x1de   : > { %1935 = vst [vmem:[%s2432_s14 + $0x18] sm:$0xff] %v1302_v6 }
 0x1df   : > { %v1269_v8 = vpop.f32.mrf.mxu3 }
 0x1e1   : > { %v1282_v9 = vpop.f32.mrf.mxu0 }
 0x208   : > { %v1530_v11 = vpop.f32.mrf.mxu0 }
 0x209   : > { %v1597_v12 = vpack.c.bf16 %v1530_v11, %v1530_v11  ;;  %v1608_v13 = vmul.f32 %v1530_v11, %v2386_v2 }
 0x20b   : > { %1968 = vst [vmem:[%s2373_s24 + $0x2c] sm:$0xf] %v1597_v12  ;;  %v1616_v24 = vmul.f32 %v1608_v13, %v1608_v13  ;;  %v1013_v44 = vpop.xlane.xlu0 %1012 }
 0x20c   : > { %v1014_v46 = vadd.f32 %v1013_v44, %v713_v40 }
 0x20d   : > { %v1021_v41 = vpop.xlane.xlu2 %1020 }
 0x20e   : > { %v1022_v45 = vadd.f32 %v1021_v41, %v721_v39 }
 0x20f   : > { %v1504_v16 = vpop.f32.mrf.mxu2  ;;  %v1517_v17 = vpop.f32.mrf.mxu3 }
 0x210   : > { %v1606_v18 = vmul.f32 %v1504_v16, %v2379_v55  ;;  %v1596_v19 = vpack.c.bf16 %v1517_v17, %v1504_v16  ;;  %v1607_v1 = vmul.f32 %v1517_v17, %v2381_v57  ;;  %v1532_v20 = vpop.f32.mrf.mxu0  ;;  %v1293_v55 = vpop.f32.mrf.mxu1 }
 0x211   : > { %v1294_v27 = vadd.f32 %v1293_v55, %v2421_v25 }
 0x212   : > { %v1614_v21 = vmul.f32 %v1606_v18, %v1606_v18  ;;  %1967 = vst [vmem:[%s2373_s24 + $0x24] sm:$0xff] %v1596_v19  ;;  %v1615_v22 = vmul.f32 %v1607_v1, %v1607_v1  ;;  %v1609_v23 = vadd.f32 %v1607_v1, %v1606_v18 }
 0x213   : > { %v1303_v57 = vpack.c.bf16 %v1294_v27, %v1294_v27 }
 0x214   : > { %v1610_v26 = vadd.f32 %v1609_v23, %v1608_v13  ;;  %v1617_v28 = vadd.f32 %v1615_v22, %v1614_v21 }
 0x215   : > { %1936 = vst [vmem:[%s2432_s14 + $0x20] sm:$0xf] %v1303_v57 }
 0x216   : > { %1611 = vadd.xlane.f32.xlu1 %v1610_v26  ;;  %v1618_v29 = vadd.f32 %v1617_v28, %v1616_v24 }
 0x217   : > { %v1506_v30 = vpop.f32.mrf.mxu2  ;;  %v1519_v2 = vpop.f32.mrf.mxu3 }
 0x218   : > { %1619 = vadd.xlane.f32.xlu2 %v1618_v29  ;;  %v1295_v10 = vpop.f32.mrf.mxu1 }
 0x21f   : > { %v1592_v14 = vpop.f32.mrf.mxu3  ;;  %v1579_v32 = vpop.f32.mrf.mxu2 }
 0x220   : > { %v1566_v7 = vpop.f32.mrf.mxu1  ;;  %v1593_v33 = vadd.f32 %v1592_v14, %v2421_v25  ;;  %v1580_v34 = vadd.f32 %v1579_v32, %v2421_v25 }
 0x221   : > { %v1567_v31 = vadd.f32 %v1566_v7, %v2421_v25 }
 0x222   : > { %v1602_v35 = vpack.c.bf16 %v1593_v33, %v1593_v33 }
 0x223   : > { %v1601_v37 = vpack.c.bf16 %v1580_v34, %v1567_v31 }
 0x224   : > { %1970 = vst [vmem:[%s2432_s14 + $0x2c] sm:$0xf] %v1602_v35 }
 0x225   : > { %1969 = vst [vmem:[%s2432_s14 + $0x24] sm:$0xff] %v1601_v37 }
 0x227   : > { %v1594_v15 = vpop.f32.mrf.mxu3  ;;  %v1581_v38 = vpop.f32.mrf.mxu2 }
 0x228   : > { %v1568_v36 = vpop.f32.mrf.mxu1 }
 0x243   : > { %v1313_v42 = vpop.xlane.xlu1 %1312 }
 0x244   : > { %v1314_v48 = vadd.f32 %v1313_v42, %v1014_v46 }
 0x245   : > { %v1321_v43 = vpop.xlane.xlu2 %1320 }
 0x246   : > { %v1322_v49 = vadd.f32 %v1321_v43, %v1022_v45 }
 0x289   : > { %v1612_v47 = vpop.xlane.xlu1 %1611 }
 0x28a   : > { %v1613_v50 = vadd.f32 %v1612_v47, %v1314_v48 }
 0x28b   : > { %v1620_v25 = vpop.xlane.xlu2 %1619 }
 0x28c   : > { %v1621_v51 = vadd.f32 %v1620_v25, %v1322_v49 }
 0x28e   : > { %v1623_v52 = vsel %vm1622_vm10, %v1613_v50, %v1621_v51 }
 0x28f   : > { %1625 = vst.msk [vmem:[%s409_s18] sm:$0xff] %vm1624_vm11, %v1623_v52 }
 0x290 PF: > { %s19_s29 = sadd.s32 1, %s2056_s29   ;;  %s2491_s27 = smov %s2052_s28 }
 0x291   : > { %p16_p5 = scmp.ge.s32.totalorder %s19_s29, 4   ;;  %s2492_s28 = smov %s2494_s30 }
 0x293   :  { %18 = sbr.rel (!%p16_p5) target bundleno = 2 (0x2), region = 128 }

</bundles_post_ra>
